<compile_context>
chip_gen: v5e
topology: v5e:2x2
jax: 0.10.0
libtpu: 0.0.40
codegen_flags: <defaults>
</compile_context>

<pallas_src>
import jax
import jax.numpy as jnp
from jax import lax
from jax.experimental import pallas as pl
from jax.experimental.pallas import tpu as pltpu


# ---------------------------------------------------------------------------
# Hyper-parameters (the `args` object of the original script).
# ---------------------------------------------------------------------------
B = 8                       # batch (>=8 fills the sublane dim; per review)
T = 16                      # sequence length
IN_CHANNEL = 4              # args.in_channel
CONV1_OUT = 8               # args.conv1d_1_out_channels (== conv1d_2_in_channels)
CONV2_OUT = 16              # args.conv1d_2_out_channels (== lstm1_input_size)
CONV_K = 3                  # kernel_size for both convs
CONV_PAD = 1                # padding for both convs
LSTM_HIDDEN = 32            # args.lstm1_hidden_size
LSTM_LAYERS = 2             # args.lstm1_num_layers
OUT_CHANNEL = 8             # args.ow

# Row offsets inside the packed 128-lane weight slab `wg` (all 4H = 128 wide).
OFF_W2F = 0                                   # conv2 (folded w/ W_ih0): K*C1 rows
OFF_WHH0 = OFF_W2F + CONV_K * CONV1_OUT       # 24  : W_hh layer 0, H rows
OFF_WCAT1 = OFF_WHH0 + LSTM_HIDDEN            # 56  : [W_ih1; W_hh1], 2H rows
OFF_B2F = OFF_WCAT1 + 2 * LSTM_HIDDEN         # 120 : folded conv2/gate bias, 1 row
OFF_BG1 = OFF_B2F + 1                         # 121 : layer-1 gate bias, 1 row
WG_ROWS = OFF_BG1 + 1                         # 122


# ---------------------------------------------------------------------------
# Fused Pallas kernel
# ---------------------------------------------------------------------------
def fused_kernel(x_ref,                      # (T*B, Cin)  time-major, flattened
                 w1_ref, b1_ref,             # (K, Cin, C1), (1, C1)
                 wg_ref,                     # (WG_ROWS, 4H) packed weight slab
                 wd_ref, bd_ref,             # (H, OUT), (1, OUT)
                 o_ref,                      # (B, OUT)
                 xpad_sc,                    # ((T+2P)*B, Cin) scratch
                 c1pad_sc,                   # ((T+2P)*B, C1)  scratch
                 g0_sc):                     # (T*B, 4H)       scratch
    H = LSTM_HIDDEN
    G = 4 * H
    Bq = o_ref.shape[0]
    TB = g0_sc.shape[0]
    Tq = TB // Bq
    K = w1_ref.shape[0]
    C1 = w1_ref.shape[2]
    PB = CONV_PAD * Bq                       # padded boundary rows per side

    # ------------------ Conv1d #1: per-tap matmuls on aligned slices -------
    xpad_sc[0:PB] = jnp.zeros((PB, xpad_sc.shape[1]), jnp.float32)
    xpad_sc[PB + TB:PB + TB + PB] = jnp.zeros((PB, xpad_sc.shape[1]), jnp.float32)
    xpad_sc[PB:PB + TB] = x_ref[...]
    acc1 = jnp.zeros((TB, C1), jnp.float32)
    for k in range(K):                       # static unroll over kernel taps
        acc1 = acc1 + jnp.dot(xpad_sc[k * Bq:k * Bq + TB], w1_ref[k],
                              preferred_element_type=jnp.float32)
    conv1 = acc1 + b1_ref[...]               # (T*B, C1)

    # --------- Conv1d #2 folded with LSTM layer-0 input projection ---------
    c1pad_sc[0:PB] = jnp.zeros((PB, C1), jnp.float32)
    c1pad_sc[PB + TB:PB + TB + PB] = jnp.zeros((PB, C1), jnp.float32)
    c1pad_sc[PB:PB + TB] = conv1
    acc2 = jnp.zeros((TB, G), jnp.float32)
    for k in range(K):
        acc2 = acc2 + jnp.dot(
            c1pad_sc[k * Bq:k * Bq + TB],
            wg_ref[OFF_W2F + k * C1:OFF_W2F + (k + 1) * C1],
            preferred_element_type=jnp.float32)
    # (T*B, 4H) layer-0 gate pre-activations (bias already includes b2@Wih0+bg0)
    g0_sc[...] = acc2 + wg_ref[OFF_B2F:OFF_B2F + 1]

    # ------------- Hoisted recurrent weights & gate-activation affine ------
    whh0 = wg_ref[OFF_WHH0:OFF_WHH0 + H]               # (H, 4H)
    wcat1 = wg_ref[OFF_WCAT1:OFF_WCAT1 + 2 * H]        # (2H, 4H) = [W_ih1; W_hh1]
    bg1 = wg_ref[OFF_BG1:OFF_BG1 + 1]                  # (1, 4H)
    lane = lax.broadcasted_iota(jnp.int32, (1, G), 1)
    is_g = lane >= 3 * H                               # gate order [i, f, o, g]
    gsc = jnp.where(is_g, 2.0, 1.0).astype(jnp.float32)
    gof = jnp.where(is_g, -1.0, 0.0).astype(jnp.float32)

    def cell(gates, c):
        # g-gate columns were pre-scaled by 2 offline, so a single full-width
        # sigmoid + hoisted affine gives sigmoid on i/f/o and tanh on g.
        a = jax.nn.sigmoid(gates) * gsc + gof
        i_g = a[:, 0 * H:1 * H]
        f_g = a[:, 1 * H:2 * H]
        o_g = a[:, 2 * H:3 * H]
        g_g = a[:, 3 * H:4 * H]
        c_new = f_g * c + i_g * g_g
        h_new = o_g * jnp.tanh(c_new)
        return h_new, c_new

    # --------- Two-layer LSTM, software-pipelined (T+1 interleaved steps) --
    h0 = jnp.zeros((Bq, H), jnp.float32)     # zero initial states (PyTorch)
    c0 = jnp.zeros((Bq, H), jnp.float32)
    h1 = jnp.zeros((Bq, H), jnp.float32)
    c1 = jnp.zeros((Bq, H), jnp.float32)
    for s in range(Tq + 1):                  # static unroll: T small & fixed
        if s < Tq:                           # layer-0 step s (uses old h0)
            gates0 = g0_sc[s * Bq:(s + 1) * Bq] + jnp.dot(
                h0, whh0, preferred_element_type=jnp.float32)
        if s >= 1:                           # layer-1 step s-1 (uses old h0, h1)
            gates1 = jnp.dot(jnp.concatenate([h0, h1], axis=-1), wcat1,
                             preferred_element_type=jnp.float32) + bg1
        if s < Tq:
            h0, c0 = cell(gates0, c0)
        if s >= 1:
            h1, c1 = cell(gates1, c1)

    # ------------------- dense2 on hidden[-1] of the last layer ------------
    o_ref[...] = jnp.dot(h1, wd_ref[...],
                         preferred_element_type=jnp.float32) + bd_ref[...]


# ---------------------------------------------------------------------------
# Wrapper
# ---------------------------------------------------------------------------
_VMEM = pl.BlockSpec(memory_space=pltpu.MemorySpace.VMEM)


def conv1d_lstm_forward(x, packed):
    # x: (B, T, IN_CHANNEL) -- PyTorch batch_first input (pre-transpose).
    Bq, Tq, Cin = x.shape
    # Only wrapper glue: time-major flatten (row index = t*B + b).
    x2 = jnp.transpose(x, (1, 0, 2)).reshape(Tq * Bq, Cin)
    args = (x2, packed["w1"], packed["b1"], packed["wg"],
            packed["wd"], packed["bd"])
    return pl.pallas_call(
        fused_kernel,
        out_shape=jax.ShapeDtypeStruct((Bq, OUT_CHANNEL), jnp.float32),
        in_specs=[_VMEM] * len(args),
        out_specs=_VMEM,
        scratch_shapes=[
            pltpu.VMEM(((Tq + 2 * CONV_PAD) * Bq, IN_CHANNEL), jnp.float32),
            pltpu.VMEM(((Tq + 2 * CONV_PAD) * Bq, CONV1_OUT), jnp.float32),
            pltpu.VMEM((Tq * Bq, 4 * LSTM_HIDDEN), jnp.float32),
        ],
    )(*args)


# ---------------------------------------------------------------------------
# Offline weight preparation (gate reorder, conv2 <- W_ih0 fold, g-gate 2x
# scale, packing into one lane-dense slab).
# ---------------------------------------------------------------------------
def _reorder_gates(w):
    """Packed gate axis: PyTorch [i, f, g, o] -> kernel order [i, f, o, g]."""
    H = LSTM_HIDDEN
    return jnp.concatenate(
        [w[..., 0:2 * H], w[..., 3 * H:4 * H], w[..., 2 * H:3 * H]], axis=-1)


def pack_params(p):
    H = LSTM_HIDDEN
    hp = jax.lax.Precision.HIGHEST
    (wih0, whh0, bg0), (wih1, whh1, bg1) = p["lstm"]
    wih0, whh0, bg0 = map(_reorder_gates, (wih0, whh0, bg0))
    wih1, whh1, bg1 = map(_reorder_gates, (wih1, whh1, bg1))

    # Exact linear fold of conv2 with the layer-0 input projection.
    w2f = jnp.einsum("kcd,dg->kcg", p["w2"], wih0, precision=hp)   # (K, C1, 4H)
    b2f = jnp.dot(p["b2"], wih0, precision=hp) + bg0               # (4H,)
    wcat1 = jnp.concatenate([wih1, whh1], axis=0)                  # (2H, 4H)

    # Bake the 2x of tanh(x) = 2*sigmoid(2x) - 1 into the g-gate columns.
    gscale = jnp.concatenate([jnp.ones((3 * H,), jnp.float32),
                              jnp.full((H,), 2.0, jnp.float32)])
    w2f = w2f * gscale
    b2f = b2f * gscale
    whh0 = whh0 * gscale
    wcat1 = wcat1 * gscale
    bg1 = bg1 * gscale

    wg = jnp.concatenate([
        w2f.reshape(CONV_K * CONV1_OUT, 4 * H),   # rows [OFF_W2F,  +K*C1)
        whh0,                                     # rows [OFF_WHH0, +H)
        wcat1,                                    # rows [OFF_WCAT1,+2H)
        b2f.reshape(1, 4 * H),                    # row  OFF_B2F
        bg1.reshape(1, 4 * H),                    # row  OFF_BG1
    ], axis=0)
    assert wg.shape[0] == WG_ROWS, wg.shape

    return {
        "w1": p["w1"],
        "b1": p["b1"].reshape(1, -1),
        "wg": wg,
        "wd": p["wd2"],
        "bd": p["bd2"].reshape(1, -1),
    }


# ---------------------------------------------------------------------------
# Parameter construction (deterministic, PyTorch-default-style uniform init,
# packed gate order [i, f, g, o] exactly as PyTorch stores it).
# ---------------------------------------------------------------------------
def _uniform(key, shape, fan_in):
    bound = 1.0 / jnp.sqrt(jnp.float32(fan_in))
    return jax.random.uniform(key, shape, jnp.float32, -bound, bound)


def init_params(key):
    keys = jax.random.split(key, 16)
    p = {}
    # conv weights stored as (K, C_in, C_out); fan_in = C_in * K
    p["w1"] = _uniform(keys[0], (CONV_K, IN_CHANNEL, CONV1_OUT), IN_CHANNEL * CONV_K)
    p["b1"] = _uniform(keys[1], (CONV1_OUT,), IN_CHANNEL * CONV_K)
    p["w2"] = _uniform(keys[2], (CONV_K, CONV1_OUT, CONV2_OUT), CONV1_OUT * CONV_K)
    p["b2"] = _uniform(keys[3], (CONV2_OUT,), CONV1_OUT * CONV_K)
    # LSTM layers: w_ih (D_in, 4H), w_hh (H, 4H), combined bias (4H,), [i,f,g,o]
    p["lstm"] = []
    kidx = 4
    for layer in range(LSTM_LAYERS):
        d_in = CONV2_OUT if layer == 0 else LSTM_HIDDEN
        w_ih = _uniform(keys[kidx + 0], (d_in, 4 * LSTM_HIDDEN), LSTM_HIDDEN)
        w_hh = _uniform(keys[kidx + 1], (LSTM_HIDDEN, 4 * LSTM_HIDDEN), LSTM_HIDDEN)
        b_ih = _uniform(keys[kidx + 2], (4 * LSTM_HIDDEN,), LSTM_HIDDEN)
        b_hh = _uniform(keys[kidx + 3], (4 * LSTM_HIDDEN,), LSTM_HIDDEN)
        p["lstm"].append((w_ih, w_hh, b_ih + b_hh))
        kidx += 4
    # dense2: stored as (H, out) (transpose of PyTorch (out, H))
    p["wd2"] = _uniform(keys[kidx], (LSTM_HIDDEN, OUT_CHANNEL), LSTM_HIDDEN)
    p["bd2"] = _uniform(keys[kidx + 1], (OUT_CHANNEL,), LSTM_HIDDEN)
    # NOTE: dense1 / dropout exist in the PyTorch module but are unused in forward.
    return p


# ---------------------------------------------------------------------------
# Pure-JAX reference mirroring the PyTorch forward (for correctness check).
# ---------------------------------------------------------------------------
def reference_forward(x, p):
    hp = jax.lax.Precision.HIGHEST
    Bq, Tq, _ = x.shape
    H = LSTM_HIDDEN

    def conv(xin, w, b):                       # xin: (T, B, C), w: (K, Cin, Cout)
        P, K = CONV_PAD, w.shape[0]
        xp = jnp.pad(xin, ((P, P), (0, 0), (0, 0)))
        out = sum(jnp.einsum("tbc,cd->tbd", xp[k:k + Tq], w[k], precision=hp)
                  for k in range(K))
        return out + b

    x_tm = jnp.transpose(x, (1, 0, 2))
    c2 = conv(conv(x_tm, p["w1"], p["b1"]), p["w2"], p["b2"])

    def lstm_layer(seq, wih, whh, bg):         # PyTorch gate order [i, f, g, o]
        h = jnp.zeros((Bq, H), jnp.float32)
        c = jnp.zeros((Bq, H), jnp.float32)
        hs = []
        for t in range(Tq):
            g = (jnp.dot(seq[t], wih, precision=hp)
                 + jnp.dot(h, whh, precision=hp) + bg)
            i = jax.nn.sigmoid(g[:, 0:H])
            f = jax.nn.sigmoid(g[:, H:2 * H])
            gg = jnp.tanh(g[:, 2 * H:3 * H])
            o = jax.nn.sigmoid(g[:, 3 * H:4 * H])
            c = f * c + i * gg
            h = o * jnp.tanh(c)
            hs.append(h)
        return jnp.stack(hs), h

    (wih0, whh0, bg0), (wih1, whh1, bg1) = p["lstm"]
    h0seq, _ = lstm_layer(c2, wih0, whh0, bg0)
    _, h_last = lstm_layer(h0seq, wih1, whh1, bg1)
    return jnp.dot(h_last, p["wd2"], precision=hp) + p["bd2"]


if __name__ == "__main__":
    key = jax.random.PRNGKey(0)
    k_x, k_p = jax.random.split(key)
    x = jax.random.normal(k_x, (B, T, IN_CHANNEL), jnp.float32)
    params = init_params(k_p)
    packed = pack_params(params)           # offline weight prep (once)

    fwd = jax.jit(conv1d_lstm_forward)
    out = jax.block_until_ready(fwd(x, packed))
    assert out.shape == (B, OUT_CHANNEL), out.shape
    assert bool(jnp.all(jnp.isfinite(out)))

    ref = reference_forward(x, params)
    err = float(jnp.max(jnp.abs(out - ref)))
    assert err < 2e-2, f"max abs err vs reference: {err}"
    print("KERNEL_OK")
</pallas_src>

<mosaic_0001>
module attributes {stable_mosaic.version = 11 : i64} {
  func.func @fused_kernel(%arg0: memref<128x4xf32, #tpu.memory_space<vmem>>, %arg1: memref<3x4x8xf32, #tpu.memory_space<vmem>>, %arg2: memref<1x8xf32, #tpu.memory_space<vmem>>, %arg3: memref<122x128xf32, #tpu.memory_space<vmem>>, %arg4: memref<32x8xf32, #tpu.memory_space<vmem>>, %arg5: memref<1x8xf32, #tpu.memory_space<vmem>>, %arg6: memref<8x8xf32, #tpu.memory_space<vmem>>, %arg7: memref<144x4xf32, #tpu.memory_space<vmem>>, %arg8: memref<144x8xf32, #tpu.memory_space<vmem>>, %arg9: memref<128x128xf32, #tpu.memory_space<vmem>>) attributes {dimension_semantics = [], scalar_prefetch = 0 : i64, scratch_operands = 3 : i64, tpu.core_type = #tpu.core_type<tc>} {
    %cst = arith.constant 0.000000e+00 : f32
    %0 = vector.broadcast %cst : f32 to vector<8x4xf32>
    %c0 = arith.constant 0 : index
    %c0_0 = arith.constant 0 : index
    %1 = vector.load %arg7[%c0, %c0_0] : memref<144x4xf32, #tpu.memory_space<vmem>>, vector<8x4xf32>
    tpu.vector_store %arg7[%c0, %c0_0], %0 {strides = array<i32>} : memref<144x4xf32, #tpu.memory_space<vmem>>, vector<8x4xf32>,
    %cst_1 = arith.constant 0.000000e+00 : f32
    %2 = vector.broadcast %cst_1 : f32 to vector<8x4xf32>
    %c136 = arith.constant 136 : index
    %c0_2 = arith.constant 0 : index
    %3 = vector.load %arg7[%c136, %c0_2] : memref<144x4xf32, #tpu.memory_space<vmem>>, vector<8x4xf32>
    tpu.vector_store %arg7[%c136, %c0_2], %2 {strides = array<i32>} : memref<144x4xf32, #tpu.memory_space<vmem>>, vector<8x4xf32>,
    %c0_3 = arith.constant 0 : index
    %c0_4 = arith.constant 0 : index
    %4 = vector.load %arg0[%c0_3, %c0_4] : memref<128x4xf32, #tpu.memory_space<vmem>>, vector<128x4xf32>
    %c8 = arith.constant 8 : index
    %c0_5 = arith.constant 0 : index
    %5 = vector.load %arg7[%c8, %c0_5] : memref<144x4xf32, #tpu.memory_space<vmem>>, vector<128x4xf32>
    tpu.vector_store %arg7[%c8, %c0_5], %4 {strides = array<i32>} : memref<144x4xf32, #tpu.memory_space<vmem>>, vector<128x4xf32>,
    %cst_6 = arith.constant 0.000000e+00 : f32
    %6 = vector.broadcast %cst_6 : f32 to vector<128x8xf32>
    %c0_7 = arith.constant 0 : index
    %c0_8 = arith.constant 0 : index
    %7 = vector.load %arg7[%c0_7, %c0_8] : memref<144x4xf32, #tpu.memory_space<vmem>>, vector<128x4xf32>
    %c0_9 = arith.constant 0 : index
    %c0_10 = arith.constant 0 : index
    %c0_11 = arith.constant 0 : index
    %8 = vector.load %arg1[%c0_9, %c0_10, %c0_11] : memref<3x4x8xf32, #tpu.memory_space<vmem>>, vector<1x4x8xf32>
    %9 = vector.shape_cast %8 : vector<1x4x8xf32> to vector<4x8xf32>
    %cst_12 = arith.constant dense<0.000000e+00> : vector<128x8xf32>
    %10 = tpu.matmul %7, %9, %cst_12 {dimension_numbers = #tpu.dot_dimension_numbers<[1], [0], [0], [1], [0, 0, 1, 1], [], []>} : vector<128x4xf32>, vector<4x8xf32>, vector<128x8xf32> -> vector<128x8xf32>
    %11 = arith.addf %6, %10 : vector<128x8xf32>
    %c8_13 = arith.constant 8 : index
    %c0_14 = arith.constant 0 : index
    %12 = vector.load %arg7[%c8_13, %c0_14] : memref<144x4xf32, #tpu.memory_space<vmem>>, vector<128x4xf32>
    %c1 = arith.constant 1 : index
    %c0_15 = arith.constant 0 : index
    %c0_16 = arith.constant 0 : index
    %13 = vector.load %arg1[%c1, %c0_15, %c0_16] : memref<3x4x8xf32, #tpu.memory_space<vmem>>, vector<1x4x8xf32>
    %14 = vector.shape_cast %13 : vector<1x4x8xf32> to vector<4x8xf32>
    %cst_17 = arith.constant dense<0.000000e+00> : vector<128x8xf32>
    %15 = tpu.matmul %12, %14, %cst_17 {dimension_numbers = #tpu.dot_dimension_numbers<[1], [0], [0], [1], [0, 0, 1, 1], [], []>} : vector<128x4xf32>, vector<4x8xf32>, vector<128x8xf32> -> vector<128x8xf32>
    %16 = arith.addf %11, %15 : vector<128x8xf32>
    %c16 = arith.constant 16 : index
    %c0_18 = arith.constant 0 : index
    %17 = vector.load %arg7[%c16, %c0_18] : memref<144x4xf32, #tpu.memory_space<vmem>>, vector<128x4xf32>
    %c2 = arith.constant 2 : index
    %c0_19 = arith.constant 0 : index
    %c0_20 = arith.constant 0 : index
    %18 = vector.load %arg1[%c2, %c0_19, %c0_20] : memref<3x4x8xf32, #tpu.memory_space<vmem>>, vector<1x4x8xf32>
    %19 = vector.shape_cast %18 : vector<1x4x8xf32> to vector<4x8xf32>
    %cst_21 = arith.constant dense<0.000000e+00> : vector<128x8xf32>
    %20 = tpu.matmul %17, %19, %cst_21 {dimension_numbers = #tpu.dot_dimension_numbers<[1], [0], [0], [1], [0, 0, 1, 1], [], []>} : vector<128x4xf32>, vector<4x8xf32>, vector<128x8xf32> -> vector<128x8xf32>
    %21 = arith.addf %16, %20 : vector<128x8xf32>
    %c0_22 = arith.constant 0 : index
    %c0_23 = arith.constant 0 : index
    %22 = vector.load %arg2[%c0_22, %c0_23] : memref<1x8xf32, #tpu.memory_space<vmem>>, vector<1x8xf32>
    %23 = vector.broadcast %22 : vector<1x8xf32> to vector<128x8xf32>
    %24 = arith.addf %21, %23 : vector<128x8xf32>
    %cst_24 = arith.constant 0.000000e+00 : f32
    %25 = vector.broadcast %cst_24 : f32 to vector<8x8xf32>
    %c0_25 = arith.constant 0 : index
    %c0_26 = arith.constant 0 : index
    %26 = vector.load %arg8[%c0_25, %c0_26] : memref<144x8xf32, #tpu.memory_space<vmem>>, vector<8x8xf32>
    tpu.vector_store %arg8[%c0_25, %c0_26], %25 {strides = array<i32>} : memref<144x8xf32, #tpu.memory_space<vmem>>, vector<8x8xf32>,
    %cst_27 = arith.constant 0.000000e+00 : f32
    %27 = vector.broadcast %cst_27 : f32 to vector<8x8xf32>
    %c136_28 = arith.constant 136 : index
    %c0_29 = arith.constant 0 : index
    %28 = vector.load %arg8[%c136_28, %c0_29] : memref<144x8xf32, #tpu.memory_space<vmem>>, vector<8x8xf32>
    tpu.vector_store %arg8[%c136_28, %c0_29], %27 {strides = array<i32>} : memref<144x8xf32, #tpu.memory_space<vmem>>, vector<8x8xf32>,
    %c8_30 = arith.constant 8 : index
    %c0_31 = arith.constant 0 : index
    %29 = vector.load %arg8[%c8_30, %c0_31] : memref<144x8xf32, #tpu.memory_space<vmem>>, vector<128x8xf32>
    tpu.vector_store %arg8[%c8_30, %c0_31], %24 {strides = array<i32>} : memref<144x8xf32, #tpu.memory_space<vmem>>, vector<128x8xf32>,
    %cst_32 = arith.constant 0.000000e+00 : f32
    %30 = vector.broadcast %cst_32 : f32 to vector<128x128xf32>
    %c0_33 = arith.constant 0 : index
    %c0_34 = arith.constant 0 : index
    %31 = vector.load %arg8[%c0_33, %c0_34] : memref<144x8xf32, #tpu.memory_space<vmem>>, vector<128x8xf32>
    %c0_35 = arith.constant 0 : index
    %c0_36 = arith.constant 0 : index
    %32 = vector.load %arg3[%c0_35, %c0_36] : memref<122x128xf32, #tpu.memory_space<vmem>>, vector<8x128xf32>
    %cst_37 = arith.constant dense<0.000000e+00> : vector<128x128xf32>
    %33 = tpu.matmul %31, %32, %cst_37 {dimension_numbers = #tpu.dot_dimension_numbers<[1], [0], [0], [1], [0, 0, 1, 1], [], []>} : vector<128x8xf32>, vector<8x128xf32>, vector<128x128xf32> -> vector<128x128xf32>
    %34 = arith.addf %30, %33 : vector<128x128xf32>
    %c8_38 = arith.constant 8 : index
    %c0_39 = arith.constant 0 : index
    %35 = vector.load %arg8[%c8_38, %c0_39] : memref<144x8xf32, #tpu.memory_space<vmem>>, vector<128x8xf32>
    %c8_40 = arith.constant 8 : index
    %c0_41 = arith.constant 0 : index
    %36 = vector.load %arg3[%c8_40, %c0_41] : memref<122x128xf32, #tpu.memory_space<vmem>>, vector<8x128xf32>
    %cst_42 = arith.constant dense<0.000000e+00> : vector<128x128xf32>
    %37 = tpu.matmul %35, %36, %cst_42 {dimension_numbers = #tpu.dot_dimension_numbers<[1], [0], [0], [1], [0, 0, 1, 1], [], []>} : vector<128x8xf32>, vector<8x128xf32>, vector<128x128xf32> -> vector<128x128xf32>
    %38 = arith.addf %34, %37 : vector<128x128xf32>
    %c16_43 = arith.constant 16 : index
    %c0_44 = arith.constant 0 : index
    %39 = vector.load %arg8[%c16_43, %c0_44] : memref<144x8xf32, #tpu.memory_space<vmem>>, vector<128x8xf32>
    %c16_45 = arith.constant 16 : index
    %c0_46 = arith.constant 0 : index
    %40 = vector.load %arg3[%c16_45, %c0_46] : memref<122x128xf32, #tpu.memory_space<vmem>>, vector<8x128xf32>
    %cst_47 = arith.constant dense<0.000000e+00> : vector<128x128xf32>
    %41 = tpu.matmul %39, %40, %cst_47 {dimension_numbers = #tpu.dot_dimension_numbers<[1], [0], [0], [1], [0, 0, 1, 1], [], []>} : vector<128x8xf32>, vector<8x128xf32>, vector<128x128xf32> -> vector<128x128xf32>
    %42 = arith.addf %38, %41 : vector<128x128xf32>
    %c120 = arith.constant 120 : index
    %c0_48 = arith.constant 0 : index
    %43 = vector.load %arg3[%c120, %c0_48] : memref<122x128xf32, #tpu.memory_space<vmem>>, vector<1x128xf32>
    %44 = vector.broadcast %43 : vector<1x128xf32> to vector<128x128xf32>
    %45 = arith.addf %42, %44 : vector<128x128xf32>
    %c0_49 = arith.constant 0 : index
    %c0_50 = arith.constant 0 : index
    %46 = vector.load %arg9[%c0_49, %c0_50] : memref<128x128xf32, #tpu.memory_space<vmem>>, vector<128x128xf32>
    tpu.vector_store %arg9[%c0_49, %c0_50], %45 {strides = array<i32>} : memref<128x128xf32, #tpu.memory_space<vmem>>, vector<128x128xf32>,
    %c24 = arith.constant 24 : index
    %c0_51 = arith.constant 0 : index
    %47 = vector.load %arg3[%c24, %c0_51] : memref<122x128xf32, #tpu.memory_space<vmem>>, vector<32x128xf32>
    %c56 = arith.constant 56 : index
    %c0_52 = arith.constant 0 : index
    %48 = vector.load %arg3[%c56, %c0_52] : memref<122x128xf32, #tpu.memory_space<vmem>>, vector<64x128xf32>
    %c121 = arith.constant 121 : index
    %c0_53 = arith.constant 0 : index
    %49 = vector.load %arg3[%c121, %c0_53] : memref<122x128xf32, #tpu.memory_space<vmem>>, vector<1x128xf32>
    %50 = tpu.iota {dimensions = array<i32: 1>} : vector<1x128xi32>
    %c96_i32 = arith.constant 96 : i32
    %51 = vector.broadcast %c96_i32 : i32 to vector<1x128xi32>
    %52 = arith.cmpi sge, %50, %51 : vector<1x128xi32>
    %cst_54 = arith.constant 2.000000e+00 : f32
    %cst_55 = arith.constant 1.000000e+00 : f32
    %53 = vector.broadcast %cst_54 : f32 to vector<1x128xf32>
    %54 = vector.broadcast %cst_55 : f32 to vector<1x128xf32>
    %55 = arith.select %52, %53, %54 : vector<1x128xi1>, vector<1x128xf32>
    %cst_56 = arith.constant -1.000000e+00 : f32
    %cst_57 = arith.constant 0.000000e+00 : f32
    %56 = vector.broadcast %cst_56 : f32 to vector<1x128xf32>
    %57 = vector.broadcast %cst_57 : f32 to vector<1x128xf32>
    %58 = arith.select %52, %56, %57 : vector<1x128xi1>, vector<1x128xf32>
    %cst_58 = arith.constant 0.000000e+00 : f32
    %59 = vector.broadcast %cst_58 : f32 to vector<8x32xf32>
    %cst_59 = arith.constant 0.000000e+00 : f32
    %60 = vector.broadcast %cst_59 : f32 to vector<8x32xf32>
    %cst_60 = arith.constant 0.000000e+00 : f32
    %61 = vector.broadcast %cst_60 : f32 to vector<8x32xf32>
    %cst_61 = arith.constant 0.000000e+00 : f32
    %62 = vector.broadcast %cst_61 : f32 to vector<8x32xf32>
    %c0_62 = arith.constant 0 : index
    %c0_63 = arith.constant 0 : index
    %63 = vector.load %arg9[%c0_62, %c0_63] : memref<128x128xf32, #tpu.memory_space<vmem>>, vector<8x128xf32>
    %cst_64 = arith.constant dense<0.000000e+00> : vector<8x128xf32>
    %64 = tpu.matmul %59, %47, %cst_64 {dimension_numbers = #tpu.dot_dimension_numbers<[1], [0], [0], [1], [0, 0, 1, 1], [], []>} : vector<8x32xf32>, vector<32x128xf32>, vector<8x128xf32> -> vector<8x128xf32>
    %65 = arith.addf %63, %64 : vector<8x128xf32>
    %66 = arith.negf %65 : vector<8x128xf32>
    %67 = math.exp %66 : vector<8x128xf32>
    %cst_65 = arith.constant 1.000000e+00 : f32
    %68 = vector.broadcast %cst_65 : f32 to vector<8x128xf32>
    %69 = arith.addf %68, %67 : vector<8x128xf32>
    %70 = arith.divf %68, %69 : vector<8x128xf32>
    %71 = vector.broadcast %55 : vector<1x128xf32> to vector<8x128xf32>
    %72 = arith.mulf %70, %71 : vector<8x128xf32>
    %73 = vector.broadcast %58 : vector<1x128xf32> to vector<8x128xf32>
    %74 = arith.addf %72, %73 : vector<8x128xf32>
    %75 = vector.extract_strided_slice %74 {offsets = [0, 0], sizes = [8, 32], strides = [1, 1]} : vector<8x128xf32> to vector<8x32xf32>
    %76 = vector.extract_strided_slice %74 {offsets = [0, 32], sizes = [8, 32], strides = [1, 1]} : vector<8x128xf32> to vector<8x32xf32>
    %77 = vector.extract_strided_slice %74 {offsets = [0, 64], sizes = [8, 32], strides = [1, 1]} : vector<8x128xf32> to vector<8x32xf32>
    %78 = vector.extract_strided_slice %74 {offsets = [0, 96], sizes = [8, 32], strides = [1, 1]} : vector<8x128xf32> to vector<8x32xf32>
    %79 = arith.mulf %76, %60 : vector<8x32xf32>
    %80 = arith.mulf %75, %78 : vector<8x32xf32>
    %81 = arith.addf %79, %80 : vector<8x32xf32>
    %82 = math.tanh %81 : vector<8x32xf32>
    %83 = arith.mulf %77, %82 : vector<8x32xf32>
    %c8_66 = arith.constant 8 : index
    %c0_67 = arith.constant 0 : index
    %84 = vector.load %arg9[%c8_66, %c0_67] : memref<128x128xf32, #tpu.memory_space<vmem>>, vector<8x128xf32>
    %cst_68 = arith.constant dense<0.000000e+00> : vector<8x128xf32>
    %85 = tpu.matmul %83, %47, %cst_68 {dimension_numbers = #tpu.dot_dimension_numbers<[1], [0], [0], [1], [0, 0, 1, 1], [], []>} : vector<8x32xf32>, vector<32x128xf32>, vector<8x128xf32> -> vector<8x128xf32>
    %86 = arith.addf %84, %85 : vector<8x128xf32>
    %87 = tpu.concatenate %83, %61 in 1 : vector<8x32xf32>, vector<8x32xf32> -> vector<8x64xf32>
    %cst_69 = arith.constant dense<0.000000e+00> : vector<8x128xf32>
    %88 = tpu.matmul %87, %48, %cst_69 {dimension_numbers = #tpu.dot_dimension_numbers<[1], [0], [0], [1], [0, 0, 1, 1], [], []>} : vector<8x64xf32>, vector<64x128xf32>, vector<8x128xf32> -> vector<8x128xf32>
    %89 = vector.broadcast %49 : vector<1x128xf32> to vector<8x128xf32>
    %90 = arith.addf %88, %89 : vector<8x128xf32>
    %91 = arith.negf %86 : vector<8x128xf32>
    %92 = math.exp %91 : vector<8x128xf32>
    %cst_70 = arith.constant 1.000000e+00 : f32
    %93 = vector.broadcast %cst_70 : f32 to vector<8x128xf32>
    %94 = arith.addf %93, %92 : vector<8x128xf32>
    %95 = arith.divf %93, %94 : vector<8x128xf32>
    %96 = vector.broadcast %55 : vector<1x128xf32> to vector<8x128xf32>
    %97 = arith.mulf %95, %96 : vector<8x128xf32>
    %98 = vector.broadcast %58 : vector<1x128xf32> to vector<8x128xf32>
    %99 = arith.addf %97, %98 : vector<8x128xf32>
    %100 = vector.extract_strided_slice %99 {offsets = [0, 0], sizes = [8, 32], strides = [1, 1]} : vector<8x128xf32> to vector<8x32xf32>
    %101 = vector.extract_strided_slice %99 {offsets = [0, 32], sizes = [8, 32], strides = [1, 1]} : vector<8x128xf32> to vector<8x32xf32>
    %102 = vector.extract_strided_slice %99 {offsets = [0, 64], sizes = [8, 32], strides = [1, 1]} : vector<8x128xf32> to vector<8x32xf32>
    %103 = vector.extract_strided_slice %99 {offsets = [0, 96], sizes = [8, 32], strides = [1, 1]} : vector<8x128xf32> to vector<8x32xf32>
    %104 = arith.mulf %101, %81 : vector<8x32xf32>
    %105 = arith.mulf %100, %103 : vector<8x32xf32>
    %106 = arith.addf %104, %105 : vector<8x32xf32>
    %107 = math.tanh %106 : vector<8x32xf32>
    %108 = arith.mulf %102, %107 : vector<8x32xf32>
    %109 = arith.negf %90 : vector<8x128xf32>
    %110 = math.exp %109 : vector<8x128xf32>
    %cst_71 = arith.constant 1.000000e+00 : f32
    %111 = vector.broadcast %cst_71 : f32 to vector<8x128xf32>
    %112 = arith.addf %111, %110 : vector<8x128xf32>
    %113 = arith.divf %111, %112 : vector<8x128xf32>
    %114 = vector.broadcast %55 : vector<1x128xf32> to vector<8x128xf32>
    %115 = arith.mulf %113, %114 : vector<8x128xf32>
    %116 = vector.broadcast %58 : vector<1x128xf32> to vector<8x128xf32>
    %117 = arith.addf %115, %116 : vector<8x128xf32>
    %118 = vector.extract_strided_slice %117 {offsets = [0, 0], sizes = [8, 32], strides = [1, 1]} : vector<8x128xf32> to vector<8x32xf32>
    %119 = vector.extract_strided_slice %117 {offsets = [0, 32], sizes = [8, 32], strides = [1, 1]} : vector<8x128xf32> to vector<8x32xf32>
    %120 = vector.extract_strided_slice %117 {offsets = [0, 64], sizes = [8, 32], strides = [1, 1]} : vector<8x128xf32> to vector<8x32xf32>
    %121 = vector.extract_strided_slice %117 {offsets = [0, 96], sizes = [8, 32], strides = [1, 1]} : vector<8x128xf32> to vector<8x32xf32>
    %122 = arith.mulf %119, %62 : vector<8x32xf32>
    %123 = arith.mulf %118, %121 : vector<8x32xf32>
    %124 = arith.addf %122, %123 : vector<8x32xf32>
    %125 = math.tanh %124 : vector<8x32xf32>
    %126 = arith.mulf %120, %125 : vector<8x32xf32>
    %c16_72 = arith.constant 16 : index
    %c0_73 = arith.constant 0 : index
    %127 = vector.load %arg9[%c16_72, %c0_73] : memref<128x128xf32, #tpu.memory_space<vmem>>, vector<8x128xf32>
    %cst_74 = arith.constant dense<0.000000e+00> : vector<8x128xf32>
    %128 = tpu.matmul %108, %47, %cst_74 {dimension_numbers = #tpu.dot_dimension_numbers<[1], [0], [0], [1], [0, 0, 1, 1], [], []>} : vector<8x32xf32>, vector<32x128xf32>, vector<8x128xf32> -> vector<8x128xf32>
    %129 = arith.addf %127, %128 : vector<8x128xf32>
    %130 = tpu.concatenate %108, %126 in 1 : vector<8x32xf32>, vector<8x32xf32> -> vector<8x64xf32>
    %cst_75 = arith.constant dense<0.000000e+00> : vector<8x128xf32>
    %131 = tpu.matmul %130, %48, %cst_75 {dimension_numbers = #tpu.dot_dimension_numbers<[1], [0], [0], [1], [0, 0, 1, 1], [], []>} : vector<8x64xf32>, vector<64x128xf32>, vector<8x128xf32> -> vector<8x128xf32>
    %132 = vector.broadcast %49 : vector<1x128xf32> to vector<8x128xf32>
    %133 = arith.addf %131, %132 : vector<8x128xf32>
    %134 = arith.negf %129 : vector<8x128xf32>
    %135 = math.exp %134 : vector<8x128xf32>
    %cst_76 = arith.constant 1.000000e+00 : f32
    %136 = vector.broadcast %cst_76 : f32 to vector<8x128xf32>
    %137 = arith.addf %136, %135 : vector<8x128xf32>
    %138 = arith.divf %136, %137 : vector<8x128xf32>
    %139 = vector.broadcast %55 : vector<1x128xf32> to vector<8x128xf32>
    %140 = arith.mulf %138, %139 : vector<8x128xf32>
    %141 = vector.broadcast %58 : vector<1x128xf32> to vector<8x128xf32>
    %142 = arith.addf %140, %141 : vector<8x128xf32>
    %143 = vector.extract_strided_slice %142 {offsets = [0, 0], sizes = [8, 32], strides = [1, 1]} : vector<8x128xf32> to vector<8x32xf32>
    %144 = vector.extract_strided_slice %142 {offsets = [0, 32], sizes = [8, 32], strides = [1, 1]} : vector<8x128xf32> to vector<8x32xf32>
    %145 = vector.extract_strided_slice %142 {offsets = [0, 64], sizes = [8, 32], strides = [1, 1]} : vector<8x128xf32> to vector<8x32xf32>
    %146 = vector.extract_strided_slice %142 {offsets = [0, 96], sizes = [8, 32], strides = [1, 1]} : vector<8x128xf32> to vector<8x32xf32>
    %147 = arith.mulf %144, %106 : vector<8x32xf32>
    %148 = arith.mulf %143, %146 : vector<8x32xf32>
    %149 = arith.addf %147, %148 : vector<8x32xf32>
    %150 = math.tanh %149 : vector<8x32xf32>
    %151 = arith.mulf %145, %150 : vector<8x32xf32>
    %152 = arith.negf %133 : vector<8x128xf32>
    %153 = math.exp %152 : vector<8x128xf32>
    %cst_77 = arith.constant 1.000000e+00 : f32
    %154 = vector.broadcast %cst_77 : f32 to vector<8x128xf32>
    %155 = arith.addf %154, %153 : vector<8x128xf32>
    %156 = arith.divf %154, %155 : vector<8x128xf32>
    %157 = vector.broadcast %55 : vector<1x128xf32> to vector<8x128xf32>
    %158 = arith.mulf %156, %157 : vector<8x128xf32>
    %159 = vector.broadcast %58 : vector<1x128xf32> to vector<8x128xf32>
    %160 = arith.addf %158, %159 : vector<8x128xf32>
    %161 = vector.extract_strided_slice %160 {offsets = [0, 0], sizes = [8, 32], strides = [1, 1]} : vector<8x128xf32> to vector<8x32xf32>
    %162 = vector.extract_strided_slice %160 {offsets = [0, 32], sizes = [8, 32], strides = [1, 1]} : vector<8x128xf32> to vector<8x32xf32>
    %163 = vector.extract_strided_slice %160 {offsets = [0, 64], sizes = [8, 32], strides = [1, 1]} : vector<8x128xf32> to vector<8x32xf32>
    %164 = vector.extract_strided_slice %160 {offsets = [0, 96], sizes = [8, 32], strides = [1, 1]} : vector<8x128xf32> to vector<8x32xf32>
    %165 = arith.mulf %162, %124 : vector<8x32xf32>
    %166 = arith.mulf %161, %164 : vector<8x32xf32>
    %167 = arith.addf %165, %166 : vector<8x32xf32>
    %168 = math.tanh %167 : vector<8x32xf32>
    %169 = arith.mulf %163, %168 : vector<8x32xf32>
    %c24_78 = arith.constant 24 : index
    %c0_79 = arith.constant 0 : index
    %170 = vector.load %arg9[%c24_78, %c0_79] : memref<128x128xf32, #tpu.memory_space<vmem>>, vector<8x128xf32>
    %cst_80 = arith.constant dense<0.000000e+00> : vector<8x128xf32>
    %171 = tpu.matmul %151, %47, %cst_80 {dimension_numbers = #tpu.dot_dimension_numbers<[1], [0], [0], [1], [0, 0, 1, 1], [], []>} : vector<8x32xf32>, vector<32x128xf32>, vector<8x128xf32> -> vector<8x128xf32>
    %172 = arith.addf %170, %171 : vector<8x128xf32>
    %173 = tpu.concatenate %151, %169 in 1 : vector<8x32xf32>, vector<8x32xf32> -> vector<8x64xf32>
    %cst_81 = arith.constant dense<0.000000e+00> : vector<8x128xf32>
    %174 = tpu.matmul %173, %48, %cst_81 {dimension_numbers = #tpu.dot_dimension_numbers<[1], [0], [0], [1], [0, 0, 1, 1], [], []>} : vector<8x64xf32>, vector<64x128xf32>, vector<8x128xf32> -> vector<8x128xf32>
    %175 = vector.broadcast %49 : vector<1x128xf32> to vector<8x128xf32>
    %176 = arith.addf %174, %175 : vector<8x128xf32>
    %177 = arith.negf %172 : vector<8x128xf32>
    %178 = math.exp %177 : vector<8x128xf32>
    %cst_82 = arith.constant 1.000000e+00 : f32
    %179 = vector.broadcast %cst_82 : f32 to vector<8x128xf32>
    %180 = arith.addf %179, %178 : vector<8x128xf32>
    %181 = arith.divf %179, %180 : vector<8x128xf32>
    %182 = vector.broadcast %55 : vector<1x128xf32> to vector<8x128xf32>
    %183 = arith.mulf %181, %182 : vector<8x128xf32>
    %184 = vector.broadcast %58 : vector<1x128xf32> to vector<8x128xf32>
    %185 = arith.addf %183, %184 : vector<8x128xf32>
    %186 = vector.extract_strided_slice %185 {offsets = [0, 0], sizes = [8, 32], strides = [1, 1]} : vector<8x128xf32> to vector<8x32xf32>
    %187 = vector.extract_strided_slice %185 {offsets = [0, 32], sizes = [8, 32], strides = [1, 1]} : vector<8x128xf32> to vector<8x32xf32>
    %188 = vector.extract_strided_slice %185 {offsets = [0, 64], sizes = [8, 32], strides = [1, 1]} : vector<8x128xf32> to vector<8x32xf32>
    %189 = vector.extract_strided_slice %185 {offsets = [0, 96], sizes = [8, 32], strides = [1, 1]} : vector<8x128xf32> to vector<8x32xf32>
    %190 = arith.mulf %187, %149 : vector<8x32xf32>
    %191 = arith.mulf %186, %189 : vector<8x32xf32>
    %192 = arith.addf %190, %191 : vector<8x32xf32>
    %193 = math.tanh %192 : vector<8x32xf32>
    %194 = arith.mulf %188, %193 : vector<8x32xf32>
    %195 = arith.negf %176 : vector<8x128xf32>
    %196 = math.exp %195 : vector<8x128xf32>
    %cst_83 = arith.constant 1.000000e+00 : f32
    %197 = vector.broadcast %cst_83 : f32 to vector<8x128xf32>
    %198 = arith.addf %197, %196 : vector<8x128xf32>
    %199 = arith.divf %197, %198 : vector<8x128xf32>
    %200 = vector.broadcast %55 : vector<1x128xf32> to vector<8x128xf32>
    %201 = arith.mulf %199, %200 : vector<8x128xf32>
    %202 = vector.broadcast %58 : vector<1x128xf32> to vector<8x128xf32>
    %203 = arith.addf %201, %202 : vector<8x128xf32>
    %204 = vector.extract_strided_slice %203 {offsets = [0, 0], sizes = [8, 32], strides = [1, 1]} : vector<8x128xf32> to vector<8x32xf32>
    %205 = vector.extract_strided_slice %203 {offsets = [0, 32], sizes = [8, 32], strides = [1, 1]} : vector<8x128xf32> to vector<8x32xf32>
    %206 = vector.extract_strided_slice %203 {offsets = [0, 64], sizes = [8, 32], strides = [1, 1]} : vector<8x128xf32> to vector<8x32xf32>
    %207 = vector.extract_strided_slice %203 {offsets = [0, 96], sizes = [8, 32], strides = [1, 1]} : vector<8x128xf32> to vector<8x32xf32>
    %208 = arith.mulf %205, %167 : vector<8x32xf32>
    %209 = arith.mulf %204, %207 : vector<8x32xf32>
    %210 = arith.addf %208, %209 : vector<8x32xf32>
    %211 = math.tanh %210 : vector<8x32xf32>
    %212 = arith.mulf %206, %211 : vector<8x32xf32>
    %c32 = arith.constant 32 : index
    %c0_84 = arith.constant 0 : index
    %213 = vector.load %arg9[%c32, %c0_84] : memref<128x128xf32, #tpu.memory_space<vmem>>, vector<8x128xf32>
    %cst_85 = arith.constant dense<0.000000e+00> : vector<8x128xf32>
    %214 = tpu.matmul %194, %47, %cst_85 {dimension_numbers = #tpu.dot_dimension_numbers<[1], [0], [0], [1], [0, 0, 1, 1], [], []>} : vector<8x32xf32>, vector<32x128xf32>, vector<8x128xf32> -> vector<8x128xf32>
    %215 = arith.addf %213, %214 : vector<8x128xf32>
    %216 = tpu.concatenate %194, %212 in 1 : vector<8x32xf32>, vector<8x32xf32> -> vector<8x64xf32>
    %cst_86 = arith.constant dense<0.000000e+00> : vector<8x128xf32>
    %217 = tpu.matmul %216, %48, %cst_86 {dimension_numbers = #tpu.dot_dimension_numbers<[1], [0], [0], [1], [0, 0, 1, 1], [], []>} : vector<8x64xf32>, vector<64x128xf32>, vector<8x128xf32> -> vector<8x128xf32>
    %218 = vector.broadcast %49 : vector<1x128xf32> to vector<8x128xf32>
    %219 = arith.addf %217, %218 : vector<8x128xf32>
    %220 = arith.negf %215 : vector<8x128xf32>
    %221 = math.exp %220 : vector<8x128xf32>
    %cst_87 = arith.constant 1.000000e+00 : f32
    %222 = vector.broadcast %cst_87 : f32 to vector<8x128xf32>
    %223 = arith.addf %222, %221 : vector<8x128xf32>
    %224 = arith.divf %222, %223 : vector<8x128xf32>
    %225 = vector.broadcast %55 : vector<1x128xf32> to vector<8x128xf32>
    %226 = arith.mulf %224, %225 : vector<8x128xf32>
    %227 = vector.broadcast %58 : vector<1x128xf32> to vector<8x128xf32>
    %228 = arith.addf %226, %227 : vector<8x128xf32>
    %229 = vector.extract_strided_slice %228 {offsets = [0, 0], sizes = [8, 32], strides = [1, 1]} : vector<8x128xf32> to vector<8x32xf32>
    %230 = vector.extract_strided_slice %228 {offsets = [0, 32], sizes = [8, 32], strides = [1, 1]} : vector<8x128xf32> to vector<8x32xf32>
    %231 = vector.extract_strided_slice %228 {offsets = [0, 64], sizes = [8, 32], strides = [1, 1]} : vector<8x128xf32> to vector<8x32xf32>
    %232 = vector.extract_strided_slice %228 {offsets = [0, 96], sizes = [8, 32], strides = [1, 1]} : vector<8x128xf32> to vector<8x32xf32>
    %233 = arith.mulf %230, %192 : vector<8x32xf32>
    %234 = arith.mulf %229, %232 : vector<8x32xf32>
    %235 = arith.addf %233, %234 : vector<8x32xf32>
    %236 = math.tanh %235 : vector<8x32xf32>
    %237 = arith.mulf %231, %236 : vector<8x32xf32>
    %238 = arith.negf %219 : vector<8x128xf32>
    %239 = math.exp %238 : vector<8x128xf32>
    %cst_88 = arith.constant 1.000000e+00 : f32
    %240 = vector.broadcast %cst_88 : f32 to vector<8x128xf32>
    %241 = arith.addf %240, %239 : vector<8x128xf32>
    %242 = arith.divf %240, %241 : vector<8x128xf32>
    %243 = vector.broadcast %55 : vector<1x128xf32> to vector<8x128xf32>
    %244 = arith.mulf %242, %243 : vector<8x128xf32>
    %245 = vector.broadcast %58 : vector<1x128xf32> to vector<8x128xf32>
    %246 = arith.addf %244, %245 : vector<8x128xf32>
    %247 = vector.extract_strided_slice %246 {offsets = [0, 0], sizes = [8, 32], strides = [1, 1]} : vector<8x128xf32> to vector<8x32xf32>
    %248 = vector.extract_strided_slice %246 {offsets = [0, 32], sizes = [8, 32], strides = [1, 1]} : vector<8x128xf32> to vector<8x32xf32>
    %249 = vector.extract_strided_slice %246 {offsets = [0, 64], sizes = [8, 32], strides = [1, 1]} : vector<8x128xf32> to vector<8x32xf32>
    %250 = vector.extract_strided_slice %246 {offsets = [0, 96], sizes = [8, 32], strides = [1, 1]} : vector<8x128xf32> to vector<8x32xf32>
    %251 = arith.mulf %248, %210 : vector<8x32xf32>
    %252 = arith.mulf %247, %250 : vector<8x32xf32>
    %253 = arith.addf %251, %252 : vector<8x32xf32>
    %254 = math.tanh %253 : vector<8x32xf32>
    %255 = arith.mulf %249, %254 : vector<8x32xf32>
    %c40 = arith.constant 40 : index
    %c0_89 = arith.constant 0 : index
    %256 = vector.load %arg9[%c40, %c0_89] : memref<128x128xf32, #tpu.memory_space<vmem>>, vector<8x128xf32>
    %cst_90 = arith.constant dense<0.000000e+00> : vector<8x128xf32>
    %257 = tpu.matmul %237, %47, %cst_90 {dimension_numbers = #tpu.dot_dimension_numbers<[1], [0], [0], [1], [0, 0, 1, 1], [], []>} : vector<8x32xf32>, vector<32x128xf32>, vector<8x128xf32> -> vector<8x128xf32>
    %258 = arith.addf %256, %257 : vector<8x128xf32>
    %259 = tpu.concatenate %237, %255 in 1 : vector<8x32xf32>, vector<8x32xf32> -> vector<8x64xf32>
    %cst_91 = arith.constant dense<0.000000e+00> : vector<8x128xf32>
    %260 = tpu.matmul %259, %48, %cst_91 {dimension_numbers = #tpu.dot_dimension_numbers<[1], [0], [0], [1], [0, 0, 1, 1], [], []>} : vector<8x64xf32>, vector<64x128xf32>, vector<8x128xf32> -> vector<8x128xf32>
    %261 = vector.broadcast %49 : vector<1x128xf32> to vector<8x128xf32>
    %262 = arith.addf %260, %261 : vector<8x128xf32>
    %263 = arith.negf %258 : vector<8x128xf32>
    %264 = math.exp %263 : vector<8x128xf32>
    %cst_92 = arith.constant 1.000000e+00 : f32
    %265 = vector.broadcast %cst_92 : f32 to vector<8x128xf32>
    %266 = arith.addf %265, %264 : vector<8x128xf32>
    %267 = arith.divf %265, %266 : vector<8x128xf32>
    %268 = vector.broadcast %55 : vector<1x128xf32> to vector<8x128xf32>
    %269 = arith.mulf %267, %268 : vector<8x128xf32>
    %270 = vector.broadcast %58 : vector<1x128xf32> to vector<8x128xf32>
    %271 = arith.addf %269, %270 : vector<8x128xf32>
    %272 = vector.extract_strided_slice %271 {offsets = [0, 0], sizes = [8, 32], strides = [1, 1]} : vector<8x128xf32> to vector<8x32xf32>
    %273 = vector.extract_strided_slice %271 {offsets = [0, 32], sizes = [8, 32], strides = [1, 1]} : vector<8x128xf32> to vector<8x32xf32>
    %274 = vector.extract_strided_slice %271 {offsets = [0, 64], sizes = [8, 32], strides = [1, 1]} : vector<8x128xf32> to vector<8x32xf32>
    %275 = vector.extract_strided_slice %271 {offsets = [0, 96], sizes = [8, 32], strides = [1, 1]} : vector<8x128xf32> to vector<8x32xf32>
    %276 = arith.mulf %273, %235 : vector<8x32xf32>
    %277 = arith.mulf %272, %275 : vector<8x32xf32>
    %278 = arith.addf %276, %277 : vector<8x32xf32>
    %279 = math.tanh %278 : vector<8x32xf32>
    %280 = arith.mulf %274, %279 : vector<8x32xf32>
    %281 = arith.negf %262 : vector<8x128xf32>
    %282 = math.exp %281 : vector<8x128xf32>
    %cst_93 = arith.constant 1.000000e+00 : f32
    %283 = vector.broadcast %cst_93 : f32 to vector<8x128xf32>
    %284 = arith.addf %283, %282 : vector<8x128xf32>
    %285 = arith.divf %283, %284 : vector<8x128xf32>
    %286 = vector.broadcast %55 : vector<1x128xf32> to vector<8x128xf32>
    %287 = arith.mulf %285, %286 : vector<8x128xf32>
    %288 = vector.broadcast %58 : vector<1x128xf32> to vector<8x128xf32>
    %289 = arith.addf %287, %288 : vector<8x128xf32>
    %290 = vector.extract_strided_slice %289 {offsets = [0, 0], sizes = [8, 32], strides = [1, 1]} : vector<8x128xf32> to vector<8x32xf32>
    %291 = vector.extract_strided_slice %289 {offsets = [0, 32], sizes = [8, 32], strides = [1, 1]} : vector<8x128xf32> to vector<8x32xf32>
    %292 = vector.extract_strided_slice %289 {offsets = [0, 64], sizes = [8, 32], strides = [1, 1]} : vector<8x128xf32> to vector<8x32xf32>
    %293 = vector.extract_strided_slice %289 {offsets = [0, 96], sizes = [8, 32], strides = [1, 1]} : vector<8x128xf32> to vector<8x32xf32>
    %294 = arith.mulf %291, %253 : vector<8x32xf32>
    %295 = arith.mulf %290, %293 : vector<8x32xf32>
    %296 = arith.addf %294, %295 : vector<8x32xf32>
    %297 = math.tanh %296 : vector<8x32xf32>
    %298 = arith.mulf %292, %297 : vector<8x32xf32>
    %c48 = arith.constant 48 : index
    %c0_94 = arith.constant 0 : index
    %299 = vector.load %arg9[%c48, %c0_94] : memref<128x128xf32, #tpu.memory_space<vmem>>, vector<8x128xf32>
    %cst_95 = arith.constant dense<0.000000e+00> : vector<8x128xf32>
    %300 = tpu.matmul %280, %47, %cst_95 {dimension_numbers = #tpu.dot_dimension_numbers<[1], [0], [0], [1], [0, 0, 1, 1], [], []>} : vector<8x32xf32>, vector<32x128xf32>, vector<8x128xf32> -> vector<8x128xf32>
    %301 = arith.addf %299, %300 : vector<8x128xf32>
    %302 = tpu.concatenate %280, %298 in 1 : vector<8x32xf32>, vector<8x32xf32> -> vector<8x64xf32>
    %cst_96 = arith.constant dense<0.000000e+00> : vector<8x128xf32>
    %303 = tpu.matmul %302, %48, %cst_96 {dimension_numbers = #tpu.dot_dimension_numbers<[1], [0], [0], [1], [0, 0, 1, 1], [], []>} : vector<8x64xf32>, vector<64x128xf32>, vector<8x128xf32> -> vector<8x128xf32>
    %304 = vector.broadcast %49 : vector<1x128xf32> to vector<8x128xf32>
    %305 = arith.addf %303, %304 : vector<8x128xf32>
    %306 = arith.negf %301 : vector<8x128xf32>
    %307 = math.exp %306 : vector<8x128xf32>
    %cst_97 = arith.constant 1.000000e+00 : f32
    %308 = vector.broadcast %cst_97 : f32 to vector<8x128xf32>
    %309 = arith.addf %308, %307 : vector<8x128xf32>
    %310 = arith.divf %308, %309 : vector<8x128xf32>
    %311 = vector.broadcast %55 : vector<1x128xf32> to vector<8x128xf32>
    %312 = arith.mulf %310, %311 : vector<8x128xf32>
    %313 = vector.broadcast %58 : vector<1x128xf32> to vector<8x128xf32>
    %314 = arith.addf %312, %313 : vector<8x128xf32>
    %315 = vector.extract_strided_slice %314 {offsets = [0, 0], sizes = [8, 32], strides = [1, 1]} : vector<8x128xf32> to vector<8x32xf32>
    %316 = vector.extract_strided_slice %314 {offsets = [0, 32], sizes = [8, 32], strides = [1, 1]} : vector<8x128xf32> to vector<8x32xf32>
    %317 = vector.extract_strided_slice %314 {offsets = [0, 64], sizes = [8, 32], strides = [1, 1]} : vector<8x128xf32> to vector<8x32xf32>
    %318 = vector.extract_strided_slice %314 {offsets = [0, 96], sizes = [8, 32], strides = [1, 1]} : vector<8x128xf32> to vector<8x32xf32>
    %319 = arith.mulf %316, %278 : vector<8x32xf32>
    %320 = arith.mulf %315, %318 : vector<8x32xf32>
    %321 = arith.addf %319, %320 : vector<8x32xf32>
    %322 = math.tanh %321 : vector<8x32xf32>
    %323 = arith.mulf %317, %322 : vector<8x32xf32>
    %324 = arith.negf %305 : vector<8x128xf32>
    %325 = math.exp %324 : vector<8x128xf32>
    %cst_98 = arith.constant 1.000000e+00 : f32
    %326 = vector.broadcast %cst_98 : f32 to vector<8x128xf32>
    %327 = arith.addf %326, %325 : vector<8x128xf32>
    %328 = arith.divf %326, %327 : vector<8x128xf32>
    %329 = vector.broadcast %55 : vector<1x128xf32> to vector<8x128xf32>
    %330 = arith.mulf %328, %329 : vector<8x128xf32>
    %331 = vector.broadcast %58 : vector<1x128xf32> to vector<8x128xf32>
    %332 = arith.addf %330, %331 : vector<8x128xf32>
    %333 = vector.extract_strided_slice %332 {offsets = [0, 0], sizes = [8, 32], strides = [1, 1]} : vector<8x128xf32> to vector<8x32xf32>
    %334 = vector.extract_strided_slice %332 {offsets = [0, 32], sizes = [8, 32], strides = [1, 1]} : vector<8x128xf32> to vector<8x32xf32>
    %335 = vector.extract_strided_slice %332 {offsets = [0, 64], sizes = [8, 32], strides = [1, 1]} : vector<8x128xf32> to vector<8x32xf32>
    %336 = vector.extract_strided_slice %332 {offsets = [0, 96], sizes = [8, 32], strides = [1, 1]} : vector<8x128xf32> to vector<8x32xf32>
    %337 = arith.mulf %334, %296 : vector<8x32xf32>
    %338 = arith.mulf %333, %336 : vector<8x32xf32>
    %339 = arith.addf %337, %338 : vector<8x32xf32>
    %340 = math.tanh %339 : vector<8x32xf32>
    %341 = arith.mulf %335, %340 : vector<8x32xf32>
    %c56_99 = arith.constant 56 : index
    %c0_100 = arith.constant 0 : index
    %342 = vector.load %arg9[%c56_99, %c0_100] : memref<128x128xf32, #tpu.memory_space<vmem>>, vector<8x128xf32>
    %cst_101 = arith.constant dense<0.000000e+00> : vector<8x128xf32>
    %343 = tpu.matmul %323, %47, %cst_101 {dimension_numbers = #tpu.dot_dimension_numbers<[1], [0], [0], [1], [0, 0, 1, 1], [], []>} : vector<8x32xf32>, vector<32x128xf32>, vector<8x128xf32> -> vector<8x128xf32>
    %344 = arith.addf %342, %343 : vector<8x128xf32>
    %345 = tpu.concatenate %323, %341 in 1 : vector<8x32xf32>, vector<8x32xf32> -> vector<8x64xf32>
    %cst_102 = arith.constant dense<0.000000e+00> : vector<8x128xf32>
    %346 = tpu.matmul %345, %48, %cst_102 {dimension_numbers = #tpu.dot_dimension_numbers<[1], [0], [0], [1], [0, 0, 1, 1], [], []>} : vector<8x64xf32>, vector<64x128xf32>, vector<8x128xf32> -> vector<8x128xf32>
    %347 = vector.broadcast %49 : vector<1x128xf32> to vector<8x128xf32>
    %348 = arith.addf %346, %347 : vector<8x128xf32>
    %349 = arith.negf %344 : vector<8x128xf32>
    %350 = math.exp %349 : vector<8x128xf32>
    %cst_103 = arith.constant 1.000000e+00 : f32
    %351 = vector.broadcast %cst_103 : f32 to vector<8x128xf32>
    %352 = arith.addf %351, %350 : vector<8x128xf32>
    %353 = arith.divf %351, %352 : vector<8x128xf32>
    %354 = vector.broadcast %55 : vector<1x128xf32> to vector<8x128xf32>
    %355 = arith.mulf %353, %354 : vector<8x128xf32>
    %356 = vector.broadcast %58 : vector<1x128xf32> to vector<8x128xf32>
    %357 = arith.addf %355, %356 : vector<8x128xf32>
    %358 = vector.extract_strided_slice %357 {offsets = [0, 0], sizes = [8, 32], strides = [1, 1]} : vector<8x128xf32> to vector<8x32xf32>
    %359 = vector.extract_strided_slice %357 {offsets = [0, 32], sizes = [8, 32], strides = [1, 1]} : vector<8x128xf32> to vector<8x32xf32>
    %360 = vector.extract_strided_slice %357 {offsets = [0, 64], sizes = [8, 32], strides = [1, 1]} : vector<8x128xf32> to vector<8x32xf32>
    %361 = vector.extract_strided_slice %357 {offsets = [0, 96], sizes = [8, 32], strides = [1, 1]} : vector<8x128xf32> to vector<8x32xf32>
    %362 = arith.mulf %359, %321 : vector<8x32xf32>
    %363 = arith.mulf %358, %361 : vector<8x32xf32>
    %364 = arith.addf %362, %363 : vector<8x32xf32>
    %365 = math.tanh %364 : vector<8x32xf32>
    %366 = arith.mulf %360, %365 : vector<8x32xf32>
    %367 = arith.negf %348 : vector<8x128xf32>
    %368 = math.exp %367 : vector<8x128xf32>
    %cst_104 = arith.constant 1.000000e+00 : f32
    %369 = vector.broadcast %cst_104 : f32 to vector<8x128xf32>
    %370 = arith.addf %369, %368 : vector<8x128xf32>
    %371 = arith.divf %369, %370 : vector<8x128xf32>
    %372 = vector.broadcast %55 : vector<1x128xf32> to vector<8x128xf32>
    %373 = arith.mulf %371, %372 : vector<8x128xf32>
    %374 = vector.broadcast %58 : vector<1x128xf32> to vector<8x128xf32>
    %375 = arith.addf %373, %374 : vector<8x128xf32>
    %376 = vector.extract_strided_slice %375 {offsets = [0, 0], sizes = [8, 32], strides = [1, 1]} : vector<8x128xf32> to vector<8x32xf32>
    %377 = vector.extract_strided_slice %375 {offsets = [0, 32], sizes = [8, 32], strides = [1, 1]} : vector<8x128xf32> to vector<8x32xf32>
    %378 = vector.extract_strided_slice %375 {offsets = [0, 64], sizes = [8, 32], strides = [1, 1]} : vector<8x128xf32> to vector<8x32xf32>
    %379 = vector.extract_strided_slice %375 {offsets = [0, 96], sizes = [8, 32], strides = [1, 1]} : vector<8x128xf32> to vector<8x32xf32>
    %380 = arith.mulf %377, %339 : vector<8x32xf32>
    %381 = arith.mulf %376, %379 : vector<8x32xf32>
    %382 = arith.addf %380, %381 : vector<8x32xf32>
    %383 = math.tanh %382 : vector<8x32xf32>
    %384 = arith.mulf %378, %383 : vector<8x32xf32>
    %c64 = arith.constant 64 : index
    %c0_105 = arith.constant 0 : index
    %385 = vector.load %arg9[%c64, %c0_105] : memref<128x128xf32, #tpu.memory_space<vmem>>, vector<8x128xf32>
    %cst_106 = arith.constant dense<0.000000e+00> : vector<8x128xf32>
    %386 = tpu.matmul %366, %47, %cst_106 {dimension_numbers = #tpu.dot_dimension_numbers<[1], [0], [0], [1], [0, 0, 1, 1], [], []>} : vector<8x32xf32>, vector<32x128xf32>, vector<8x128xf32> -> vector<8x128xf32>
    %387 = arith.addf %385, %386 : vector<8x128xf32>
    %388 = tpu.concatenate %366, %384 in 1 : vector<8x32xf32>, vector<8x32xf32> -> vector<8x64xf32>
    %cst_107 = arith.constant dense<0.000000e+00> : vector<8x128xf32>
    %389 = tpu.matmul %388, %48, %cst_107 {dimension_numbers = #tpu.dot_dimension_numbers<[1], [0], [0], [1], [0, 0, 1, 1], [], []>} : vector<8x64xf32>, vector<64x128xf32>, vector<8x128xf32> -> vector<8x128xf32>
    %390 = vector.broadcast %49 : vector<1x128xf32> to vector<8x128xf32>
    %391 = arith.addf %389, %390 : vector<8x128xf32>
    %392 = arith.negf %387 : vector<8x128xf32>
    %393 = math.exp %392 : vector<8x128xf32>
    %cst_108 = arith.constant 1.000000e+00 : f32
    %394 = vector.broadcast %cst_108 : f32 to vector<8x128xf32>
    %395 = arith.addf %394, %393 : vector<8x128xf32>
    %396 = arith.divf %394, %395 : vector<8x128xf32>
    %397 = vector.broadcast %55 : vector<1x128xf32> to vector<8x128xf32>
    %398 = arith.mulf %396, %397 : vector<8x128xf32>
    %399 = vector.broadcast %58 : vector<1x128xf32> to vector<8x128xf32>
    %400 = arith.addf %398, %399 : vector<8x128xf32>
    %401 = vector.extract_strided_slice %400 {offsets = [0, 0], sizes = [8, 32], strides = [1, 1]} : vector<8x128xf32> to vector<8x32xf32>
    %402 = vector.extract_strided_slice %400 {offsets = [0, 32], sizes = [8, 32], strides = [1, 1]} : vector<8x128xf32> to vector<8x32xf32>
    %403 = vector.extract_strided_slice %400 {offsets = [0, 64], sizes = [8, 32], strides = [1, 1]} : vector<8x128xf32> to vector<8x32xf32>
    %404 = vector.extract_strided_slice %400 {offsets = [0, 96], sizes = [8, 32], strides = [1, 1]} : vector<8x128xf32> to vector<8x32xf32>
    %405 = arith.mulf %402, %364 : vector<8x32xf32>
    %406 = arith.mulf %401, %404 : vector<8x32xf32>
    %407 = arith.addf %405, %406 : vector<8x32xf32>
    %408 = math.tanh %407 : vector<8x32xf32>
    %409 = arith.mulf %403, %408 : vector<8x32xf32>
    %410 = arith.negf %391 : vector<8x128xf32>
    %411 = math.exp %410 : vector<8x128xf32>
    %cst_109 = arith.constant 1.000000e+00 : f32
    %412 = vector.broadcast %cst_109 : f32 to vector<8x128xf32>
    %413 = arith.addf %412, %411 : vector<8x128xf32>
    %414 = arith.divf %412, %413 : vector<8x128xf32>
    %415 = vector.broadcast %55 : vector<1x128xf32> to vector<8x128xf32>
    %416 = arith.mulf %414, %415 : vector<8x128xf32>
    %417 = vector.broadcast %58 : vector<1x128xf32> to vector<8x128xf32>
    %418 = arith.addf %416, %417 : vector<8x128xf32>
    %419 = vector.extract_strided_slice %418 {offsets = [0, 0], sizes = [8, 32], strides = [1, 1]} : vector<8x128xf32> to vector<8x32xf32>
    %420 = vector.extract_strided_slice %418 {offsets = [0, 32], sizes = [8, 32], strides = [1, 1]} : vector<8x128xf32> to vector<8x32xf32>
    %421 = vector.extract_strided_slice %418 {offsets = [0, 64], sizes = [8, 32], strides = [1, 1]} : vector<8x128xf32> to vector<8x32xf32>
    %422 = vector.extract_strided_slice %418 {offsets = [0, 96], sizes = [8, 32], strides = [1, 1]} : vector<8x128xf32> to vector<8x32xf32>
    %423 = arith.mulf %420, %382 : vector<8x32xf32>
    %424 = arith.mulf %419, %422 : vector<8x32xf32>
    %425 = arith.addf %423, %424 : vector<8x32xf32>
    %426 = math.tanh %425 : vector<8x32xf32>
    %427 = arith.mulf %421, %426 : vector<8x32xf32>
    %c72 = arith.constant 72 : index
    %c0_110 = arith.constant 0 : index
    %428 = vector.load %arg9[%c72, %c0_110] : memref<128x128xf32, #tpu.memory_space<vmem>>, vector<8x128xf32>
    %cst_111 = arith.constant dense<0.000000e+00> : vector<8x128xf32>
    %429 = tpu.matmul %409, %47, %cst_111 {dimension_numbers = #tpu.dot_dimension_numbers<[1], [0], [0], [1], [0, 0, 1, 1], [], []>} : vector<8x32xf32>, vector<32x128xf32>, vector<8x128xf32> -> vector<8x128xf32>
    %430 = arith.addf %428, %429 : vector<8x128xf32>
    %431 = tpu.concatenate %409, %427 in 1 : vector<8x32xf32>, vector<8x32xf32> -> vector<8x64xf32>
    %cst_112 = arith.constant dense<0.000000e+00> : vector<8x128xf32>
    %432 = tpu.matmul %431, %48, %cst_112 {dimension_numbers = #tpu.dot_dimension_numbers<[1], [0], [0], [1], [0, 0, 1, 1], [], []>} : vector<8x64xf32>, vector<64x128xf32>, vector<8x128xf32> -> vector<8x128xf32>
    %433 = vector.broadcast %49 : vector<1x128xf32> to vector<8x128xf32>
    %434 = arith.addf %432, %433 : vector<8x128xf32>
    %435 = arith.negf %430 : vector<8x128xf32>
    %436 = math.exp %435 : vector<8x128xf32>
    %cst_113 = arith.constant 1.000000e+00 : f32
    %437 = vector.broadcast %cst_113 : f32 to vector<8x128xf32>
    %438 = arith.addf %437, %436 : vector<8x128xf32>
    %439 = arith.divf %437, %438 : vector<8x128xf32>
    %440 = vector.broadcast %55 : vector<1x128xf32> to vector<8x128xf32>
    %441 = arith.mulf %439, %440 : vector<8x128xf32>
    %442 = vector.broadcast %58 : vector<1x128xf32> to vector<8x128xf32>
    %443 = arith.addf %441, %442 : vector<8x128xf32>
    %444 = vector.extract_strided_slice %443 {offsets = [0, 0], sizes = [8, 32], strides = [1, 1]} : vector<8x128xf32> to vector<8x32xf32>
    %445 = vector.extract_strided_slice %443 {offsets = [0, 32], sizes = [8, 32], strides = [1, 1]} : vector<8x128xf32> to vector<8x32xf32>
    %446 = vector.extract_strided_slice %443 {offsets = [0, 64], sizes = [8, 32], strides = [1, 1]} : vector<8x128xf32> to vector<8x32xf32>
    %447 = vector.extract_strided_slice %443 {offsets = [0, 96], sizes = [8, 32], strides = [1, 1]} : vector<8x128xf32> to vector<8x32xf32>
    %448 = arith.mulf %445, %407 : vector<8x32xf32>
    %449 = arith.mulf %444, %447 : vector<8x32xf32>
    %450 = arith.addf %448, %449 : vector<8x32xf32>
    %451 = math.tanh %450 : vector<8x32xf32>
    %452 = arith.mulf %446, %451 : vector<8x32xf32>
    %453 = arith.negf %434 : vector<8x128xf32>
    %454 = math.exp %453 : vector<8x128xf32>
    %cst_114 = arith.constant 1.000000e+00 : f32
    %455 = vector.broadcast %cst_114 : f32 to vector<8x128xf32>
    %456 = arith.addf %455, %454 : vector<8x128xf32>
    %457 = arith.divf %455, %456 : vector<8x128xf32>
    %458 = vector.broadcast %55 : vector<1x128xf32> to vector<8x128xf32>
    %459 = arith.mulf %457, %458 : vector<8x128xf32>
    %460 = vector.broadcast %58 : vector<1x128xf32> to vector<8x128xf32>
    %461 = arith.addf %459, %460 : vector<8x128xf32>
    %462 = vector.extract_strided_slice %461 {offsets = [0, 0], sizes = [8, 32], strides = [1, 1]} : vector<8x128xf32> to vector<8x32xf32>
    %463 = vector.extract_strided_slice %461 {offsets = [0, 32], sizes = [8, 32], strides = [1, 1]} : vector<8x128xf32> to vector<8x32xf32>
    %464 = vector.extract_strided_slice %461 {offsets = [0, 64], sizes = [8, 32], strides = [1, 1]} : vector<8x128xf32> to vector<8x32xf32>
    %465 = vector.extract_strided_slice %461 {offsets = [0, 96], sizes = [8, 32], strides = [1, 1]} : vector<8x128xf32> to vector<8x32xf32>
    %466 = arith.mulf %463, %425 : vector<8x32xf32>
    %467 = arith.mulf %462, %465 : vector<8x32xf32>
    %468 = arith.addf %466, %467 : vector<8x32xf32>
    %469 = math.tanh %468 : vector<8x32xf32>
    %470 = arith.mulf %464, %469 : vector<8x32xf32>
    %c80 = arith.constant 80 : index
    %c0_115 = arith.constant 0 : index
    %471 = vector.load %arg9[%c80, %c0_115] : memref<128x128xf32, #tpu.memory_space<vmem>>, vector<8x128xf32>
    %cst_116 = arith.constant dense<0.000000e+00> : vector<8x128xf32>
    %472 = tpu.matmul %452, %47, %cst_116 {dimension_numbers = #tpu.dot_dimension_numbers<[1], [0], [0], [1], [0, 0, 1, 1], [], []>} : vector<8x32xf32>, vector<32x128xf32>, vector<8x128xf32> -> vector<8x128xf32>
    %473 = arith.addf %471, %472 : vector<8x128xf32>
    %474 = tpu.concatenate %452, %470 in 1 : vector<8x32xf32>, vector<8x32xf32> -> vector<8x64xf32>
    %cst_117 = arith.constant dense<0.000000e+00> : vector<8x128xf32>
    %475 = tpu.matmul %474, %48, %cst_117 {dimension_numbers = #tpu.dot_dimension_numbers<[1], [0], [0], [1], [0, 0, 1, 1], [], []>} : vector<8x64xf32>, vector<64x128xf32>, vector<8x128xf32> -> vector<8x128xf32>
    %476 = vector.broadcast %49 : vector<1x128xf32> to vector<8x128xf32>
    %477 = arith.addf %475, %476 : vector<8x128xf32>
    %478 = arith.negf %473 : vector<8x128xf32>
    %479 = math.exp %478 : vector<8x128xf32>
    %cst_118 = arith.constant 1.000000e+00 : f32
    %480 = vector.broadcast %cst_118 : f32 to vector<8x128xf32>
    %481 = arith.addf %480, %479 : vector<8x128xf32>
    %482 = arith.divf %480, %481 : vector<8x128xf32>
    %483 = vector.broadcast %55 : vector<1x128xf32> to vector<8x128xf32>
    %484 = arith.mulf %482, %483 : vector<8x128xf32>
    %485 = vector.broadcast %58 : vector<1x128xf32> to vector<8x128xf32>
    %486 = arith.addf %484, %485 : vector<8x128xf32>
    %487 = vector.extract_strided_slice %486 {offsets = [0, 0], sizes = [8, 32], strides = [1, 1]} : vector<8x128xf32> to vector<8x32xf32>
    %488 = vector.extract_strided_slice %486 {offsets = [0, 32], sizes = [8, 32], strides = [1, 1]} : vector<8x128xf32> to vector<8x32xf32>
    %489 = vector.extract_strided_slice %486 {offsets = [0, 64], sizes = [8, 32], strides = [1, 1]} : vector<8x128xf32> to vector<8x32xf32>
    %490 = vector.extract_strided_slice %486 {offsets = [0, 96], sizes = [8, 32], strides = [1, 1]} : vector<8x128xf32> to vector<8x32xf32>
    %491 = arith.mulf %488, %450 : vector<8x32xf32>
    %492 = arith.mulf %487, %490 : vector<8x32xf32>
    %493 = arith.addf %491, %492 : vector<8x32xf32>
    %494 = math.tanh %493 : vector<8x32xf32>
    %495 = arith.mulf %489, %494 : vector<8x32xf32>
    %496 = arith.negf %477 : vector<8x128xf32>
    %497 = math.exp %496 : vector<8x128xf32>
    %cst_119 = arith.constant 1.000000e+00 : f32
    %498 = vector.broadcast %cst_119 : f32 to vector<8x128xf32>
    %499 = arith.addf %498, %497 : vector<8x128xf32>
    %500 = arith.divf %498, %499 : vector<8x128xf32>
    %501 = vector.broadcast %55 : vector<1x128xf32> to vector<8x128xf32>
    %502 = arith.mulf %500, %501 : vector<8x128xf32>
    %503 = vector.broadcast %58 : vector<1x128xf32> to vector<8x128xf32>
    %504 = arith.addf %502, %503 : vector<8x128xf32>
    %505 = vector.extract_strided_slice %504 {offsets = [0, 0], sizes = [8, 32], strides = [1, 1]} : vector<8x128xf32> to vector<8x32xf32>
    %506 = vector.extract_strided_slice %504 {offsets = [0, 32], sizes = [8, 32], strides = [1, 1]} : vector<8x128xf32> to vector<8x32xf32>
    %507 = vector.extract_strided_slice %504 {offsets = [0, 64], sizes = [8, 32], strides = [1, 1]} : vector<8x128xf32> to vector<8x32xf32>
    %508 = vector.extract_strided_slice %504 {offsets = [0, 96], sizes = [8, 32], strides = [1, 1]} : vector<8x128xf32> to vector<8x32xf32>
    %509 = arith.mulf %506, %468 : vector<8x32xf32>
    %510 = arith.mulf %505, %508 : vector<8x32xf32>
    %511 = arith.addf %509, %510 : vector<8x32xf32>
    %512 = math.tanh %511 : vector<8x32xf32>
    %513 = arith.mulf %507, %512 : vector<8x32xf32>
    %c88 = arith.constant 88 : index
    %c0_120 = arith.constant 0 : index
    %514 = vector.load %arg9[%c88, %c0_120] : memref<128x128xf32, #tpu.memory_space<vmem>>, vector<8x128xf32>
    %cst_121 = arith.constant dense<0.000000e+00> : vector<8x128xf32>
    %515 = tpu.matmul %495, %47, %cst_121 {dimension_numbers = #tpu.dot_dimension_numbers<[1], [0], [0], [1], [0, 0, 1, 1], [], []>} : vector<8x32xf32>, vector<32x128xf32>, vector<8x128xf32> -> vector<8x128xf32>
    %516 = arith.addf %514, %515 : vector<8x128xf32>
    %517 = tpu.concatenate %495, %513 in 1 : vector<8x32xf32>, vector<8x32xf32> -> vector<8x64xf32>
    %cst_122 = arith.constant dense<0.000000e+00> : vector<8x128xf32>
    %518 = tpu.matmul %517, %48, %cst_122 {dimension_numbers = #tpu.dot_dimension_numbers<[1], [0], [0], [1], [0, 0, 1, 1], [], []>} : vector<8x64xf32>, vector<64x128xf32>, vector<8x128xf32> -> vector<8x128xf32>
    %519 = vector.broadcast %49 : vector<1x128xf32> to vector<8x128xf32>
    %520 = arith.addf %518, %519 : vector<8x128xf32>
    %521 = arith.negf %516 : vector<8x128xf32>
    %522 = math.exp %521 : vector<8x128xf32>
    %cst_123 = arith.constant 1.000000e+00 : f32
    %523 = vector.broadcast %cst_123 : f32 to vector<8x128xf32>
    %524 = arith.addf %523, %522 : vector<8x128xf32>
    %525 = arith.divf %523, %524 : vector<8x128xf32>
    %526 = vector.broadcast %55 : vector<1x128xf32> to vector<8x128xf32>
    %527 = arith.mulf %525, %526 : vector<8x128xf32>
    %528 = vector.broadcast %58 : vector<1x128xf32> to vector<8x128xf32>
    %529 = arith.addf %527, %528 : vector<8x128xf32>
    %530 = vector.extract_strided_slice %529 {offsets = [0, 0], sizes = [8, 32], strides = [1, 1]} : vector<8x128xf32> to vector<8x32xf32>
    %531 = vector.extract_strided_slice %529 {offsets = [0, 32], sizes = [8, 32], strides = [1, 1]} : vector<8x128xf32> to vector<8x32xf32>
    %532 = vector.extract_strided_slice %529 {offsets = [0, 64], sizes = [8, 32], strides = [1, 1]} : vector<8x128xf32> to vector<8x32xf32>
    %533 = vector.extract_strided_slice %529 {offsets = [0, 96], sizes = [8, 32], strides = [1, 1]} : vector<8x128xf32> to vector<8x32xf32>
    %534 = arith.mulf %531, %493 : vector<8x32xf32>
    %535 = arith.mulf %530, %533 : vector<8x32xf32>
    %536 = arith.addf %534, %535 : vector<8x32xf32>
    %537 = math.tanh %536 : vector<8x32xf32>
    %538 = arith.mulf %532, %537 : vector<8x32xf32>
    %539 = arith.negf %520 : vector<8x128xf32>
    %540 = math.exp %539 : vector<8x128xf32>
    %cst_124 = arith.constant 1.000000e+00 : f32
    %541 = vector.broadcast %cst_124 : f32 to vector<8x128xf32>
    %542 = arith.addf %541, %540 : vector<8x128xf32>
    %543 = arith.divf %541, %542 : vector<8x128xf32>
    %544 = vector.broadcast %55 : vector<1x128xf32> to vector<8x128xf32>
    %545 = arith.mulf %543, %544 : vector<8x128xf32>
    %546 = vector.broadcast %58 : vector<1x128xf32> to vector<8x128xf32>
    %547 = arith.addf %545, %546 : vector<8x128xf32>
    %548 = vector.extract_strided_slice %547 {offsets = [0, 0], sizes = [8, 32], strides = [1, 1]} : vector<8x128xf32> to vector<8x32xf32>
    %549 = vector.extract_strided_slice %547 {offsets = [0, 32], sizes = [8, 32], strides = [1, 1]} : vector<8x128xf32> to vector<8x32xf32>
    %550 = vector.extract_strided_slice %547 {offsets = [0, 64], sizes = [8, 32], strides = [1, 1]} : vector<8x128xf32> to vector<8x32xf32>
    %551 = vector.extract_strided_slice %547 {offsets = [0, 96], sizes = [8, 32], strides = [1, 1]} : vector<8x128xf32> to vector<8x32xf32>
    %552 = arith.mulf %549, %511 : vector<8x32xf32>
    %553 = arith.mulf %548, %551 : vector<8x32xf32>
    %554 = arith.addf %552, %553 : vector<8x32xf32>
    %555 = math.tanh %554 : vector<8x32xf32>
    %556 = arith.mulf %550, %555 : vector<8x32xf32>
    %c96 = arith.constant 96 : index
    %c0_125 = arith.constant 0 : index
    %557 = vector.load %arg9[%c96, %c0_125] : memref<128x128xf32, #tpu.memory_space<vmem>>, vector<8x128xf32>
    %cst_126 = arith.constant dense<0.000000e+00> : vector<8x128xf32>
    %558 = tpu.matmul %538, %47, %cst_126 {dimension_numbers = #tpu.dot_dimension_numbers<[1], [0], [0], [1], [0, 0, 1, 1], [], []>} : vector<8x32xf32>, vector<32x128xf32>, vector<8x128xf32> -> vector<8x128xf32>
    %559 = arith.addf %557, %558 : vector<8x128xf32>
    %560 = tpu.concatenate %538, %556 in 1 : vector<8x32xf32>, vector<8x32xf32> -> vector<8x64xf32>
    %cst_127 = arith.constant dense<0.000000e+00> : vector<8x128xf32>
    %561 = tpu.matmul %560, %48, %cst_127 {dimension_numbers = #tpu.dot_dimension_numbers<[1], [0], [0], [1], [0, 0, 1, 1], [], []>} : vector<8x64xf32>, vector<64x128xf32>, vector<8x128xf32> -> vector<8x128xf32>
    %562 = vector.broadcast %49 : vector<1x128xf32> to vector<8x128xf32>
    %563 = arith.addf %561, %562 : vector<8x128xf32>
    %564 = arith.negf %559 : vector<8x128xf32>
    %565 = math.exp %564 : vector<8x128xf32>
    %cst_128 = arith.constant 1.000000e+00 : f32
    %566 = vector.broadcast %cst_128 : f32 to vector<8x128xf32>
    %567 = arith.addf %566, %565 : vector<8x128xf32>
    %568 = arith.divf %566, %567 : vector<8x128xf32>
    %569 = vector.broadcast %55 : vector<1x128xf32> to vector<8x128xf32>
    %570 = arith.mulf %568, %569 : vector<8x128xf32>
    %571 = vector.broadcast %58 : vector<1x128xf32> to vector<8x128xf32>
    %572 = arith.addf %570, %571 : vector<8x128xf32>
    %573 = vector.extract_strided_slice %572 {offsets = [0, 0], sizes = [8, 32], strides = [1, 1]} : vector<8x128xf32> to vector<8x32xf32>
    %574 = vector.extract_strided_slice %572 {offsets = [0, 32], sizes = [8, 32], strides = [1, 1]} : vector<8x128xf32> to vector<8x32xf32>
    %575 = vector.extract_strided_slice %572 {offsets = [0, 64], sizes = [8, 32], strides = [1, 1]} : vector<8x128xf32> to vector<8x32xf32>
    %576 = vector.extract_strided_slice %572 {offsets = [0, 96], sizes = [8, 32], strides = [1, 1]} : vector<8x128xf32> to vector<8x32xf32>
    %577 = arith.mulf %574, %536 : vector<8x32xf32>
    %578 = arith.mulf %573, %576 : vector<8x32xf32>
    %579 = arith.addf %577, %578 : vector<8x32xf32>
    %580 = math.tanh %579 : vector<8x32xf32>
    %581 = arith.mulf %575, %580 : vector<8x32xf32>
    %582 = arith.negf %563 : vector<8x128xf32>
    %583 = math.exp %582 : vector<8x128xf32>
    %cst_129 = arith.constant 1.000000e+00 : f32
    %584 = vector.broadcast %cst_129 : f32 to vector<8x128xf32>
    %585 = arith.addf %584, %583 : vector<8x128xf32>
    %586 = arith.divf %584, %585 : vector<8x128xf32>
    %587 = vector.broadcast %55 : vector<1x128xf32> to vector<8x128xf32>
    %588 = arith.mulf %586, %587 : vector<8x128xf32>
    %589 = vector.broadcast %58 : vector<1x128xf32> to vector<8x128xf32>
    %590 = arith.addf %588, %589 : vector<8x128xf32>
    %591 = vector.extract_strided_slice %590 {offsets = [0, 0], sizes = [8, 32], strides = [1, 1]} : vector<8x128xf32> to vector<8x32xf32>
    %592 = vector.extract_strided_slice %590 {offsets = [0, 32], sizes = [8, 32], strides = [1, 1]} : vector<8x128xf32> to vector<8x32xf32>
    %593 = vector.extract_strided_slice %590 {offsets = [0, 64], sizes = [8, 32], strides = [1, 1]} : vector<8x128xf32> to vector<8x32xf32>
    %594 = vector.extract_strided_slice %590 {offsets = [0, 96], sizes = [8, 32], strides = [1, 1]} : vector<8x128xf32> to vector<8x32xf32>
    %595 = arith.mulf %592, %554 : vector<8x32xf32>
    %596 = arith.mulf %591, %594 : vector<8x32xf32>
    %597 = arith.addf %595, %596 : vector<8x32xf32>
    %598 = math.tanh %597 : vector<8x32xf32>
    %599 = arith.mulf %593, %598 : vector<8x32xf32>
    %c104 = arith.constant 104 : index
    %c0_130 = arith.constant 0 : index
    %600 = vector.load %arg9[%c104, %c0_130] : memref<128x128xf32, #tpu.memory_space<vmem>>, vector<8x128xf32>
    %cst_131 = arith.constant dense<0.000000e+00> : vector<8x128xf32>
    %601 = tpu.matmul %581, %47, %cst_131 {dimension_numbers = #tpu.dot_dimension_numbers<[1], [0], [0], [1], [0, 0, 1, 1], [], []>} : vector<8x32xf32>, vector<32x128xf32>, vector<8x128xf32> -> vector<8x128xf32>
    %602 = arith.addf %600, %601 : vector<8x128xf32>
    %603 = tpu.concatenate %581, %599 in 1 : vector<8x32xf32>, vector<8x32xf32> -> vector<8x64xf32>
    %cst_132 = arith.constant dense<0.000000e+00> : vector<8x128xf32>
    %604 = tpu.matmul %603, %48, %cst_132 {dimension_numbers = #tpu.dot_dimension_numbers<[1], [0], [0], [1], [0, 0, 1, 1], [], []>} : vector<8x64xf32>, vector<64x128xf32>, vector<8x128xf32> -> vector<8x128xf32>
    %605 = vector.broadcast %49 : vector<1x128xf32> to vector<8x128xf32>
    %606 = arith.addf %604, %605 : vector<8x128xf32>
    %607 = arith.negf %602 : vector<8x128xf32>
    %608 = math.exp %607 : vector<8x128xf32>
    %cst_133 = arith.constant 1.000000e+00 : f32
    %609 = vector.broadcast %cst_133 : f32 to vector<8x128xf32>
    %610 = arith.addf %609, %608 : vector<8x128xf32>
    %611 = arith.divf %609, %610 : vector<8x128xf32>
    %612 = vector.broadcast %55 : vector<1x128xf32> to vector<8x128xf32>
    %613 = arith.mulf %611, %612 : vector<8x128xf32>
    %614 = vector.broadcast %58 : vector<1x128xf32> to vector<8x128xf32>
    %615 = arith.addf %613, %614 : vector<8x128xf32>
    %616 = vector.extract_strided_slice %615 {offsets = [0, 0], sizes = [8, 32], strides = [1, 1]} : vector<8x128xf32> to vector<8x32xf32>
    %617 = vector.extract_strided_slice %615 {offsets = [0, 32], sizes = [8, 32], strides = [1, 1]} : vector<8x128xf32> to vector<8x32xf32>
    %618 = vector.extract_strided_slice %615 {offsets = [0, 64], sizes = [8, 32], strides = [1, 1]} : vector<8x128xf32> to vector<8x32xf32>
    %619 = vector.extract_strided_slice %615 {offsets = [0, 96], sizes = [8, 32], strides = [1, 1]} : vector<8x128xf32> to vector<8x32xf32>
    %620 = arith.mulf %617, %579 : vector<8x32xf32>
    %621 = arith.mulf %616, %619 : vector<8x32xf32>
    %622 = arith.addf %620, %621 : vector<8x32xf32>
    %623 = math.tanh %622 : vector<8x32xf32>
    %624 = arith.mulf %618, %623 : vector<8x32xf32>
    %625 = arith.negf %606 : vector<8x128xf32>
    %626 = math.exp %625 : vector<8x128xf32>
    %cst_134 = arith.constant 1.000000e+00 : f32
    %627 = vector.broadcast %cst_134 : f32 to vector<8x128xf32>
    %628 = arith.addf %627, %626 : vector<8x128xf32>
    %629 = arith.divf %627, %628 : vector<8x128xf32>
    %630 = vector.broadcast %55 : vector<1x128xf32> to vector<8x128xf32>
    %631 = arith.mulf %629, %630 : vector<8x128xf32>
    %632 = vector.broadcast %58 : vector<1x128xf32> to vector<8x128xf32>
    %633 = arith.addf %631, %632 : vector<8x128xf32>
    %634 = vector.extract_strided_slice %633 {offsets = [0, 0], sizes = [8, 32], strides = [1, 1]} : vector<8x128xf32> to vector<8x32xf32>
    %635 = vector.extract_strided_slice %633 {offsets = [0, 32], sizes = [8, 32], strides = [1, 1]} : vector<8x128xf32> to vector<8x32xf32>
    %636 = vector.extract_strided_slice %633 {offsets = [0, 64], sizes = [8, 32], strides = [1, 1]} : vector<8x128xf32> to vector<8x32xf32>
    %637 = vector.extract_strided_slice %633 {offsets = [0, 96], sizes = [8, 32], strides = [1, 1]} : vector<8x128xf32> to vector<8x32xf32>
    %638 = arith.mulf %635, %597 : vector<8x32xf32>
    %639 = arith.mulf %634, %637 : vector<8x32xf32>
    %640 = arith.addf %638, %639 : vector<8x32xf32>
    %641 = math.tanh %640 : vector<8x32xf32>
    %642 = arith.mulf %636, %641 : vector<8x32xf32>
    %c112 = arith.constant 112 : index
    %c0_135 = arith.constant 0 : index
    %643 = vector.load %arg9[%c112, %c0_135] : memref<128x128xf32, #tpu.memory_space<vmem>>, vector<8x128xf32>
    %cst_136 = arith.constant dense<0.000000e+00> : vector<8x128xf32>
    %644 = tpu.matmul %624, %47, %cst_136 {dimension_numbers = #tpu.dot_dimension_numbers<[1], [0], [0], [1], [0, 0, 1, 1], [], []>} : vector<8x32xf32>, vector<32x128xf32>, vector<8x128xf32> -> vector<8x128xf32>
    %645 = arith.addf %643, %644 : vector<8x128xf32>
    %646 = tpu.concatenate %624, %642 in 1 : vector<8x32xf32>, vector<8x32xf32> -> vector<8x64xf32>
    %cst_137 = arith.constant dense<0.000000e+00> : vector<8x128xf32>
    %647 = tpu.matmul %646, %48, %cst_137 {dimension_numbers = #tpu.dot_dimension_numbers<[1], [0], [0], [1], [0, 0, 1, 1], [], []>} : vector<8x64xf32>, vector<64x128xf32>, vector<8x128xf32> -> vector<8x128xf32>
    %648 = vector.broadcast %49 : vector<1x128xf32> to vector<8x128xf32>
    %649 = arith.addf %647, %648 : vector<8x128xf32>
    %650 = arith.negf %645 : vector<8x128xf32>
    %651 = math.exp %650 : vector<8x128xf32>
    %cst_138 = arith.constant 1.000000e+00 : f32
    %652 = vector.broadcast %cst_138 : f32 to vector<8x128xf32>
    %653 = arith.addf %652, %651 : vector<8x128xf32>
    %654 = arith.divf %652, %653 : vector<8x128xf32>
    %655 = vector.broadcast %55 : vector<1x128xf32> to vector<8x128xf32>
    %656 = arith.mulf %654, %655 : vector<8x128xf32>
    %657 = vector.broadcast %58 : vector<1x128xf32> to vector<8x128xf32>
    %658 = arith.addf %656, %657 : vector<8x128xf32>
    %659 = vector.extract_strided_slice %658 {offsets = [0, 0], sizes = [8, 32], strides = [1, 1]} : vector<8x128xf32> to vector<8x32xf32>
    %660 = vector.extract_strided_slice %658 {offsets = [0, 32], sizes = [8, 32], strides = [1, 1]} : vector<8x128xf32> to vector<8x32xf32>
    %661 = vector.extract_strided_slice %658 {offsets = [0, 64], sizes = [8, 32], strides = [1, 1]} : vector<8x128xf32> to vector<8x32xf32>
    %662 = vector.extract_strided_slice %658 {offsets = [0, 96], sizes = [8, 32], strides = [1, 1]} : vector<8x128xf32> to vector<8x32xf32>
    %663 = arith.mulf %660, %622 : vector<8x32xf32>
    %664 = arith.mulf %659, %662 : vector<8x32xf32>
    %665 = arith.addf %663, %664 : vector<8x32xf32>
    %666 = math.tanh %665 : vector<8x32xf32>
    %667 = arith.mulf %661, %666 : vector<8x32xf32>
    %668 = arith.negf %649 : vector<8x128xf32>
    %669 = math.exp %668 : vector<8x128xf32>
    %cst_139 = arith.constant 1.000000e+00 : f32
    %670 = vector.broadcast %cst_139 : f32 to vector<8x128xf32>
    %671 = arith.addf %670, %669 : vector<8x128xf32>
    %672 = arith.divf %670, %671 : vector<8x128xf32>
    %673 = vector.broadcast %55 : vector<1x128xf32> to vector<8x128xf32>
    %674 = arith.mulf %672, %673 : vector<8x128xf32>
    %675 = vector.broadcast %58 : vector<1x128xf32> to vector<8x128xf32>
    %676 = arith.addf %674, %675 : vector<8x128xf32>
    %677 = vector.extract_strided_slice %676 {offsets = [0, 0], sizes = [8, 32], strides = [1, 1]} : vector<8x128xf32> to vector<8x32xf32>
    %678 = vector.extract_strided_slice %676 {offsets = [0, 32], sizes = [8, 32], strides = [1, 1]} : vector<8x128xf32> to vector<8x32xf32>
    %679 = vector.extract_strided_slice %676 {offsets = [0, 64], sizes = [8, 32], strides = [1, 1]} : vector<8x128xf32> to vector<8x32xf32>
    %680 = vector.extract_strided_slice %676 {offsets = [0, 96], sizes = [8, 32], strides = [1, 1]} : vector<8x128xf32> to vector<8x32xf32>
    %681 = arith.mulf %678, %640 : vector<8x32xf32>
    %682 = arith.mulf %677, %680 : vector<8x32xf32>
    %683 = arith.addf %681, %682 : vector<8x32xf32>
    %684 = math.tanh %683 : vector<8x32xf32>
    %685 = arith.mulf %679, %684 : vector<8x32xf32>
    %c120_140 = arith.constant 120 : index
    %c0_141 = arith.constant 0 : index
    %686 = vector.load %arg9[%c120_140, %c0_141] : memref<128x128xf32, #tpu.memory_space<vmem>>, vector<8x128xf32>
    %cst_142 = arith.constant dense<0.000000e+00> : vector<8x128xf32>
    %687 = tpu.matmul %667, %47, %cst_142 {dimension_numbers = #tpu.dot_dimension_numbers<[1], [0], [0], [1], [0, 0, 1, 1], [], []>} : vector<8x32xf32>, vector<32x128xf32>, vector<8x128xf32> -> vector<8x128xf32>
    %688 = arith.addf %686, %687 : vector<8x128xf32>
    %689 = tpu.concatenate %667, %685 in 1 : vector<8x32xf32>, vector<8x32xf32> -> vector<8x64xf32>
    %cst_143 = arith.constant dense<0.000000e+00> : vector<8x128xf32>
    %690 = tpu.matmul %689, %48, %cst_143 {dimension_numbers = #tpu.dot_dimension_numbers<[1], [0], [0], [1], [0, 0, 1, 1], [], []>} : vector<8x64xf32>, vector<64x128xf32>, vector<8x128xf32> -> vector<8x128xf32>
    %691 = vector.broadcast %49 : vector<1x128xf32> to vector<8x128xf32>
    %692 = arith.addf %690, %691 : vector<8x128xf32>
    %693 = arith.negf %688 : vector<8x128xf32>
    %694 = math.exp %693 : vector<8x128xf32>
    %cst_144 = arith.constant 1.000000e+00 : f32
    %695 = vector.broadcast %cst_144 : f32 to vector<8x128xf32>
    %696 = arith.addf %695, %694 : vector<8x128xf32>
    %697 = arith.divf %695, %696 : vector<8x128xf32>
    %698 = vector.broadcast %55 : vector<1x128xf32> to vector<8x128xf32>
    %699 = arith.mulf %697, %698 : vector<8x128xf32>
    %700 = vector.broadcast %58 : vector<1x128xf32> to vector<8x128xf32>
    %701 = arith.addf %699, %700 : vector<8x128xf32>
    %702 = vector.extract_strided_slice %701 {offsets = [0, 0], sizes = [8, 32], strides = [1, 1]} : vector<8x128xf32> to vector<8x32xf32>
    %703 = vector.extract_strided_slice %701 {offsets = [0, 32], sizes = [8, 32], strides = [1, 1]} : vector<8x128xf32> to vector<8x32xf32>
    %704 = vector.extract_strided_slice %701 {offsets = [0, 64], sizes = [8, 32], strides = [1, 1]} : vector<8x128xf32> to vector<8x32xf32>
    %705 = vector.extract_strided_slice %701 {offsets = [0, 96], sizes = [8, 32], strides = [1, 1]} : vector<8x128xf32> to vector<8x32xf32>
    %706 = arith.mulf %703, %665 : vector<8x32xf32>
    %707 = arith.mulf %702, %705 : vector<8x32xf32>
    %708 = arith.addf %706, %707 : vector<8x32xf32>
    %709 = math.tanh %708 : vector<8x32xf32>
    %710 = arith.mulf %704, %709 : vector<8x32xf32>
    %711 = arith.negf %692 : vector<8x128xf32>
    %712 = math.exp %711 : vector<8x128xf32>
    %cst_145 = arith.constant 1.000000e+00 : f32
    %713 = vector.broadcast %cst_145 : f32 to vector<8x128xf32>
    %714 = arith.addf %713, %712 : vector<8x128xf32>
    %715 = arith.divf %713, %714 : vector<8x128xf32>
    %716 = vector.broadcast %55 : vector<1x128xf32> to vector<8x128xf32>
    %717 = arith.mulf %715, %716 : vector<8x128xf32>
    %718 = vector.broadcast %58 : vector<1x128xf32> to vector<8x128xf32>
    %719 = arith.addf %717, %718 : vector<8x128xf32>
    %720 = vector.extract_strided_slice %719 {offsets = [0, 0], sizes = [8, 32], strides = [1, 1]} : vector<8x128xf32> to vector<8x32xf32>
    %721 = vector.extract_strided_slice %719 {offsets = [0, 32], sizes = [8, 32], strides = [1, 1]} : vector<8x128xf32> to vector<8x32xf32>
    %722 = vector.extract_strided_slice %719 {offsets = [0, 64], sizes = [8, 32], strides = [1, 1]} : vector<8x128xf32> to vector<8x32xf32>
    %723 = vector.extract_strided_slice %719 {offsets = [0, 96], sizes = [8, 32], strides = [1, 1]} : vector<8x128xf32> to vector<8x32xf32>
    %724 = arith.mulf %721, %683 : vector<8x32xf32>
    %725 = arith.mulf %720, %723 : vector<8x32xf32>
    %726 = arith.addf %724, %725 : vector<8x32xf32>
    %727 = math.tanh %726 : vector<8x32xf32>
    %728 = arith.mulf %722, %727 : vector<8x32xf32>
    %729 = tpu.concatenate %710, %728 in 1 : vector<8x32xf32>, vector<8x32xf32> -> vector<8x64xf32>
    %cst_146 = arith.constant dense<0.000000e+00> : vector<8x128xf32>
    %730 = tpu.matmul %729, %48, %cst_146 {dimension_numbers = #tpu.dot_dimension_numbers<[1], [0], [0], [1], [0, 0, 1, 1], [], []>} : vector<8x64xf32>, vector<64x128xf32>, vector<8x128xf32> -> vector<8x128xf32>
    %731 = vector.broadcast %49 : vector<1x128xf32> to vector<8x128xf32>
    %732 = arith.addf %730, %731 : vector<8x128xf32>
    %733 = arith.negf %732 : vector<8x128xf32>
    %734 = math.exp %733 : vector<8x128xf32>
    %cst_147 = arith.constant 1.000000e+00 : f32
    %735 = vector.broadcast %cst_147 : f32 to vector<8x128xf32>
    %736 = arith.addf %735, %734 : vector<8x128xf32>
    %737 = arith.divf %735, %736 : vector<8x128xf32>
    %738 = vector.broadcast %55 : vector<1x128xf32> to vector<8x128xf32>
    %739 = arith.mulf %737, %738 : vector<8x128xf32>
    %740 = vector.broadcast %58 : vector<1x128xf32> to vector<8x128xf32>
    %741 = arith.addf %739, %740 : vector<8x128xf32>
    %742 = vector.extract_strided_slice %741 {offsets = [0, 0], sizes = [8, 32], strides = [1, 1]} : vector<8x128xf32> to vector<8x32xf32>
    %743 = vector.extract_strided_slice %741 {offsets = [0, 32], sizes = [8, 32], strides = [1, 1]} : vector<8x128xf32> to vector<8x32xf32>
    %744 = vector.extract_strided_slice %741 {offsets = [0, 64], sizes = [8, 32], strides = [1, 1]} : vector<8x128xf32> to vector<8x32xf32>
    %745 = vector.extract_strided_slice %741 {offsets = [0, 96], sizes = [8, 32], strides = [1, 1]} : vector<8x128xf32> to vector<8x32xf32>
    %746 = arith.mulf %743, %726 : vector<8x32xf32>
    %747 = arith.mulf %742, %745 : vector<8x32xf32>
    %748 = arith.addf %746, %747 : vector<8x32xf32>
    %749 = math.tanh %748 : vector<8x32xf32>
    %750 = arith.mulf %744, %749 : vector<8x32xf32>
    %c0_148 = arith.constant 0 : index
    %c0_149 = arith.constant 0 : index
    %751 = vector.load %arg4[%c0_148, %c0_149] : memref<32x8xf32, #tpu.memory_space<vmem>>, vector<32x8xf32>
    %cst_150 = arith.constant dense<0.000000e+00> : vector<8x8xf32>
    %752 = tpu.matmul %750, %751, %cst_150 {dimension_numbers = #tpu.dot_dimension_numbers<[1], [0], [0], [1], [0, 0, 1, 1], [], []>} : vector<8x32xf32>, vector<32x8xf32>, vector<8x8xf32> -> vector<8x8xf32>
    %c0_151 = arith.constant 0 : index
    %c0_152 = arith.constant 0 : index
    %753 = vector.load %arg5[%c0_151, %c0_152] : memref<1x8xf32, #tpu.memory_space<vmem>>, vector<1x8xf32>
    %754 = vector.broadcast %753 : vector<1x8xf32> to vector<8x8xf32>
    %755 = arith.addf %752, %754 : vector<8x8xf32>
    %c0_153 = arith.constant 0 : index
    %c0_154 = arith.constant 0 : index
    %756 = vector.load %arg6[%c0_153, %c0_154] : memref<8x8xf32, #tpu.memory_space<vmem>>, vector<8x8xf32>
    tpu.vector_store %arg6[%c0_153, %c0_154], %755 {strides = array<i32>} : memref<8x8xf32, #tpu.memory_space<vmem>>, vector<8x8xf32>,
    return
  }
}

</mosaic_0001>

<bundles_post_ra>
// kernel: conv1d_lstm_forward.1
= control target key start
LH: loop header
LB: loop body
LE: loop exit
PB: predicated region body
PF: predicated region fallthrough
CT: control target
= control target key end

     0   :  { %vm127_vm0 = vcmask 1043456   ;;  %vm24_vm1 = vcmask 31744   ;;  %v3430_v7 = vmov 0.0   ;;  %s4601_s0 = inlined_call_operand.vmem [shape: f32[128,4], index: 0, kind: input, shape index: {}]   ;;  %s4602_s1 = inlined_call_operand.vmem [shape: f32[3,4,8], index: 1, kind: input, shape index: {}]   ;;  %s4603_s2 = inlined_call_operand.vmem [shape: f32[1,8], index: 2, kind: input, shape index: {}]   ;;  %s4604_s3 = inlined_call_operand.vmem [shape: f32[122,128], index: 3, kind: input, shape index: {}]   ;;  %s4605_s4 = inlined_call_operand.vmem [shape: f32[32,8], index: 4, kind: input, shape index: {}]   ;;  %s4606_s5 = inlined_call_operand.vmem [shape: f32[1,8], index: 5, kind: input, shape index: {}]   ;;  %s4607_s6 = inlined_call_operand.hbm [shape: f32[8,8], index: 6, kind: output, shape index: {}]  }
   0x1   :  { %v3051_v0 = vld [vmem:[%s4602_s1 + $0x8] sm:$0xf]  ;;  %v27_v2 = vld [vmem:[%s4601_s0] sm:$0xff]  ;;  %v29_v5 = vld [vmem:[%s4601_s0 + $0x10] sm:$0xff]  ;;  %25 = vst.msk [vmem:[#allocation2] sm:$0xff] %vm24_vm1, %v3430_v7 }
   0x2   :  { %v28_v1 = vld [vmem:[%s4601_s0 + $0x8] sm:$0xff]  ;;  %3052 = vmatpush.msk.msra.mxu2 %vm127_vm0, %v3051_v0  ;;  %v3016_v3 = vld [vmem:[%s4602_s1 + $0x4] sm:$0xf]  ;;  %v75_v4 = vld [vmem:[%s4602_s1] sm:$0xf]  ;;  %43 = vst.msk [vmem:[#allocation2 + $0x8] sm:$0xff] %vm24_vm1, %v27_v2 }
   0x3   :  { %44 = vst.msk [vmem:[#allocation2 + $0x10] sm:$0xff] %vm24_vm1, %v28_v1  ;;  %3017 = vmatpush.msk.msra.mxu0 %vm127_vm0, %v3016_v3  ;;  %3034 = vmatpush.msk.msra.mxu1 %vm127_vm0, %v75_v4  ;;  %v3497_v6 = vld [vmem:[%s4604_s3 + $0x30] sm:$0xff]  ;;  %v30_v8 = vld [vmem:[%s4601_s0 + $0x18] sm:$0xff]  ;;  %v472_v10 = vld [vmem:[%s4604_s3] sm:$0xff] }
   0x4   :  { %871 = vmatpush.msrb.mxu2 %v3497_v6  ;;  %v672_v9 = vld [vmem:[%s4604_s3 + $0x10] sm:$0xff]  ;;  %3181 = vmatpush.msk.msra.mxu3 %vm127_vm0, %v3016_v3  ;;  %26 = vst.msk [vmem:[#allocation2 + $0x88] sm:$0xff] %vm24_vm1, %v3430_v7  ;;  %v31_v11 = vld [vmem:[%s4601_s0 + $0x20] sm:$0xff]  ;;  %v32_v12 = vld [vmem:[%s4601_s0 + $0x28] sm:$0xff] }
   0x5   :  { %736 = vmatpush.msrb.mxu1 %v672_v9  ;;  %606 = vmatpush.msrb.mxu0 %v472_v10  ;;  %45 = vst.msk [vmem:[#allocation2 + $0x18] sm:$0xff] %vm24_vm1, %v29_v5 }
   0x6   :  { %46 = vst.msk [vmem:[#allocation2 + $0x20] sm:$0xff] %vm24_vm1, %v30_v8 }
   0x7   :  { %11 = vsyncpa [#allocation6], 0  ;;  %47 = vst.msk [vmem:[#allocation2 + $0x28] sm:$0xff] %vm24_vm1, %v31_v11  ;;  %v33_v16 = vld [vmem:[%s4601_s0 + $0x30] sm:$0xff]  ;;  %v34_v18 = vld [vmem:[%s4601_s0 + $0x38] sm:$0xff]  ;;  %vm437_vm2 = vcmask 64512  }
   0x8   :  { %48 = vst.msk [vmem:[#allocation2 + $0x30] sm:$0xff] %vm24_vm1, %v32_v12  ;;  %v59_v15 = vld [vmem:[#allocation2] sm:$0xff]  ;;  %v3543_v20 = vld [vmem:[%s4604_s3 + $0x28] sm:$0xff]  ;;  %v37_v25 = vld [vmem:[%s4601_s0 + $0x50] sm:$0xff]  ;;  %s3432_s25 = smov 32   ;;  %s3433_s15 = smov 64  }
   0x9   :  { %v60_v14 = vld [vmem:[#allocation2 + $0x8] sm:$0xff]  ;;  %3035 = vmatmul.msk.f32.vlgmr.msra.gmra.mxu1 %vm24_vm1, %v59_v15  ;;  %49 = vst.msk [vmem:[#allocation2 + $0x38] sm:$0xff] %vm24_vm1, %v33_v16  ;;  %872 = vmatpush.msrb.mxu2 %v3543_v20  ;;  %v35_v21 = vld [vmem:[%s4601_s0 + $0x40] sm:$0xff]  ;;  %v38_v27 = vld [vmem:[%s4601_s0 + $0x58] sm:$0xff]  ;;  %vm855_vm8 = vcmask 261120   ;;  %vm948_vm9 = vcmask 523264  }
   0xa   :  { %v267_v13 = vld [vmem:[#allocation2 + $0x10] sm:$0xff]  ;;  %3018 = vmatmul.msk.f32.vlgmr.msra.gmra.mxu0 %vm24_vm1, %v60_v14  ;;  %2386 = vmatpush.msra.mxu1 %v3497_v6  ;;  %50 = vst.msk [vmem:[#allocation2 + $0x40] sm:$0xff] %vm24_vm1, %v34_v18  ;;  %v36_v23 = vld [vmem:[%s4601_s0 + $0x48] sm:$0xff]  ;;  %v3578_v29 = vld [vmem:[%s4604_s3 + $0x20] sm:$0xff]  ;;  %s3434_s20 = smov 96   ;;  %s3435_s19 = smov [#allocation5]  }
   0xb   :  { %3053 = vmatmul.msk.f32.vlgmr.msra.gmra.mxu2 %vm24_vm1, %v267_v13  ;;  %51 = vst.msk [vmem:[#allocation2 + $0x48] sm:$0xff] %vm24_vm1, %v35_v21  ;;  %v39_v30 = vld [vmem:[%s4601_s0 + $0x60] sm:$0xff]  ;;  %v40_v32 = vld [vmem:[%s4601_s0 + $0x68] sm:$0xff]  ;;  %v41_v34 = vld [vmem:[%s4601_s0 + $0x70] sm:$0xff]  ;;  %s3007_s23 = sshll.u32 %s4607_s6, 4  ;;  %s3008_s23 = int_to_ptr.hbm [resolvable:$true] %s3007_s23 }
   0xc   :  { %v268_v17 = vld [vmem:[#allocation2 + $0x18] sm:$0xff]  ;;  %2387 = vmatpush.msra.mxu1 %v3543_v20  ;;  %52 = vst.msk [vmem:[#allocation2 + $0x50] sm:$0xff] %vm24_vm1, %v36_v23  ;;  %873 = vmatpush.msrb.mxu2 %v3578_v29  ;;  %v474_v43 = vld [vmem:[%s4604_s3 + $0x8] sm:$0xff]  ;;  %v3650_v49 = vld [vmem:[%s4603_s2] ss:$0 sm:$0xff] }
   0xd   :  { %v269_v19 = vld [vmem:[#allocation2 + $0x20] sm:$0xff]  ;;  %53 = vst.msk [vmem:[#allocation2 + $0x58] sm:$0xff] %vm24_vm1, %v37_v25  ;;  %v42_v36 = vld [vmem:[%s4601_s0 + $0x78] sm:$0xff]  ;;  %538 = vmatpush.msrb.mxu3 %v474_v43  ;;  %v282_v44 = vld [vmem:[#allocation2 + $0x88] sm:$0xff]  ;;  %s3005_s0 = sshll.u32 %s3435_s19, 4  ;;  %s3006_s0 = int_to_ptr.vmem [resolvable:$true] %s3005_s0 }
   0xe   :  { %v270_v22 = vld [vmem:[#allocation2 + $0x28] sm:$0xff]  ;;  %54 = vst.msk [vmem:[#allocation2 + $0x60] sm:$0xff] %vm24_vm1, %v38_v27  ;;  %2388 = vmatpush.msra.mxu1 %v3578_v29  ;;  %v3613_v38 = vld [vmem:[%s4604_s3 + $0x18] sm:$0xff] }
   0xf   :  { %v271_v24 = vld [vmem:[#allocation2 + $0x30] sm:$0xff]  ;;  %55 = vst.msk [vmem:[#allocation2 + $0x68] sm:$0xff] %vm24_vm1, %v39_v30  ;;  %874 = vmatpush.msrb.mxu2 %v3613_v38 }
  0x10   :  { %v272_v26 = vld [vmem:[#allocation2 + $0x38] sm:$0xff]  ;;  %56 = vst.msk [vmem:[#allocation2 + $0x70] sm:$0xff] %vm24_vm1, %v40_v32  ;;  %2389 = vmatpush.msra.mxu1 %v3613_v38 }
  0x11   :  { %3036 = vmatmul.msk.f32.gmra.mxu1 %vm24_vm1, %v60_v14  ;;  %v273_v28 = vld [vmem:[#allocation2 + $0x40] sm:$0xff]  ;;  %57 = vst.msk [vmem:[#allocation2 + $0x78] sm:$0xff] %vm24_vm1, %v41_v34 }
  0x12   :  { %3019 = vmatmul.msk.f32.gmra.mxu0 %vm24_vm1, %v267_v13  ;;  %v274_v31 = vld [vmem:[#allocation2 + $0x48] sm:$0xff]  ;;  %58 = vst.msk [vmem:[#allocation2 + $0x80] sm:$0xff] %vm24_vm1, %v42_v36 }
  0x13   :  { %3054 = vmatmul.msk.f32.gmra.mxu2 %vm24_vm1, %v268_v17  ;;  %v275_v33 = vld [vmem:[#allocation2 + $0x50] sm:$0xff]  ;;  %438 = vst.msk [vmem:[#allocation3] sm:$0xff] %vm437_vm2, %v3430_v7 }
  0x14   :  { %v276_v35 = vld [vmem:[#allocation2 + $0x58] sm:$0xff]  ;;  %439 = vst.msk [vmem:[#allocation3 + $0x88] sm:$0xff] %vm437_vm2, %v3430_v7 }
  0x15   :  { %v277_v37 = vld [vmem:[#allocation2 + $0x60] sm:$0xff] }
  0x16   :  { %v278_v40 = vld [vmem:[#allocation2 + $0x68] sm:$0xff] }
  0x17   :  { %v279_v41 = vld [vmem:[#allocation2 + $0x70] sm:$0xff] }
  0x18   :  { %v280_v42 = vld [vmem:[#allocation2 + $0x78] sm:$0xff] }
  0x19   :  { %3037 = vmatmul.msk.f32.gmra.mxu1 %vm24_vm1, %v267_v13  ;;  %v281_v39 = vld [vmem:[#allocation2 + $0x80] sm:$0xff] }
  0x1a   :  { %3020 = vmatmul.msk.f32.gmra.mxu0 %vm24_vm1, %v268_v17  ;;  %3033 = vmatmul.msk.f32.vlgmr.msra.gmra.mxu3 %vm24_vm1, %v281_v39  ;;  %v456_v45 = vld [vmem:[#allocation3] sm:$0xff] }
  0x1b   :  { %3055 = vmatmul.msk.f32.gmra.mxu2 %vm24_vm1, %v269_v19  ;;  %936 = vmatpush.msra.mxu3 %v3497_v6 }
  0x1d   :  { %937 = vmatpush.msra.mxu3 %v3543_v20 }
  0x1f   :  { %938 = vmatpush.msra.mxu3 %v3578_v29 }
  0x21   :  { %3038 = vmatmul.msk.f32.gmra.mxu1 %vm24_vm1, %v268_v17  ;;  %939 = vmatpush.msra.mxu3 %v3613_v38 }
  0x22   :  { %3021 = vmatmul.msk.f32.gmra.mxu0 %vm24_vm1, %v269_v19 }
  0x23   :  { %3056 = vmatmul.msk.f32.gmra.mxu2 %vm24_vm1, %v270_v22 }
  0x29   :  { %3039 = vmatmul.msk.f32.gmra.mxu1 %vm24_vm1, %v269_v19 }
  0x2a   :  { %3022 = vmatmul.msk.f32.gmra.mxu0 %vm24_vm1, %v270_v22 }
  0x2b   :  { %3057 = vmatmul.msk.f32.gmra.mxu2 %vm24_vm1, %v271_v24 }
  0x31   :  { %3040 = vmatmul.msk.f32.gmra.mxu1 %vm24_vm1, %v270_v22 }
  0x32   :  { %3023 = vmatmul.msk.f32.gmra.mxu0 %vm24_vm1, %v271_v24 }
  0x33   :  { %3058 = vmatmul.msk.f32.gmra.mxu2 %vm24_vm1, %v272_v26 }
  0x39   :  { %3041 = vmatmul.msk.f32.gmra.mxu1 %vm24_vm1, %v271_v24 }
  0x3a   :  { %3024 = vmatmul.msk.f32.gmra.mxu0 %vm24_vm1, %v272_v26 }
  0x3b   :  { %3059 = vmatmul.msk.f32.gmra.mxu2 %vm24_vm1, %v273_v28 }
  0x41   :  { %3042 = vmatmul.msk.f32.gmra.mxu1 %vm24_vm1, %v272_v26 }
  0x42   :  { %3025 = vmatmul.msk.f32.gmra.mxu0 %vm24_vm1, %v273_v28 }
  0x43   :  { %3060 = vmatmul.msk.f32.gmra.mxu2 %vm24_vm1, %v274_v31 }
  0x49   :  { %3043 = vmatmul.msk.f32.gmra.mxu1 %vm24_vm1, %v273_v28 }
  0x4a   :  { %3026 = vmatmul.msk.f32.gmra.mxu0 %vm24_vm1, %v274_v31 }
  0x4b   :  { %3061 = vmatmul.msk.f32.gmra.mxu2 %vm24_vm1, %v275_v33 }
  0x51   :  { %3044 = vmatmul.msk.f32.gmra.mxu1 %vm24_vm1, %v274_v31 }
  0x52   :  { %3027 = vmatmul.msk.f32.gmra.mxu0 %vm24_vm1, %v275_v33 }
  0x53   :  { %3062 = vmatmul.msk.f32.gmra.mxu2 %vm24_vm1, %v276_v35 }
  0x59   :  { %3045 = vmatmul.msk.f32.gmra.mxu1 %vm24_vm1, %v275_v33 }
  0x5a   :  { %3028 = vmatmul.msk.f32.gmra.mxu0 %vm24_vm1, %v276_v35 }
  0x5b   :  { %3063 = vmatmul.msk.f32.gmra.mxu2 %vm24_vm1, %v277_v37 }
  0x61   :  { %3046 = vmatmul.msk.f32.gmra.mxu1 %vm24_vm1, %v276_v35 }
  0x62   :  { %3029 = vmatmul.msk.f32.gmra.mxu0 %vm24_vm1, %v277_v37 }
  0x63   :  { %3064 = vmatmul.msk.f32.gmra.mxu2 %vm24_vm1, %v278_v40 }
  0x69   :  { %3047 = vmatmul.msk.f32.gmra.mxu1 %vm24_vm1, %v277_v37 }
  0x6a   :  { %3030 = vmatmul.msk.f32.gmra.mxu0 %vm24_vm1, %v278_v40 }
  0x6b   :  { %3065 = vmatmul.msk.f32.gmra.mxu2 %vm24_vm1, %v279_v41 }
  0x71   :  { %3048 = vmatmul.msk.f32.gmra.mxu1 %vm24_vm1, %v278_v40 }
  0x72   :  { %3031 = vmatmul.msk.f32.gmra.mxu0 %vm24_vm1, %v279_v41 }
  0x73   :  { %3066 = vmatmul.msk.f32.gmra.mxu2 %vm24_vm1, %v280_v42 }
  0x79   :  { %3049 = vmatmul.msk.f32.gmra.mxu1 %vm24_vm1, %v279_v41 }
  0x7a   :  { %3032 = vmatmul.msk.f32.gmra.mxu0 %vm24_vm1, %v280_v42 }
  0x7b   :  { %3067 = vmatmul.msk.f32.gmra.mxu2 %vm24_vm1, %v281_v39 }
  0x81   :  { %3050 = vmatmul.msk.f32.gmra.mxu1 %vm24_vm1, %v280_v42 }
  0x82   :  { %3085 = vmatmul.msk.f32.vlgmr.msrb.gmra.mxu0 %vm437_vm2, %v456_v45 }
  0x83   :  { %3068 = vmatmul.msk.f32.gmra.mxu2 %vm24_vm1, %v282_v44 }
  0x86   :  { %v219_v47 = vpop.f32.mrf.mxu1 }
  0x87   :  { %v148_v46 = vpop.f32.mrf.mxu0 }
  0x88   :  { %v220_v48 = vadd.f32 %v219_v47, %v148_v46 }
  0x8b   :  { %875 = vmatmul.f32.vlgmr.msrb.gmra.mxu2 %v3430_v7 }
  0x8e   :  { %v353_v50 = vpop.f32.mrf.mxu2  ;;  %v222_v54 = vpop.f32.mrf.mxu1 }
  0x8f   :  { %v401_v51 = vadd.f32 %v353_v50, %v220_v48  ;;  %v151_v53 = vpop.f32.mrf.mxu0 }
  0x90   :  { %v223_v55 = vadd.f32 %v222_v54, %v151_v53 }
  0x91   :  { %v421_v52 = vadd.f32 %v3650_v49, %v401_v51 }
  0x93   :  { %440 = vst.msk [vmem:[#allocation3 + $0x8] sm:$0xff] %vm437_vm2, %v421_v52 }
  0x96   :  { %v356_v56 = vpop.f32.mrf.mxu2  ;;  %v225_v61 = vpop.f32.mrf.mxu1 }
  0x97   :  { %v402_v57 = vadd.f32 %v356_v56, %v223_v55  ;;  %v154_v59 = vpop.f32.mrf.mxu0 }
  0x98   :  { %v226_v62 = vadd.f32 %v225_v61, %v154_v59 }
  0x99   :  { %v422_v58 = vadd.f32 %v3650_v49, %v402_v57 }
  0x9a   :  { %v457_v60 = vld [vmem:[#allocation3 + $0x8] sm:$0xff] }
  0x9b   :  { %441 = vst.msk [vmem:[#allocation3 + $0x10] sm:$0xff] %vm437_vm2, %v422_v58  ;;  %3069 = vmatmul.msk.f32.vlgmr.msrb.gmra.mxu3 %vm437_vm2, %v457_v60  ;;  %3086 = vmatmul.msk.f32.gmra.mxu0 %vm437_vm2, %v457_v60 }
  0x9c   :  { %1066 = vmatpush.msrb.mxu3 %v3497_v6 }
  0x9e   :  { %v359_v63 = vpop.f32.mrf.mxu2  ;;  %1067 = vmatpush.msrb.mxu3 %v3543_v20  ;;  %v228_v4 = vpop.f32.mrf.mxu1 }
  0x9f   :  { %v403_v0 = vadd.f32 %v359_v63, %v226_v62  ;;  %v157_v2 = vpop.f32.mrf.mxu0 }
  0xa0   :  { %1068 = vmatpush.msrb.mxu3 %v3578_v29  ;;  %v229_v5 = vadd.f32 %v228_v4, %v157_v2 }
  0xa1   :  { %v423_v1 = vadd.f32 %v3650_v49, %v403_v0 }
  0xa2   :  { %v458_v3 = vld [vmem:[#allocation3 + $0x10] sm:$0xff]  ;;  %1069 = vmatpush.msrb.mxu3 %v3613_v38 }
  0xa3   :  { %442 = vst.msk [vmem:[#allocation3 + $0x18] sm:$0xff] %vm437_vm2, %v423_v1  ;;  %3070 = vmatmul.msk.f32.gmra.mxu3 %vm437_vm2, %v458_v3  ;;  %3087 = vmatmul.msk.f32.gmra.mxu0 %vm437_vm2, %v458_v3 }
  0xa4   :  { %3101 = vmatmul.msk.f32.vlgmr.msrb.gmra.mxu1 %vm437_vm2, %v458_v3 }
  0xa5   :  { %2650 = vmatpush.msrb.mxu1 %v3497_v6 }
  0xa6   :  { %v362_v8 = vpop.f32.mrf.mxu2  ;;  %v231_v13 = vpop.f32.mrf.mxu1 }
  0xa7   :  { %v404_v9 = vadd.f32 %v362_v8, %v229_v5  ;;  %2651 = vmatpush.msrb.mxu1 %v3543_v20  ;;  %v160_v11 = vpop.f32.mrf.mxu0 }
  0xa8   :  { %v232_v14 = vadd.f32 %v231_v13, %v160_v11 }
  0xa9   :  { %v424_v10 = vadd.f32 %v3650_v49, %v404_v9  ;;  %2652 = vmatpush.msrb.mxu1 %v3578_v29 }
  0xaa   :  { %v459_v12 = vld [vmem:[#allocation3 + $0x18] sm:$0xff] }
  0xab   :  { %443 = vst.msk [vmem:[#allocation3 + $0x20] sm:$0xff] %vm437_vm2, %v424_v10  ;;  %3071 = vmatmul.msk.f32.gmra.mxu3 %vm437_vm2, %v459_v12  ;;  %3088 = vmatmul.msk.f32.gmra.mxu0 %vm437_vm2, %v459_v12 }
  0xac   :  { %3102 = vmatmul.msk.f32.gmra.mxu1 %vm437_vm2, %v459_v12 }
  0xad   :  { %2653 = vmatpush.msrb.mxu1 %v3613_v38 }
  0xae   :  { %v365_v15 = vpop.f32.mrf.mxu2  ;;  %v234_v21 = vpop.f32.mrf.mxu1 }
  0xaf   :  { %v405_v16 = vadd.f32 %v365_v15, %v232_v14  ;;  %v163_v18 = vpop.f32.mrf.mxu0 }
  0xb0   :  { %v235_v22 = vadd.f32 %v234_v21, %v163_v18 }
  0xb1   :  { %v425_v17 = vadd.f32 %v3650_v49, %v405_v16 }
  0xb2   :  { %v658_v19 = vld [vmem:[#allocation3 + $0x20] sm:$0xff] }
  0xb3   :  { %444 = vst.msk [vmem:[#allocation3 + $0x28] sm:$0xff] %vm437_vm2, %v425_v17  ;;  %3072 = vmatmul.msk.f32.gmra.mxu3 %vm437_vm2, %v658_v19  ;;  %3089 = vmatmul.msk.f32.gmra.mxu0 %vm437_vm2, %v658_v19 }
  0xb4   :  { %3103 = vmatmul.msk.f32.gmra.mxu1 %vm437_vm2, %v658_v19 }
  0xb6   :  { %v368_v23 = vpop.f32.mrf.mxu2  ;;  %v237_v28 = vpop.f32.mrf.mxu1 }
  0xb7   :  { %v406_v24 = vadd.f32 %v368_v23, %v235_v22  ;;  %v166_v26 = vpop.f32.mrf.mxu0 }
  0xb8   :  { %v238_v30 = vadd.f32 %v237_v28, %v166_v26 }
  0xb9   :  { %v426_v25 = vadd.f32 %v3650_v49, %v406_v24 }
  0xba   :  { %v461_v27 = vld [vmem:[#allocation3 + $0x28] sm:$0xff] }
  0xbb   :  { %445 = vst.msk [vmem:[#allocation3 + $0x30] sm:$0xff] %vm437_vm2, %v426_v25  ;;  %3073 = vmatmul.msk.f32.gmra.mxu3 %vm437_vm2, %v461_v27  ;;  %3090 = vmatmul.msk.f32.gmra.mxu0 %vm437_vm2, %v461_v27 }
  0xbc   :  { %3104 = vmatmul.msk.f32.gmra.mxu1 %vm437_vm2, %v461_v27 }
  0xbe   :  { %v371_v31 = vpop.f32.mrf.mxu2  ;;  %v240_v36 = vpop.f32.mrf.mxu1 }
  0xbf   :  { %v407_v32 = vadd.f32 %v371_v31, %v238_v30  ;;  %v169_v34 = vpop.f32.mrf.mxu0  ;;  %v193_v31 = vpop.f32.mrf.mxu3 }
  0xc0   :  { %v241_v37 = vadd.f32 %v240_v36, %v169_v34 }
  0xc1   :  { %v427_v33 = vadd.f32 %v3650_v49, %v407_v32 }
  0xc2   :  { %v462_v35 = vld [vmem:[#allocation3 + $0x30] sm:$0xff] }
  0xc3   :  { %446 = vst.msk [vmem:[#allocation3 + $0x38] sm:$0xff] %vm437_vm2, %v427_v33  ;;  %3074 = vmatmul.msk.f32.gmra.mxu3 %vm437_vm2, %v462_v35  ;;  %3091 = vmatmul.msk.f32.gmra.mxu0 %vm437_vm2, %v462_v35 }
  0xc4   :  { %3105 = vmatmul.msk.f32.gmra.mxu1 %vm437_vm2, %v462_v35 }
  0xc6   :  { %v374_v39 = vpop.f32.mrf.mxu2  ;;  %v243_v44 = vpop.f32.mrf.mxu1 }
  0xc7   :  { %v408_v40 = vadd.f32 %v374_v39, %v241_v37  ;;  %v172_v42 = vpop.f32.mrf.mxu0 }
  0xc8   :  { %v244_v45 = vadd.f32 %v243_v44, %v172_v42  ;;  %v671_v44 = vld [vmem:[#allocation3 + $0x88] sm:$0xff] }
  0xc9   :  { %v428_v41 = vadd.f32 %v3650_v49, %v408_v40 }
  0xca   :  { %v463_v43 = vld [vmem:[#allocation3 + $0x38] sm:$0xff] }
  0xcb   :  { %447 = vst.msk [vmem:[#allocation3 + $0x40] sm:$0xff] %vm437_vm2, %v428_v41  ;;  %3075 = vmatmul.msk.f32.gmra.mxu3 %vm437_vm2, %v463_v43  ;;  %3092 = vmatmul.msk.f32.gmra.mxu0 %vm437_vm2, %v463_v43 }
  0xcc   :  { %3106 = vmatmul.msk.f32.gmra.mxu1 %vm437_vm2, %v463_v43 }
  0xce   :  { %v377_v46 = vpop.f32.mrf.mxu2  ;;  %v246_v52 = vpop.f32.mrf.mxu1 }
  0xcf   :  { %v409_v47 = vadd.f32 %v377_v46, %v244_v45  ;;  %v175_v50 = vpop.f32.mrf.mxu0 }
  0xd0   :  { %v247_v53 = vadd.f32 %v246_v52, %v175_v50 }
  0xd1   :  { %v429_v48 = vadd.f32 %v3650_v49, %v409_v47  ;;  %v3746_v47 = vld [vmem:[%s4604_s3 + $0x78] ss:$0 sm:$0xff] }
  0xd2   :  { %v464_v51 = vld [vmem:[#allocation3 + $0x40] sm:$0xff] }
  0xd3   :  { %448 = vst.msk [vmem:[#allocation3 + $0x48] sm:$0xff] %vm437_vm2, %v429_v48  ;;  %3076 = vmatmul.msk.f32.gmra.mxu3 %vm437_vm2, %v464_v51  ;;  %3093 = vmatmul.msk.f32.gmra.mxu0 %vm437_vm2, %v464_v51 }
  0xd4   :  { %3107 = vmatmul.msk.f32.gmra.mxu1 %vm437_vm2, %v464_v51 }
  0xd6   :  { %v380_v54 = vpop.f32.mrf.mxu2  ;;  %v249_v59 = vpop.f32.mrf.mxu1 }
  0xd7   :  { %v410_v55 = vadd.f32 %v380_v54, %v247_v53  ;;  %v178_v57 = vpop.f32.mrf.mxu0 }
  0xd8   :  { %v250_v60 = vadd.f32 %v249_v59, %v178_v57 }
  0xd9   :  { %v430_v56 = vadd.f32 %v3650_v49, %v410_v55 }
  0xda   :  { %v465_v58 = vld [vmem:[#allocation3 + $0x48] sm:$0xff] }
  0xdb   :  { %449 = vst.msk [vmem:[#allocation3 + $0x50] sm:$0xff] %vm437_vm2, %v430_v56  ;;  %3077 = vmatmul.msk.f32.gmra.mxu3 %vm437_vm2, %v465_v58  ;;  %3094 = vmatmul.msk.f32.gmra.mxu0 %vm437_vm2, %v465_v58 }
  0xdc   :  { %3108 = vmatmul.msk.f32.gmra.mxu1 %vm437_vm2, %v465_v58 }
  0xde   :  { %v383_v61 = vpop.f32.mrf.mxu2  ;;  %v252_v2 = vpop.f32.mrf.mxu1 }
  0xdf   :  { %v411_v62 = vadd.f32 %v383_v61, %v250_v60  ;;  %v181_v0 = vpop.f32.mrf.mxu0 }
  0xe0   :  { %v253_v3 = vadd.f32 %v252_v2, %v181_v0 }
  0xe1   :  { %v431_v63 = vadd.f32 %v3650_v49, %v411_v62 }
  0xe2   :  { %v466_v1 = vld [vmem:[#allocation3 + $0x50] sm:$0xff] }
  0xe3   :  { %450 = vst.msk [vmem:[#allocation3 + $0x58] sm:$0xff] %vm437_vm2, %v431_v63  ;;  %3078 = vmatmul.msk.f32.gmra.mxu3 %vm437_vm2, %v466_v1  ;;  %3095 = vmatmul.msk.f32.gmra.mxu0 %vm437_vm2, %v466_v1  ;;  %v849_v63 = vlaneseq }
  0xe4   :  { %3109 = vmatmul.msk.f32.gmra.mxu1 %vm437_vm2, %v466_v1 }
  0xe6   :  { %v386_v4 = vpop.f32.mrf.mxu2  ;;  %v255_v11 = vpop.f32.mrf.mxu1 }
  0xe7   :  { %v412_v5 = vadd.f32 %v386_v4, %v253_v3  ;;  %v184_v9 = vpop.f32.mrf.mxu0  ;;  %v850_v3 = vand.u32 127, %v849_v63 }
  0xe8   :  { %v256_v12 = vadd.f32 %v255_v11, %v184_v9 }
  0xe9   :  { %v432_v8 = vadd.f32 %v3650_v49, %v412_v5  ;;  %vm851_vm3 = vcmp.ge.s32.totalorder %v850_v3, 96 }
  0xea   :  { %v467_v10 = vld [vmem:[#allocation3 + $0x58] sm:$0xff] }
  0xeb   :  { %451 = vst.msk [vmem:[#allocation3 + $0x60] sm:$0xff] %vm437_vm2, %v432_v8  ;;  %3079 = vmatmul.msk.f32.gmra.mxu3 %vm437_vm2, %v467_v10  ;;  %3096 = vmatmul.msk.f32.gmra.mxu0 %vm437_vm2, %v467_v10 }
  0xec   :  { %3110 = vmatmul.msk.f32.gmra.mxu1 %vm437_vm2, %v467_v10 }
  0xee   :  { %v389_v13 = vpop.f32.mrf.mxu2  ;;  %v258_v18 = vpop.f32.mrf.mxu1 }
  0xef   :  { %v413_v14 = vadd.f32 %v389_v13, %v256_v12  ;;  %v187_v16 = vpop.f32.mrf.mxu0 }
  0xf0   :  { %v259_v19 = vadd.f32 %v258_v18, %v187_v16  ;;  %v3431_v16 = vmov 1.0  }
  0xf1   :  { %v433_v15 = vadd.f32 %v3650_v49, %v413_v14 }
  0xf2   :  { %v468_v17 = vld [vmem:[#allocation3 + $0x60] sm:$0xff] }
  0xf3   :  { %452 = vst.msk [vmem:[#allocation3 + $0x68] sm:$0xff] %vm437_vm2, %v433_v15  ;;  %3080 = vmatmul.msk.f32.gmra.mxu3 %vm437_vm2, %v468_v17  ;;  %3097 = vmatmul.msk.f32.gmra.mxu0 %vm437_vm2, %v468_v17 }
  0xf4   :  { %3111 = vmatmul.msk.f32.gmra.mxu1 %vm437_vm2, %v468_v17  ;;  %v3774_v17 = vsel %vm851_vm3, 2.0, %v3431_v16 }
  0xf6   :  { %v392_v21 = vpop.f32.mrf.mxu2  ;;  %v261_v26 = vpop.f32.mrf.mxu1 }
  0xf7   :  { %v414_v22 = vadd.f32 %v392_v21, %v259_v19  ;;  %v190_v24 = vpop.f32.mrf.mxu0  ;;  %v3778_v21 = vsel %vm851_vm3, -1.0, %v3430_v7 }
  0xf8   :  { %v262_v27 = vadd.f32 %v261_v26, %v190_v24 }
  0xf9   :  { %v434_v23 = vadd.f32 %v3650_v49, %v414_v22 }
  0xfa   :  { %v469_v25 = vld [vmem:[#allocation3 + $0x68] sm:$0xff] }
  0xfb   :  { %453 = vst.msk [vmem:[#allocation3 + $0x70] sm:$0xff] %vm437_vm2, %v434_v23  ;;  %3081 = vmatmul.msk.f32.gmra.mxu3 %vm437_vm2, %v469_v25  ;;  %3098 = vmatmul.msk.f32.gmra.mxu0 %vm437_vm2, %v469_v25 }
  0xfc   :  { %3112 = vmatmul.msk.f32.gmra.mxu1 %vm437_vm2, %v469_v25 }
  0xfe   :  { %v395_v28 = vpop.f32.mrf.mxu2  ;;  %v264_v34 = vpop.f32.mrf.mxu1 }
  0xff   :  { %v415_v30 = vadd.f32 %v395_v28, %v262_v27  ;;  %v265_v35 = vadd.f32 %v264_v34, %v193_v31  ;;  %v608_v41 = vpop.f32.mrf.mxu0 }
 0x101   :  { %v435_v32 = vadd.f32 %v3650_v49, %v415_v30 }
 0x102   :  { %v470_v33 = vld [vmem:[#allocation3 + $0x70] sm:$0xff] }
 0x103   :  { %454 = vst.msk [vmem:[#allocation3 + $0x78] sm:$0xff] %vm437_vm2, %v435_v32  ;;  %3082 = vmatmul.msk.f32.gmra.mxu3 %vm437_vm2, %v470_v33  ;;  %3099 = vmatmul.msk.f32.gmra.mxu0 %vm437_vm2, %v470_v33 }
 0x104   :  { %3113 = vmatmul.msk.f32.gmra.mxu1 %vm437_vm2, %v470_v33 }
 0x106   :  { %v398_v36 = vpop.f32.mrf.mxu2 }
 0x107   :  { %v416_v37 = vadd.f32 %v398_v36, %v265_v35 }
 0x109   :  { %v436_v39 = vadd.f32 %v3650_v49, %v416_v37 }
 0x10a   :  { %v471_v40 = vld [vmem:[#allocation3 + $0x78] sm:$0xff] }
 0x10b   :  { %455 = vst.msk [vmem:[#allocation3 + $0x80] sm:$0xff] %vm437_vm2, %v436_v39  ;;  %3083 = vmatmul.msk.f32.gmra.mxu3 %vm437_vm2, %v471_v40  ;;  %3100 = vmatmul.msk.f32.gmra.mxu0 %vm437_vm2, %v471_v40 }
 0x10c   :  { %3114 = vmatmul.msk.f32.gmra.mxu1 %vm437_vm2, %v471_v40 }
 0x10e   :  { %v876_v51 = vpop.f32.mrf.mxu2 }
 0x112   :  { %v473_v42 = vld [vmem:[#allocation3 + $0x80] sm:$0xff] }
 0x113   :  { %3084 = vmatmul.msk.f32.gmra.mxu3 %vm437_vm2, %v473_v42 }
 0x114   :  { %3115 = vmatmul.msk.f32.gmra.mxu1 %vm437_vm2, %v473_v42 }
 0x118   :  { %v3738_v43 = vpop.f32.mrf.mxu0 }
 0x11c   :  { %3116 = vmatmul.msk.f32.gmra.mxu1 %vm437_vm2, %v671_v44 }
 0x11e   :  { %v540_v49 = vpop.f32.mrf.mxu3 }
 0x11f   :  { %v609_v45 = vadd.f32 %v608_v41, %v540_v49 }
 0x120   :  { %v3741_v46 = vpop.f32.mrf.mxu0 }
 0x121   :  { %v738_v48 = vpop.f32.mrf.mxu1 }
 0x122   :  { %v786_v50 = vadd.f32 %v738_v48, %v609_v45 }
 0x124   :  { %v804_v52 = vadd.f32 %v3746_v47, %v786_v50 }
 0x126   :  { %v879_v53 = vadd.f32 %v876_v51, %v804_v52  ;;  %v3749_v54 = vpop.f32.mrf.mxu3 }
 0x128   :  { %v3117_v55 = vmul.f32 -1.442695, %v879_v53  ;;  %v3751_v56 = vpop.f32.mrf.mxu0 }
 0x129   :  { %v3753_v57 = vpop.f32.mrf.mxu1 }
 0x12a   :  { %3192 = vpow2.f32 %v3117_v55 }
 0x12e   :  { %v3755_v58 = vpop.f32.mrf.mxu3 }
 0x130   :  { %v3193_v59 = vpop.eup %3192  ;;  %v3757_v60 = vpop.f32.mrf.mxu0 }
 0x131   :  { %v883_v61 = vadd.f32 1.0, %v3193_v59  ;;  %v3759_v62 = vpop.f32.mrf.mxu1 }
 0x133   :  { %3194 = vrcp.f32 %v883_v61  ;;  %v895_v9 = vand.u32 2147483648, %v883_v61  ;;  %v893_v12 = vand.u32 2147483647, %v883_v61  ;;  %vm889_vm5 = vweird.f32 %v883_v61 }
 0x135   :  { %v896_v18 = vor.u32 1.1754944e-38, %v895_v9  ;;  %vm894_vm7 = vcmp.eq.f32.partialorder %v893_v12, 8.507059e+37 }
 0x136   :  { %v3761_v0 = vpop.f32.mrf.mxu3 }
 0x138   :  { %v3763_v1 = vpop.f32.mrf.mxu0 }
 0x139   :  { %v3195_v2 = vpop.eup %3194  ;;  %v3765_v4 = vpop.f32.mrf.mxu1 }
 0x13a   :  { %v885_v5 = vmul.f32 %v3195_v2, %v883_v61  ;;  %vm890_vm4 = vweird.f32 %v3195_v2 }
 0x13b   :  { %vm891_vm6 = vmor %vm889_vm5, %vm890_vm4 }
 0x13c   :  { %v886_v8 = vsub.f32 1.0, %v885_v5 }
 0x13e   :  { %v887_v10 = vmul.f32 %v3195_v2, %v886_v8  ;;  %v3767_v11 = vpop.f32.mrf.mxu3 }
 0x140   :  { %v888_v13 = vadd.f32 %v3195_v2, %v887_v10  ;;  %v3769_v14 = vpop.f32.mrf.mxu0 }
 0x141   :  { %v3771_v15 = vpop.f32.mrf.mxu1 }
 0x142   :  { %v892_v19 = vsel %vm891_vm6, %v3195_v2, %v888_v13 }
 0x143   :  { %v897_v22 = vsel %vm894_vm7, %v896_v18, %v892_v19  ;;  %v3842_v19 = vld [vmem:[%s4604_s3 + $0x70] sm:$0xff] }
 0x144   :  { %v899_v23 = vmul.f32 %v897_v22, %v3774_v17  ;;  %v3847_v22 = vld [vmem:[%s4604_s3 + $0x68] sm:$0xff]  ;;  %960 = vmatpush.msra.mxu2 %v3842_v19  ;;  %2280 = vmatpush.msra.mxu0 %v3842_v19 }
 0x146   :  { %v3782_v24 = vadd.f32 %v899_v23, %v3778_v21  ;;  %v3784_v25 = vpop.f32.mrf.mxu3  ;;  %v3854_v23 = vld [vmem:[%s4604_s3 + $0x60] sm:$0xff]  ;;  %961 = vmatpush.msra.mxu2 %v3847_v22  ;;  %2281 = vmatpush.msra.mxu0 %v3847_v22 }
 0x148   :  { %903 = vrot.lane.b32.xlu0 %v3782_v24, %s3432_s25  ;;  %v3788_v26 = vpop.f32.mrf.mxu0  ;;  %v901_v12 = vmul.f32 0.0, %v3782_v24  ;;  %962 = vmatpush.msra.mxu2 %v3854_v23 }
 0x149   :  { %v3790_v27 = vpop.f32.mrf.mxu1  ;;  %2282 = vmatpush.msra.mxu0 %v3854_v23 }
 0x14e   :  { %v3792_v28 = vpop.f32.mrf.mxu3 }
 0x150   :  { %v3794_v7 = vpop.f32.mrf.mxu0 }
 0x151   :  { %v3796_v30 = vpop.f32.mrf.mxu1 }
 0x156   :  { %v3798_v31 = vpop.f32.mrf.mxu3 }
 0x158   :  { %v3802_v33 = vpop.f32.mrf.mxu0 }
 0x159   :  { %v3800_v32 = vpop.f32.mrf.mxu1 }
 0x15e   :  { %v3804_v34 = vpop.f32.mrf.mxu3 }
 0x160   :  { %v3808_v36 = vpop.f32.mrf.mxu0 }
 0x161   :  { %v3806_v35 = vpop.f32.mrf.mxu1 }
 0x166   :  { %v3810_v37 = vpop.f32.mrf.mxu3 }
 0x168   :  { %v3816_v41 = vpop.f32.mrf.mxu0 }
 0x169   :  { %v3812_v39 = vpop.f32.mrf.mxu1 }
 0x16e   :  { %v3814_v40 = vpop.f32.mrf.mxu3 }
 0x170   :  { %v644_v49 = vpop.f32.mrf.mxu0 }
 0x171   :  { %v3818_v42 = vpop.f32.mrf.mxu1 }
 0x176   :  { %v3820_v44 = vpop.f32.mrf.mxu3 }
 0x178   :  { %v647_v52 = vpop.f32.mrf.mxu0 }
 0x179   :  { %v3822_v45 = vpop.f32.mrf.mxu1 }
 0x17a   :  { %4608 = vst [vmem:[#allocation8_spill] sm:$0xff] %v3822_v45 }
 0x17e   :  { %v576_v48 = vpop.f32.mrf.mxu3 }
 0x17f   :  { %v3824_v50 = vadd.f32 %v644_v49, %v576_v48  ;;  %v3861_v49 = vld [vmem:[%s4604_s3 + $0x58] sm:$0xff]  ;;  %v3868_v48 = vld [vmem:[%s4604_s3 + $0x50] sm:$0xff] }
 0x180   :  { %v650_v63 = vpop.f32.mrf.mxu0  ;;  %963 = vmatpush.msra.mxu2 %v3861_v49  ;;  %2283 = vmatpush.msra.mxu0 %v3861_v49 }
 0x181   :  { %4609 = vst [vmem:[#allocation9_spill] sm:$0xff] %v3824_v50  ;;  %v3826_v51 = vpop.f32.mrf.mxu1 }
 0x182   :  { %4610 = vst [vmem:[#allocation10_spill] sm:$0xff] %v3826_v51  ;;  %964 = vmatpush.msra.mxu2 %v3868_v48  ;;  %2284 = vmatpush.msra.mxu0 %v3868_v48 }
 0x186   :  { %v579_v53 = vpop.f32.mrf.mxu3 }
 0x187   :  { %v648_v55 = vadd.f32 %v647_v52, %v579_v53  ;;  %v3875_v52 = vld [vmem:[%s4604_s3 + $0x48] sm:$0xff]  ;;  %v3882_v53 = vld [vmem:[%s4604_s3 + $0x40] sm:$0xff] }
 0x188   :  { %965 = vmatpush.msra.mxu2 %v3875_v52  ;;  %2285 = vmatpush.msra.mxu0 %v3875_v52 }
 0x189   :  { %v777_v59 = vpop.f32.mrf.mxu1 }
 0x18a   :  { %v3828_v61 = vadd.f32 %v777_v59, %v648_v55  ;;  %966 = vmatpush.msra.mxu2 %v3882_v53  ;;  %2286 = vmatpush.msra.mxu0 %v3882_v53 }
 0x18c   :  { %4611 = vst [vmem:[#allocation11_spill] sm:$0xff] %v3828_v61 }
 0x18e   :  { %v582_v2 = vpop.f32.mrf.mxu3 }
 0x18f   :  { %v651_v3 = vadd.f32 %v650_v63, %v582_v2  ;;  %v3893_v63 = vld [vmem:[%s4604_s3 + $0x38] sm:$0xff] }
 0x190   :  { %967 = vmatpush.msra.mxu2 %v3893_v63  ;;  %2287 = vmatpush.msra.mxu0 %v3893_v63 }
 0x191   :  { %v780_v5 = vpop.f32.mrf.mxu1 }
 0x192   :  { %v3830_v8 = vadd.f32 %v780_v5, %v651_v3  ;;  %1198 = vmatpush.msrb.mxu2 %v3497_v6  ;;  %2544 = vmatpush.msrb.mxu0 %v3842_v19  ;;  %v3936_v5 = vld [vmem:[%s4604_s3 + $0x79] ss:$0 sm:$0xff] }
 0x194   :  { %4612 = vst [vmem:[#allocation12_spill] sm:$0xff] %v3830_v8  ;;  %1199 = vmatpush.msrb.mxu2 %v3543_v20  ;;  %2545 = vmatpush.msrb.mxu0 %v3847_v22 }
 0x196   :  { %1200 = vmatpush.msrb.mxu2 %v3578_v29  ;;  %2546 = vmatpush.msrb.mxu0 %v3854_v23  ;;  %v3930_v2 = vpop.f32.mrf.mxu3 }
 0x197   :  { %4613 = vst [vmem:[#allocation13_spill] sm:$0xff] %v3930_v2 }
 0x198   :  { %1201 = vmatpush.msrb.mxu2 %v3613_v38  ;;  %2547 = vmatpush.msrb.mxu0 %v3861_v49 }
 0x19a   :  { %2548 = vmatpush.msrb.mxu0 %v3868_v48 }
 0x19c   :  { %2549 = vmatpush.msrb.mxu0 %v3875_v52 }
 0x19e   :  { %2550 = vmatpush.msrb.mxu0 %v3882_v53 }
 0x1a0   :  { %2551 = vmatpush.msrb.mxu0 %v3893_v63 }
 0x1ba   :  { %v904_v9 = vpop.permute.xlu0 %903 }
 0x1bb   :  { %v906_v10 = vmul.f32 %v904_v9, %v3782_v24 }
 0x1bd   :  { %908 = vrot.lane.b32.xlu0 %v906_v10, %s3432_s25 }
 0x22f   :  { %v909_v13 = vpop.permute.xlu0 %908 }
 0x230   :  { %v3835_v16 = vadd.f32 %v909_v13, %v901_v12 }
 0x232   :  { %3196 = vtanh.f32 %v3835_v16 }
 0x238   :  { %v3197_v18 = vpop.eup %3196 }
 0x239   :  { %914 = vrot.lane.b32.xlu1 %v3197_v18, %s3432_s25 }
 0x2ab   :  { %v915_v55 = vpop.permute.xlu1 %914 }
 0x2ac   :  { %v917_v59 = vmul.f32 %v915_v55, %v3782_v24  ;;  %v612_v24 = vadd.f32 %v3738_v43, %v3749_v54 }
 0x2ae   :  { %920 = vrot.lane.b32.xlu1 %v917_v59, %s3433_s15  ;;  %v787_v3 = vadd.f32 %v3753_v57, %v612_v24 }
 0x2b0   :  { %v805_v9 = vadd.f32 %v3746_v47, %v787_v3 }
 0x320   :  { %v921_v6 = vpop.permute.xlu1 %920 }
 0x321   :  { %v946_v20 = vsel %vm855_vm8, %v921_v6, 0.0  ;;  %3118 = vmatmul.msk.f32.vlgmr.msra.gmra.mxu3 %vm855_vm8, %v921_v6 }
 0x322   :  { %3119 = vmatmul.msk.f32.vlgmr.msra.gmra.mxu2 %vm948_vm9, %v946_v20  ;;  %1092 = vmatpush.msra.mxu3 %v3842_v19 }
 0x323   :  { %1224 = vmatpush.msra.mxu2 %v3842_v19 }
 0x324   :  { %1093 = vmatpush.msra.mxu3 %v3847_v22 }
 0x325   :  { %1225 = vmatpush.msra.mxu2 %v3847_v22 }
 0x326   :  { %1094 = vmatpush.msra.mxu3 %v3854_v23 }
 0x327   :  { %1226 = vmatpush.msra.mxu2 %v3854_v23 }
 0x328   :  { %1095 = vmatpush.msra.mxu3 %v3861_v49 }
 0x329   :  { %1227 = vmatpush.msra.mxu2 %v3861_v49 }
 0x32a   :  { %1096 = vmatpush.msra.mxu3 %v3868_v48 }
 0x32b   :  { %1228 = vmatpush.msra.mxu2 %v3868_v48 }
 0x32c   :  { %1097 = vmatpush.msra.mxu3 %v3875_v52 }
 0x32d   :  { %1229 = vmatpush.msra.mxu2 %v3875_v52 }
 0x32e   :  { %1098 = vmatpush.msra.mxu3 %v3882_v53 }
 0x32f   :  { %1230 = vmatpush.msra.mxu2 %v3882_v53 }
 0x330   :  { %1099 = vmatpush.msra.mxu3 %v3893_v63 }
 0x331   :  { %1231 = vmatpush.msra.mxu2 %v3893_v63 }
 0x3a4   :  { %v941_v10 = vpop.f32.mrf.mxu3 }
 0x3a5   :  { %v944_v12 = vadd.f32 %v941_v10, %v805_v9  ;;  %v969_v13 = vpop.f32.mrf.mxu2 }
 0x3a6   :  { %v970_v18 = vadd.f32 %v3936_v5, %v969_v13 }
 0x3a7   :  { %v3120_v55 = vmul.f32 -1.442695, %v944_v12 }
 0x3a8   :  { %v3121_v59 = vmul.f32 -1.442695, %v970_v18 }
 0x3a9   :  { %3198 = vpow2.f32 %v3120_v55 }
 0x3aa   :  { %3200 = vpow2.f32 %v3121_v59 }
 0x3af   :  { %v3199_v43 = vpop.eup %3198 }
 0x3b0   :  { %v3201_v54 = vpop.eup %3200  ;;  %v975_v6 = vadd.f32 1.0, %v3199_v43 }
 0x3b1   :  { %v1013_v57 = vadd.f32 1.0, %v3201_v54 }
 0x3b2   :  { %3202 = vrcp.f32 %v975_v6  ;;  %v987_v9 = vand.u32 2147483648, %v975_v6  ;;  %v985_v13 = vand.u32 2147483647, %v975_v6  ;;  %vm981_vm11 = vweird.f32 %v975_v6 }
 0x3b3   :  { %3204 = vrcp.f32 %v1013_v57  ;;  %v1025_v43 = vand.u32 2147483648, %v1013_v57  ;;  %vm1019_vm14 = vweird.f32 %v1013_v57  ;;  %v1023_v51 = vand.u32 2147483647, %v1013_v57 }
 0x3b4   :  { %v988_v55 = vor.u32 1.1754944e-38, %v987_v9  ;;  %vm986_vm15 = vcmp.eq.f32.partialorder %v985_v13, 8.507059e+37 }
 0x3b5   :  { %vm1024_vm1 = vcmp.eq.f32.partialorder %v1023_v51, 8.507059e+37 }
 0x3b8   :  { %v3203_v20 = vpop.eup %3202 }
 0x3b9   :  { %v3205_v24 = vpop.eup %3204  ;;  %v977_v2 = vmul.f32 %v3203_v20, %v975_v6  ;;  %vm982_vm10 = vweird.f32 %v3203_v20 }
 0x3ba   :  { %v1015_v8 = vmul.f32 %v3205_v24, %v1013_v57  ;;  %vm1020_vm12 = vweird.f32 %v3205_v24  ;;  %vm983_vm13 = vmor %vm981_vm11, %vm982_vm10 }
 0x3bb   :  { %v978_v3 = vsub.f32 1.0, %v977_v2  ;;  %vm1021_vm0 = vmor %vm1019_vm14, %vm1020_vm12 }
 0x3bc   :  { %v1016_v61 = vsub.f32 1.0, %v1015_v8 }
 0x3bd   :  { %v979_v10 = vmul.f32 %v3203_v20, %v978_v3  ;;  %v1026_v3 = vor.u32 1.1754944e-38, %v1025_v43 }
 0x3be   :  { %v1017_v12 = vmul.f32 %v3205_v24, %v1016_v61 }
 0x3bf   :  { %v980_v18 = vadd.f32 %v3203_v20, %v979_v10 }
 0x3c0   :  { %v1018_v59 = vadd.f32 %v3205_v24, %v1017_v12 }
 0x3c1   :  { %v984_v54 = vsel %vm983_vm13, %v3203_v20, %v980_v18 }
 0x3c2   :  { %v989_v50 = vsel %vm986_vm15, %v988_v55, %v984_v54  ;;  %v1022_v2 = vsel %vm1021_vm0, %v3205_v24, %v1018_v59 }
 0x3c3   :  { %v991_v8 = vmul.f32 %v989_v50, %v3774_v17  ;;  %v1027_v61 = vsel %vm1024_vm1, %v1026_v3, %v1022_v2 }
 0x3c4   :  { %v1029_v6 = vmul.f32 %v1027_v61, %v3774_v17  ;;  %v3963_v61 = vld [vmem:[%s4604_s3 + $0x30] sm:$0xff] }
 0x3c5   :  { %v992_v45 = vadd.f32 %v991_v8, %v3778_v21 }
 0x3c6   :  { %v1030_v9 = vadd.f32 %v1029_v6, %v3778_v21 }
 0x3c7   :  { %995 = vrot.lane.b32.xlu2 %v992_v45, %s3432_s25  ;;  %v993_v24 = vmul.f32 %v992_v45, %v3835_v16 }
 0x3c8   :  { %v1031_v12 = vmul.f32 0.0, %v1030_v9 }
 0x3cf   :  { %1033 = vrot.lane.b32.xlu2 %v1030_v9, %s3432_s25 }
 0x421   :  { %v996_v20 = vpop.permute.xlu2 %995 }
 0x422   :  { %v998_v57 = vmul.f32 %v996_v20, %v992_v45 }
 0x424   :  { %1000 = vrot.lane.b32.xlu0 %v998_v57, %s3432_s25 }
 0x429   :  { %v1034_v10 = vpop.permute.xlu2 %1033 }
 0x42a   :  { %v1036_v50 = vmul.f32 %v1034_v10, %v1030_v9 }
 0x42c   :  { %1038 = vrot.lane.b32.xlu1 %v1036_v50, %s3432_s25 }
 0x496   :  { %v1001_v51 = vpop.permute.xlu0 %1000 }
 0x497   :  { %v3949_v13 = vadd.f32 %v1001_v51, %v993_v24 }
 0x499   :  { %3206 = vtanh.f32 %v3949_v13 }
 0x49e   :  { %v1039_v18 = vpop.permute.xlu1 %1038 }
 0x49f   :  { %v3207_v55 = vpop.eup %3206  ;;  %v3952_v59 = vadd.f32 %v1039_v18, %v1031_v12 }
 0x4a0   :  { %1006 = vrot.lane.b32.xlu2 %v3207_v55, %s3432_s25 }
 0x4a1   :  { %3208 = vtanh.f32 %v3952_v59 }
 0x4a7   :  { %v3209_v43 = vpop.eup %3208 }
 0x4a8   :  { %1044 = vrot.lane.b32.xlu0 %v3209_v43, %s3432_s25 }
 0x4fa   :  { %v1007_v54 = vpop.permute.xlu2 %1006 }
 0x4fb   :  { %v1009_v8 = vmul.f32 %v1007_v54, %v992_v45  ;;  %v3969_v45 = vld [vmem:[%s4604_s3 + $0x28] sm:$0xff] }
 0x4fd   :  { %1050 = vrot.lane.b32.xlu1 %v1009_v8, %s3433_s15 }
 0x51a   :  { %v1045_v16 = vpop.permute.xlu0 %1044 }
 0x51b   :  { %v1047_v2 = vmul.f32 %v1045_v16, %v1030_v9 }
 0x51d   :  { %1077 = vrot.lane.b32.xlu2 %v1047_v2, %s3434_s20 }
 0x56f   :  { %v1051_v3 = vpop.permute.xlu1 %1050 }
 0x570   :  { %3122 = vmatmul.msk.f32.vlgmr.msrb.gmra.mxu3 %vm855_vm8, %v1051_v3 }
 0x571   :  { %1330 = vmatpush.msrb.mxu3 %v3963_v61 }
 0x573   :  { %1331 = vmatpush.msrb.mxu3 %v3969_v45 }
 0x575   :  { %1332 = vmatpush.msrb.mxu3 %v3578_v29  ;;  %v615_v29 = vadd.f32 %v3741_v46, %v3755_v58 }
 0x577   :  { %v1078_v6 = vpop.permute.xlu2 %1077  ;;  %1333 = vmatpush.msrb.mxu3 %v3613_v38  ;;  %v788_v38 = vadd.f32 %v3759_v62, %v615_v29 }
 0x578   :  { %v1080_v9 = vsel %vm855_vm8, %v1051_v3, %v1078_v6 }
 0x579   :  { %3123 = vmatmul.msk.f32.vlgmr.msra.gmra.mxu3 %vm948_vm9, %v1080_v9  ;;  %v806_v20 = vadd.f32 %v3746_v47, %v788_v38 }
 0x57a   :  { %1356 = vmatpush.msra.mxu3 %v3842_v19 }
 0x57c   :  { %1357 = vmatpush.msra.mxu3 %v3847_v22 }
 0x57e   :  { %1358 = vmatpush.msra.mxu3 %v3854_v23 }
 0x580   :  { %1359 = vmatpush.msra.mxu3 %v3861_v49 }
 0x582   :  { %1360 = vmatpush.msra.mxu3 %v3868_v48 }
 0x584   :  { %1361 = vmatpush.msra.mxu3 %v3875_v52 }
 0x586   :  { %1362 = vmatpush.msra.mxu3 %v3882_v53 }
 0x588   :  { %1363 = vmatpush.msra.mxu3 %v3893_v63 }
 0x5f3   :  { %v1071_v57 = vpop.f32.mrf.mxu3 }
 0x5f4   :  { %v1074_v10 = vadd.f32 %v1071_v57, %v806_v20 }
 0x5f6   :  { %v3124_v50 = vmul.f32 -1.442695, %v1074_v10 }
 0x5f8   :  { %3210 = vpow2.f32 %v3124_v50 }
 0x5fc   :  { %v1101_v24 = vpop.f32.mrf.mxu3 }
 0x5fd   :  { %v1102_v51 = vadd.f32 %v3936_v5, %v1101_v24 }
 0x5fe   :  { %v3211_v12 = vpop.eup %3210 }
 0x5ff   :  { %v1107_v18 = vadd.f32 1.0, %v3211_v12  ;;  %v3125_v55 = vmul.f32 -1.442695, %v1102_v51 }
 0x601   :  { %3212 = vrcp.f32 %v1107_v18  ;;  %v1119_v62 = vand.u32 2147483648, %v1107_v18  ;;  %v1117_v2 = vand.u32 2147483647, %v1107_v18  ;;  %vm1113_vm4 = vweird.f32 %v1107_v18 }
 0x602   :  { %3214 = vpow2.f32 %v3125_v55 }
 0x603   :  { %v1120_v6 = vor.u32 1.1754944e-38, %v1119_v62  ;;  %vm1118_vm6 = vcmp.eq.f32.partialorder %v1117_v2, 8.507059e+37 }
 0x607   :  { %v3213_v43 = vpop.eup %3212 }
 0x608   :  { %v3215_v54 = vpop.eup %3214  ;;  %v1109_v8 = vmul.f32 %v3213_v43, %v1107_v18  ;;  %vm1114_vm3 = vweird.f32 %v3213_v43 }
 0x609   :  { %v1145_v46 = vadd.f32 1.0, %v3215_v54  ;;  %vm1115_vm5 = vmor %vm1113_vm4, %vm1114_vm3 }
 0x60a   :  { %v1110_v58 = vsub.f32 1.0, %v1109_v8 }
 0x60b   :  { %3216 = vrcp.f32 %v1145_v46  ;;  %v1157_v24 = vand.u32 2147483648, %v1145_v46  ;;  %v1155_v12 = vand.u32 2147483647, %v1145_v46  ;;  %vm1151_vm10 = vweird.f32 %v1145_v46 }
 0x60c   :  { %v1111_v16 = vmul.f32 %v3213_v43, %v1110_v58 }
 0x60d   :  { %v1158_v55 = vor.u32 1.1754944e-38, %v1157_v24  ;;  %vm1156_vm12 = vcmp.eq.f32.partialorder %v1155_v12, 8.507059e+37 }
 0x60e   :  { %v1112_v3 = vadd.f32 %v3213_v43, %v1111_v16 }
 0x610   :  { %v1116_v9 = vsel %vm1115_vm5, %v3213_v43, %v1112_v3 }
 0x611   :  { %v3217_v29 = vpop.eup %3216  ;;  %v1121_v38 = vsel %vm1118_vm6, %v1120_v6, %v1116_v9 }
 0x612   :  { %v1147_v20 = vmul.f32 %v3217_v29, %v1145_v46  ;;  %v1123_v57 = vmul.f32 %v1121_v38, %v3774_v17  ;;  %vm1152_vm7 = vweird.f32 %v3217_v29 }
 0x613   :  { %vm1153_vm11 = vmor %vm1151_vm10, %vm1152_vm7 }
 0x614   :  { %v1148_v10 = vsub.f32 1.0, %v1147_v20  ;;  %v1124_v50 = vadd.f32 %v1123_v57, %v3778_v21 }
 0x616   :  { %v1149_v51 = vmul.f32 %v3217_v29, %v1148_v10  ;;  %1127 = vrot.lane.b32.xlu0 %v1124_v50, %s3432_s25  ;;  %v1125_v46 = vmul.f32 %v1124_v50, %v3949_v13 }
 0x618   :  { %v1150_v18 = vadd.f32 %v3217_v29, %v1149_v51 }
 0x61a   :  { %v1154_v43 = vsel %vm1153_vm11, %v3217_v29, %v1150_v18 }
 0x61b   :  { %v1159_v54 = vsel %vm1156_vm12, %v1158_v55, %v1154_v43 }
 0x61c   :  { %v1161_v8 = vmul.f32 %v1159_v54, %v3774_v17  ;;  %v618_v54 = vadd.f32 %v3751_v56, %v3761_v0 }
 0x61e   :  { %v1162_v58 = vadd.f32 %v1161_v8, %v3778_v21  ;;  %v789_v8 = vadd.f32 %v3765_v4, %v618_v54 }
 0x620   :  { %1165 = vrot.lane.b32.xlu1 %v1162_v58, %s3432_s25  ;;  %v1163_v38 = vmul.f32 %v1162_v58, %v3952_v59  ;;  %v4015_v59 = vld [vmem:[%s4604_s3 + $0x20] sm:$0xff] }
 0x688   :  { %v1128_v62 = vpop.permute.xlu0 %1127 }
 0x689   :  { %v1130_v16 = vmul.f32 %v1128_v62, %v1124_v50 }
 0x68b   :  { %1132 = vrot.lane.b32.xlu2 %v1130_v16, %s3432_s25 }
 0x692   :  { %v1166_v2 = vpop.permute.xlu1 %1165 }
 0x693   :  { %v1168_v3 = vmul.f32 %v1166_v2, %v1162_v58 }
 0x695   :  { %1170 = vrot.lane.b32.xlu0 %v1168_v3, %s3432_s25 }
 0x6e5   :  { %v1133_v6 = vpop.permute.xlu2 %1132 }
 0x6e6   :  { %v3998_v9 = vadd.f32 %v1133_v6, %v1125_v46 }
 0x6e8   :  { %3218 = vtanh.f32 %v3998_v9 }
 0x6ee   :  { %v3219_v29 = vpop.eup %3218 }
 0x6ef   :  { %1138 = vrot.lane.b32.xlu1 %v3219_v29, %s3432_s25 }
 0x707   :  { %v1171_v20 = vpop.permute.xlu0 %1170 }
 0x708   :  { %v4003_v57 = vadd.f32 %v1171_v20, %v1163_v38 }
 0x70a   :  { %3220 = vtanh.f32 %v4003_v57 }
 0x710   :  { %v3221_v10 = vpop.eup %3220 }
 0x711   :  { %1176 = vrot.lane.b32.xlu2 %v3221_v10, %s3432_s25 }
 0x761   :  { %v1139_v24 = vpop.permute.xlu1 %1138 }
 0x762   :  { %v1141_v13 = vmul.f32 %v1139_v24, %v1124_v50  ;;  %v4021_v50 = vld [vmem:[%s4604_s3 + $0x18] sm:$0xff] }
 0x764   :  { %1182 = vrot.lane.b32.xlu0 %v1141_v13, %s3433_s15 }
 0x76b   :  { %v1177_v51 = vpop.permute.xlu2 %1176 }
 0x76c   :  { %v1179_v12 = vmul.f32 %v1177_v51, %v1162_v58  ;;  %v807_v58 = vadd.f32 %v3746_v47, %v789_v8 }
 0x76e   :  { %1209 = vrot.lane.b32.xlu1 %v1179_v12, %s3434_s20 }
 0x7d6   :  { %v1183_v18 = vpop.permute.xlu0 %1182 }
 0x7d7   :  { %3126 = vmatmul.msk.f32.vlgmr.msrb.gmra.mxu2 %vm855_vm8, %v1183_v18 }
 0x7d8   :  { %1462 = vmatpush.msrb.mxu2 %v3963_v61 }
 0x7da   :  { %1463 = vmatpush.msrb.mxu2 %v3969_v45 }
 0x7dc   :  { %1464 = vmatpush.msrb.mxu2 %v4015_v59 }
 0x7de   :  { %1465 = vmatpush.msrb.mxu2 %v4021_v50 }
 0x7e0   :  { %v1210_v55 = vpop.permute.xlu1 %1209 }
 0x7e1   :  { %v1212_v43 = vsel %vm855_vm8, %v1183_v18, %v1210_v55 }
 0x7e2   :  { %3127 = vmatmul.msk.f32.vlgmr.msra.gmra.mxu2 %vm948_vm9, %v1212_v43 }
 0x7e3   :  { %1488 = vmatpush.msra.mxu2 %v3842_v19 }
 0x7e5   :  { %1489 = vmatpush.msra.mxu2 %v3847_v22 }
 0x7e7   :  { %1490 = vmatpush.msra.mxu2 %v3854_v23 }
 0x7e9   :  { %1491 = vmatpush.msra.mxu2 %v3861_v49 }
 0x7eb   :  { %1492 = vmatpush.msra.mxu2 %v3868_v48 }
 0x7ed   :  { %1493 = vmatpush.msra.mxu2 %v3875_v52 }
 0x7ef   :  { %1494 = vmatpush.msra.mxu2 %v3882_v53 }
 0x7f1   :  { %1495 = vmatpush.msra.mxu2 %v3893_v63 }
 0x85a   :  { %v1203_v62 = vpop.f32.mrf.mxu2 }
 0x85b   :  { %v1206_v16 = vadd.f32 %v1203_v62, %v807_v58 }
 0x85d   :  { %v3128_v2 = vmul.f32 -1.442695, %v1206_v16 }
 0x85f   :  { %3222 = vpow2.f32 %v3128_v2 }
 0x865   :  { %v3223_v3 = vpop.eup %3222  ;;  %v1233_v46 = vpop.f32.mrf.mxu2 }
 0x866   :  { %v1239_v6 = vadd.f32 1.0, %v3223_v3  ;;  %v1234_v29 = vadd.f32 %v3936_v5, %v1233_v46 }
 0x868   :  { %3224 = vrcp.f32 %v1239_v6  ;;  %v3129_v38 = vmul.f32 -1.442695, %v1234_v29  ;;  %v1251_v4 = vand.u32 2147483648, %v1239_v6  ;;  %v1249_v51 = vand.u32 2147483647, %v1239_v6 }
 0x869   :  { %vm1245_vm14 = vweird.f32 %v1239_v6 }
 0x86a   :  { %3226 = vpow2.f32 %v3129_v38  ;;  %v1252_v18 = vor.u32 1.1754944e-38, %v1251_v4  ;;  %vm1250_vm0 = vcmp.eq.f32.partialorder %v1249_v51, 8.507059e+37 }
 0x86e   :  { %v3225_v20 = vpop.eup %3224 }
 0x86f   :  { %v1241_v10 = vmul.f32 %v3225_v20, %v1239_v6  ;;  %vm1246_vm13 = vweird.f32 %v3225_v20 }
 0x870   :  { %v3227_v24 = vpop.eup %3226  ;;  %vm1247_vm15 = vmor %vm1245_vm14, %vm1246_vm13 }
 0x871   :  { %v1242_v56 = vsub.f32 1.0, %v1241_v10  ;;  %v1277_v0 = vadd.f32 1.0, %v3227_v24 }
 0x873   :  { %v1243_v13 = vmul.f32 %v3225_v20, %v1242_v56  ;;  %3228 = vrcp.f32 %v1277_v0  ;;  %v1289_v2 = vand.u32 2147483648, %v1277_v0  ;;  %v1287_v46 = vand.u32 2147483647, %v1277_v0 }
 0x874   :  { %vm1283_vm3 = vweird.f32 %v1277_v0 }
 0x875   :  { %v1244_v12 = vadd.f32 %v3225_v20, %v1243_v13  ;;  %v1290_v29 = vor.u32 1.1754944e-38, %v1289_v2  ;;  %vm1288_vm5 = vcmp.eq.f32.partialorder %v1287_v46, 8.507059e+37 }
 0x877   :  { %v1248_v55 = vsel %vm1247_vm15, %v3225_v20, %v1244_v12 }
 0x878   :  { %v1253_v43 = vsel %vm1250_vm0, %v1252_v18, %v1248_v55 }
 0x879   :  { %v3229_v54 = vpop.eup %3228  ;;  %v1255_v8 = vmul.f32 %v1253_v43, %v3774_v17 }
 0x87a   :  { %v1279_v58 = vmul.f32 %v3229_v54, %v1277_v0  ;;  %vm1284_vm1 = vweird.f32 %v3229_v54 }
 0x87b   :  { %v1256_v62 = vadd.f32 %v1255_v8, %v3778_v21  ;;  %vm1285_vm4 = vmor %vm1283_vm3, %vm1284_vm1 }
 0x87c   :  { %v1280_v16 = vsub.f32 1.0, %v1279_v58 }
 0x87d   :  { %1259 = vrot.lane.b32.xlu2 %v1256_v62, %s3432_s25  ;;  %v1257_v0 = vmul.f32 %v1256_v62, %v3998_v9 }
 0x87e   :  { %v1281_v3 = vmul.f32 %v3229_v54, %v1280_v16 }
 0x880   :  { %v1282_v6 = vadd.f32 %v3229_v54, %v1281_v3 }
 0x882   :  { %v1286_v38 = vsel %vm1285_vm4, %v3229_v54, %v1282_v6  ;;  %v621_v6 = vadd.f32 %v3757_v60, %v3767_v11 }
 0x883   :  { %v1291_v20 = vsel %vm1288_vm5, %v1290_v29, %v1286_v38 }
 0x884   :  { %v1293_v10 = vmul.f32 %v1291_v20, %v3774_v17  ;;  %v790_v29 = vadd.f32 %v3771_v15, %v621_v6 }
 0x886   :  { %v1294_v24 = vadd.f32 %v1293_v10, %v3778_v21  ;;  %v808_v38 = vadd.f32 %v3746_v47, %v790_v29 }
 0x888   :  { %1297 = vrot.lane.b32.xlu0 %v1294_v24, %s3432_s25  ;;  %v1295_v43 = vmul.f32 %v1294_v24, %v4003_v57 }
 0x8d7   :  { %v1260_v56 = vpop.permute.xlu2 %1259 }
 0x8d8   :  { %v1262_v4 = vmul.f32 %v1260_v56, %v1256_v62 }
 0x8da   :  { %1264 = vrot.lane.b32.xlu1 %v1262_v4, %s3432_s25 }
 0x8fa   :  { %v1298_v13 = vpop.permute.xlu0 %1297 }
 0x8fb   :  { %v1300_v51 = vmul.f32 %v1298_v13, %v1294_v24 }
 0x8fd   :  { %1302 = vrot.lane.b32.xlu2 %v1300_v51, %s3432_s25 }
 0x94c   :  { %v1265_v12 = vpop.permute.xlu1 %1264 }
 0x94d   :  { %v4048_v18 = vadd.f32 %v1265_v12, %v1257_v0 }
 0x94f   :  { %3230 = vtanh.f32 %v4048_v18 }
 0x955   :  { %v3231_v55 = vpop.eup %3230 }
 0x956   :  { %1270 = vrot.lane.b32.xlu0 %v3231_v55, %s3432_s25 }
 0x957   :  { %v1303_v54 = vpop.permute.xlu2 %1302 }
 0x958   :  { %v4053_v8 = vadd.f32 %v1303_v54, %v1295_v43 }
 0x95a   :  { %3232 = vtanh.f32 %v4053_v8 }
 0x960   :  { %v3233_v58 = vpop.eup %3232 }
 0x961   :  { %1308 = vrot.lane.b32.xlu1 %v3233_v58, %s3432_s25 }
 0x9c8   :  { %v1271_v16 = vpop.permute.xlu0 %1270 }
 0x9c9   :  { %v1273_v9 = vmul.f32 %v1271_v16, %v1256_v62 }
 0x9cb   :  { %1314 = vrot.lane.b32.xlu2 %v1273_v9, %s3433_s15 }
 0x9d3   :  { %v1309_v2 = vpop.permute.xlu1 %1308 }
 0x9d4   :  { %v1311_v3 = vmul.f32 %v1309_v2, %v1294_v24 }
 0x9d6   :  { %1341 = vrot.lane.b32.xlu0 %v1311_v3, %s3434_s20 }
 0xa25   :  { %v1315_v46 = vpop.permute.xlu2 %1314 }
 0xa26   :  { %3130 = vmatmul.msk.f32.vlgmr.msrb.gmra.mxu3 %vm855_vm8, %v1315_v46 }
 0xa27   :  { %1594 = vmatpush.msrb.mxu3 %v3963_v61 }
 0xa29   :  { %1595 = vmatpush.msrb.mxu3 %v3969_v45 }
 0xa2b   :  { %1596 = vmatpush.msrb.mxu3 %v4015_v59 }
 0xa2d   :  { %1597 = vmatpush.msrb.mxu3 %v4021_v50 }
 0xa48   :  { %v1342_v57 = vpop.permute.xlu0 %1341 }
 0xa49   :  { %v1344_v62 = vsel %vm855_vm8, %v1315_v46, %v1342_v57 }
 0xa4a   :  { %3131 = vmatmul.msk.f32.vlgmr.msra.gmra.mxu3 %vm948_vm9, %v1344_v62 }
 0xa4b   :  { %1620 = vmatpush.msra.mxu3 %v3842_v19 }
 0xa4d   :  { %1621 = vmatpush.msra.mxu3 %v3847_v22 }
 0xa4f   :  { %1622 = vmatpush.msra.mxu3 %v3854_v23 }
 0xa51   :  { %1623 = vmatpush.msra.mxu3 %v3861_v49 }
 0xa53   :  { %1624 = vmatpush.msra.mxu3 %v3868_v48 }
 0xa55   :  { %1625 = vmatpush.msra.mxu3 %v3875_v52 }
 0xa57   :  { %1626 = vmatpush.msra.mxu3 %v3882_v53 }
 0xa59   :  { %1627 = vmatpush.msra.mxu3 %v3893_v63 }
 0xaa9   :  { %v1335_v20 = vpop.f32.mrf.mxu3 }
 0xaaa   :  { %v1338_v10 = vadd.f32 %v1335_v20, %v808_v38 }
 0xaac   :  { %v3132_v24 = vmul.f32 -1.442695, %v1338_v10 }
 0xaae   :  { %3234 = vpow2.f32 %v3132_v24 }
 0xab4   :  { %v3235_v56 = vpop.eup %3234 }
 0xab5   :  { %v1371_v4 = vadd.f32 1.0, %v3235_v56 }
 0xab7   :  { %3236 = vrcp.f32 %v1371_v4  ;;  %v1383_v12 = vand.u32 2147483648, %v1371_v4  ;;  %v1381_v43 = vand.u32 2147483647, %v1371_v4  ;;  %vm1377_vm7 = vweird.f32 %v1371_v4 }
 0xab9   :  { %v1384_v11 = vor.u32 1.1754944e-38, %v1383_v12  ;;  %vm1382_vm11 = vcmp.eq.f32.partialorder %v1381_v43, 8.507059e+37 }
 0xabd   :  { %v3237_v13 = vpop.eup %3236 }
 0xabe   :  { %v1373_v51 = vmul.f32 %v3237_v13, %v1371_v4  ;;  %vm1378_vm6 = vweird.f32 %v3237_v13 }
 0xabf   :  { %vm1379_vm10 = vmor %vm1377_vm7, %vm1378_vm6 }
 0xac0   :  { %v1374_v0 = vsub.f32 1.0, %v1373_v51 }
 0xac2   :  { %v1375_v55 = vmul.f32 %v3237_v13, %v1374_v0 }
 0xac4   :  { %v1376_v60 = vadd.f32 %v3237_v13, %v1375_v55 }
 0xac6   :  { %v1380_v15 = vsel %vm1379_vm10, %v3237_v13, %v1376_v60 }
 0xac7   :  { %v1385_v47 = vsel %vm1382_vm11, %v1384_v11, %v1380_v15 }
 0xac8   :  { %v1387_v54 = vmul.f32 %v1385_v47, %v3774_v17 }
 0xaca   :  { %v1388_v58 = vadd.f32 %v1387_v54, %v3778_v21 }
 0xacc   :  { %1391 = vrot.lane.b32.xlu1 %v1388_v58, %s3432_s25  ;;  %v1389_v60 = vmul.f32 %v1388_v58, %v4048_v18 }
 0xacd   :  { %v1365_v16 = vpop.f32.mrf.mxu3 }
 0xace   :  { %v1366_v9 = vadd.f32 %v3936_v5, %v1365_v16 }
 0xad0   :  { %v3133_v2 = vmul.f32 -1.442695, %v1366_v9 }
 0xad2   :  { %3238 = vpow2.f32 %v3133_v2 }
 0xad8   :  { %v3239_v3 = vpop.eup %3238 }
 0xad9   :  { %v1409_v46 = vadd.f32 1.0, %v3239_v3 }
 0xadb   :  { %3240 = vrcp.f32 %v1409_v46  ;;  %v1421_v29 = vand.u32 2147483648, %v1409_v46  ;;  %v1419_v20 = vand.u32 2147483647, %v1409_v46  ;;  %vm1415_vm13 = vweird.f32 %v1409_v46 }
 0xadd   :  { %v1422_v24 = vor.u32 1.1754944e-38, %v1421_v29  ;;  %vm1420_vm15 = vcmp.eq.f32.partialorder %v1419_v20, 8.507059e+37 }
 0xae1   :  { %v3241_v57 = vpop.eup %3240 }
 0xae2   :  { %v1411_v62 = vmul.f32 %v3241_v57, %v1409_v46  ;;  %vm1416_vm12 = vweird.f32 %v3241_v57 }
 0xae3   :  { %vm1417_vm14 = vmor %vm1415_vm13, %vm1416_vm12 }
 0xae4   :  { %v1412_v6 = vsub.f32 1.0, %v1411_v62 }
 0xae6   :  { %v1413_v38 = vmul.f32 %v3241_v57, %v1412_v6  ;;  %v624_v6 = vadd.f32 %v3763_v1, %v3784_v25 }
 0xae8   :  { %v1414_v10 = vadd.f32 %v3241_v57, %v1413_v38  ;;  %v791_v29 = vadd.f32 %v3790_v27, %v624_v6 }
 0xaea   :  { %v1418_v56 = vsel %vm1417_vm14, %v3241_v57, %v1414_v10 }
 0xaeb   :  { %v1423_v4 = vsel %vm1420_vm15, %v1422_v24, %v1418_v56 }
 0xaec   :  { %v1425_v13 = vmul.f32 %v1423_v4, %v3774_v17 }
 0xaee   :  { %v1426_v51 = vadd.f32 %v1425_v13, %v3778_v21 }
 0xaf0   :  { %1429 = vrot.lane.b32.xlu2 %v1426_v51, %s3432_s25  ;;  %v1427_v54 = vmul.f32 %v1426_v51, %v4053_v8 }
 0xb3e   :  { %v1392_v0 = vpop.permute.xlu1 %1391 }
 0xb3f   :  { %v1394_v12 = vmul.f32 %v1392_v0, %v1388_v58 }
 0xb41   :  { %1396 = vrot.lane.b32.xlu0 %v1394_v12, %s3432_s25 }
 0xb4a   :  { %v1430_v55 = vpop.permute.xlu2 %1429 }
 0xb4b   :  { %v1432_v43 = vmul.f32 %v1430_v55, %v1426_v51 }
 0xb4d   :  { %1434 = vrot.lane.b32.xlu1 %v1432_v43, %s3432_s25 }
 0xbb3   :  { %v1397_v11 = vpop.permute.xlu0 %1396 }
 0xbb4   :  { %v4088_v15 = vadd.f32 %v1397_v11, %v1389_v60 }
 0xbb6   :  { %3242 = vtanh.f32 %v4088_v15 }
 0xbbc   :  { %v3243_v47 = vpop.eup %3242 }
 0xbbd   :  { %1402 = vrot.lane.b32.xlu2 %v3243_v47, %s3432_s25 }
 0xbbf   :  { %v1435_v16 = vpop.permute.xlu1 %1434 }
 0xbc0   :  { %v4093_v9 = vadd.f32 %v1435_v16, %v1427_v54 }
 0xbc2   :  { %3244 = vtanh.f32 %v4093_v9 }
 0xbc8   :  { %v3245_v2 = vpop.eup %3244 }
 0xbc9   :  { %1440 = vrot.lane.b32.xlu0 %v3245_v2, %s3432_s25 }
 0xc17   :  { %v1403_v3 = vpop.permute.xlu2 %1402 }
 0xc18   :  { %v1405_v18 = vmul.f32 %v1403_v3, %v1388_v58 }
 0xc1a   :  { %1446 = vrot.lane.b32.xlu1 %v1405_v18, %s3433_s15 }
 0xc3b   :  { %v1441_v46 = vpop.permute.xlu0 %1440 }
 0xc3c   :  { %v1443_v57 = vmul.f32 %v1441_v46, %v1426_v51 }
 0xc3e   :  { %1473 = vrot.lane.b32.xlu2 %v1443_v57, %s3434_s20 }
 0xc8c   :  { %v1447_v62 = vpop.permute.xlu1 %1446 }
 0xc8d   :  { %3134 = vmatmul.msk.f32.vlgmr.msrb.gmra.mxu2 %vm855_vm8, %v1447_v62 }
 0xc8e   :  { %1726 = vmatpush.msrb.mxu2 %v3963_v61 }
 0xc90   :  { %1727 = vmatpush.msrb.mxu2 %v3969_v45 }
 0xc92   :  { %1728 = vmatpush.msrb.mxu2 %v4015_v59 }
 0xc94   :  { %1729 = vmatpush.msrb.mxu2 %v4021_v50 }
 0xc98   :  { %v1474_v8 = vpop.permute.xlu2 %1473 }
 0xc99   :  { %v1476_v58 = vsel %vm855_vm8, %v1447_v62, %v1474_v8 }
 0xc9a   :  { %3135 = vmatmul.msk.f32.vlgmr.msra.gmra.mxu2 %vm948_vm9, %v1476_v58 }
 0xc9b   :  { %1752 = vmatpush.msra.mxu2 %v3842_v19  ;;  %v4120_v19 = vld [vmem:[%s4604_s3 + $0x78] ss:$0 sm:$0xff] }
 0xc9d   :  { %1753 = vmatpush.msra.mxu2 %v3847_v22  ;;  %v809_v22 = vadd.f32 %v4120_v19, %v791_v29 }
 0xc9f   :  { %1754 = vmatpush.msra.mxu2 %v3854_v23 }
 0xca1   :  { %1755 = vmatpush.msra.mxu2 %v3861_v49 }
 0xca3   :  { %1756 = vmatpush.msra.mxu2 %v3868_v48 }
 0xca5   :  { %1757 = vmatpush.msra.mxu2 %v3875_v52 }
 0xca7   :  { %1758 = vmatpush.msra.mxu2 %v3882_v53 }
 0xca9   :  { %1759 = vmatpush.msra.mxu2 %v3893_v63 }
 0xd10   :  { %v1467_v23 = vpop.f32.mrf.mxu2 }
 0xd11   :  { %v1470_v49 = vadd.f32 %v1467_v23, %v809_v22 }
 0xd13   :  { %v3136_v38 = vmul.f32 -1.442695, %v1470_v49 }
 0xd15   :  { %3246 = vpow2.f32 %v3136_v38 }
 0xd1b   :  { %v3247_v20 = vpop.eup %3246 }
 0xd1c   :  { %v1503_v10 = vadd.f32 1.0, %v3247_v20 }
 0xd1d   :  { %v1497_v24 = vpop.f32.mrf.mxu2 }
 0xd1e   :  { %3248 = vrcp.f32 %v1503_v10  ;;  %v1498_v56 = vadd.f32 %v3936_v5, %v1497_v24  ;;  %v1515_v51 = vand.u32 2147483648, %v1503_v10  ;;  %v1513_v55 = vand.u32 2147483647, %v1503_v10 }
 0xd1f   :  { %vm1509_vm1 = vweird.f32 %v1503_v10 }
 0xd20   :  { %v3137_v1 = vmul.f32 -1.442695, %v1498_v56  ;;  %v1516_v60 = vor.u32 1.1754944e-38, %v1515_v51  ;;  %vm1514_vm4 = vcmp.eq.f32.partialorder %v1513_v55, 8.507059e+37 }
 0xd22   :  { %3250 = vpow2.f32 %v3137_v1 }
 0xd24   :  { %v3249_v25 = vpop.eup %3248 }
 0xd25   :  { %v1505_v27 = vmul.f32 %v3249_v25, %v1503_v10  ;;  %vm1510_vm0 = vweird.f32 %v3249_v25 }
 0xd26   :  { %vm1511_vm3 = vmor %vm1509_vm1, %vm1510_vm0 }
 0xd27   :  { %v1506_v4 = vsub.f32 1.0, %v1505_v27 }
 0xd28   :  { %v3251_v13 = vpop.eup %3250 }
 0xd29   :  { %v1507_v0 = vmul.f32 %v3249_v25, %v1506_v4  ;;  %v1541_v12 = vadd.f32 1.0, %v3251_v13 }
 0xd2b   :  { %3252 = vrcp.f32 %v1541_v12  ;;  %v1508_v43 = vadd.f32 %v3249_v25, %v1507_v0  ;;  %v1553_v46 = vand.u32 2147483648, %v1541_v12  ;;  %v1551_v62 = vand.u32 2147483647, %v1541_v12 }
 0xd2c   :  { %vm1547_vm6 = vweird.f32 %v1541_v12 }
 0xd2d   :  { %v1512_v11 = vsel %vm1511_vm3, %v3249_v25, %v1508_v43  ;;  %v1554_v58 = vor.u32 1.1754944e-38, %v1553_v46  ;;  %vm1552_vm10 = vcmp.eq.f32.partialorder %v1551_v62, 8.507059e+37 }
 0xd2e   :  { %v1517_v47 = vsel %vm1514_vm4, %v1516_v60, %v1512_v11  ;;  %v4154_v11 = vld [vmem:[%s4604_s3 + $0x70] sm:$0xff] }
 0xd2f   :  { %v1519_v54 = vmul.f32 %v1517_v47, %v3774_v17  ;;  %v4160_v47 = vld [vmem:[%s4604_s3 + $0x68] sm:$0xff] }
 0xd31   :  { %v3253_v16 = vpop.eup %3252  ;;  %v1520_v2 = vadd.f32 %v1519_v54, %v3778_v21  ;;  %v4166_v54 = vld [vmem:[%s4604_s3 + $0x60] sm:$0xff] }
 0xd32   :  { %v1543_v3 = vmul.f32 %v3253_v16, %v1541_v12  ;;  %vm1548_vm5 = vweird.f32 %v3253_v16 }
 0xd33   :  { %1523 = vrot.lane.b32.xlu0 %v1520_v2, %s3432_s25  ;;  %vm1549_vm7 = vmor %vm1547_vm6, %vm1548_vm5  ;;  %v1521_v24 = vmul.f32 %v1520_v2, %v4088_v15 }
 0xd34   :  { %v1544_v18 = vsub.f32 1.0, %v1543_v3 }
 0xd36   :  { %v1545_v57 = vmul.f32 %v3253_v16, %v1544_v18 }
 0xd38   :  { %v1546_v8 = vadd.f32 %v3253_v16, %v1545_v57 }
 0xd3a   :  { %v1550_v6 = vsel %vm1549_vm7, %v3253_v16, %v1546_v8  ;;  %v4172_v16 = vld [vmem:[%s4604_s3 + $0x58] sm:$0xff] }
 0xd3b   :  { %v1555_v29 = vsel %vm1552_vm10, %v1554_v58, %v1550_v6 }
 0xd3c   :  { %v1557_v22 = vmul.f32 %v1555_v29, %v3774_v17 }
 0xd3e   :  { %v1558_v23 = vadd.f32 %v1557_v22, %v3778_v21 }
 0xd40   :  { %1561 = vrot.lane.b32.xlu1 %v1558_v23, %s3432_s25  ;;  %v1559_v27 = vmul.f32 %v1558_v23, %v4093_v9 }
 0xda5   :  { %v1524_v49 = vpop.permute.xlu0 %1523 }
 0xda6   :  { %v1526_v38 = vmul.f32 %v1524_v49, %v1520_v2 }
 0xda8   :  { %1528 = vrot.lane.b32.xlu2 %v1526_v38, %s3432_s25 }
 0xdb2   :  { %v1562_v20 = vpop.permute.xlu1 %1561 }
 0xdb3   :  { %v1564_v10 = vmul.f32 %v1562_v20, %v1558_v23 }
 0xdb5   :  { %1566 = vrot.lane.b32.xlu0 %v1564_v10, %s3432_s25 }
 0xe02   :  { %v1529_v56 = vpop.permute.xlu2 %1528 }
 0xe03   :  { %v4133_v1 = vadd.f32 %v1529_v56, %v1521_v24 }
 0xe05   :  { %3254 = vtanh.f32 %v4133_v1 }
 0xe0b   :  { %v3255_v25 = vpop.eup %3254 }
 0xe0c   :  { %1534 = vrot.lane.b32.xlu1 %v3255_v25, %s3432_s25 }
 0xe27   :  { %v1567_v4 = vpop.permute.xlu0 %1566 }
 0xe28   :  { %v4138_v13 = vadd.f32 %v1567_v4, %v1559_v27 }
 0xe2a   :  { %3256 = vtanh.f32 %v4138_v13 }
 0xe30   :  { %v3257_v51 = vpop.eup %3256 }
 0xe31   :  { %1572 = vrot.lane.b32.xlu2 %v3257_v51, %s3432_s25 }
 0xe7e   :  { %v1535_v0 = vpop.permute.xlu1 %1534 }
 0xe7f   :  { %v1537_v15 = vmul.f32 %v1535_v0, %v1520_v2  ;;  %v627_v2 = vadd.f32 %v3769_v14, %v3792_v28 }
 0xe81   :  { %1578 = vrot.lane.b32.xlu0 %v1537_v15, %s3433_s15  ;;  %v792_v3 = vadd.f32 %v3796_v30, %v627_v2 }
 0xe83   :  { %v810_v18 = vadd.f32 %v4120_v19, %v792_v3 }
 0xe8b   :  { %v1573_v12 = vpop.permute.xlu2 %1572 }
 0xe8c   :  { %v1575_v55 = vmul.f32 %v1573_v12, %v1558_v23 }
 0xe8e   :  { %1605 = vrot.lane.b32.xlu1 %v1575_v55, %s3434_s20 }
 0xef3   :  { %v1579_v43 = vpop.permute.xlu0 %1578 }
 0xef4   :  { %3138 = vmatmul.msk.f32.vlgmr.msrb.gmra.mxu3 %vm855_vm8, %v1579_v43 }
 0xef5   :  { %1858 = vmatpush.msrb.mxu3 %v3963_v61 }
 0xef7   :  { %1859 = vmatpush.msrb.mxu3 %v3969_v45 }
 0xef9   :  { %1860 = vmatpush.msrb.mxu3 %v4015_v59 }
 0xefb   :  { %1861 = vmatpush.msrb.mxu3 %v4021_v50 }
 0xf00   :  { %v1606_v9 = vpop.permute.xlu1 %1605 }
 0xf01   :  { %v1608_v60 = vsel %vm855_vm8, %v1579_v43, %v1606_v9 }
 0xf02   :  { %3139 = vmatmul.msk.f32.vlgmr.msra.gmra.mxu3 %vm948_vm9, %v1608_v60 }
 0xf03   :  { %1884 = vmatpush.msra.mxu3 %v4154_v11 }
 0xf05   :  { %1885 = vmatpush.msra.mxu3 %v4160_v47 }
 0xf07   :  { %1886 = vmatpush.msra.mxu3 %v4166_v54 }
 0xf09   :  { %1887 = vmatpush.msra.mxu3 %v4172_v16 }
 0xf0b   :  { %1888 = vmatpush.msra.mxu3 %v3868_v48 }
 0xf0d   :  { %1889 = vmatpush.msra.mxu3 %v3875_v52 }
 0xf0f   :  { %1890 = vmatpush.msra.mxu3 %v3882_v53 }
 0xf11   :  { %1891 = vmatpush.msra.mxu3 %v3893_v63 }
 0xf77   :  { %v1599_v46 = vpop.f32.mrf.mxu3 }
 0xf78   :  { %v1602_v57 = vadd.f32 %v1599_v46, %v810_v18 }
 0xf7a   :  { %v3140_v62 = vmul.f32 -1.442695, %v1602_v57 }
 0xf7c   :  { %3258 = vpow2.f32 %v3140_v62 }
 0xf82   :  { %v3259_v8 = vpop.eup %3258 }
 0xf83   :  { %v1635_v58 = vadd.f32 1.0, %v3259_v8 }
 0xf85   :  { %3260 = vrcp.f32 %v1635_v58  ;;  %v1629_v48 = vpop.f32.mrf.mxu3  ;;  %v1647_v14 = vand.u32 2147483648, %v1635_v58  ;;  %v1645_v22 = vand.u32 2147483647, %v1635_v58  ;;  %vm1641_vm12 = vweird.f32 %v1635_v58 }
 0xf86   :  { %v1630_v52 = vadd.f32 %v3936_v5, %v1629_v48 }
 0xf87   :  { %v1648_v38 = vor.u32 1.1754944e-38, %v1647_v14  ;;  %vm1646_vm14 = vcmp.eq.f32.partialorder %v1645_v22, 8.507059e+37  ;;  %v4230_v22 = vld [vmem:[%s4604_s3 + $0x40] sm:$0xff] }
 0xf88   :  { %v3141_v53 = vmul.f32 -1.442695, %v1630_v52 }
 0xf8a   :  { %3262 = vpow2.f32 %v3141_v53 }
 0xf8b   :  { %v3261_v63 = vpop.eup %3260 }
 0xf8c   :  { %v1637_v6 = vmul.f32 %v3261_v63, %v1635_v58  ;;  %vm1642_vm11 = vweird.f32 %v3261_v63 }
 0xf8d   :  { %vm1643_vm13 = vmor %vm1641_vm12, %vm1642_vm11 }
 0xf8e   :  { %v1638_v29 = vsub.f32 1.0, %v1637_v6 }
 0xf90   :  { %v3263_v28 = vpop.eup %3262  ;;  %v1639_v30 = vmul.f32 %v3261_v63, %v1638_v29 }
 0xf91   :  { %v1673_v23 = vadd.f32 1.0, %v3263_v28 }
 0xf92   :  { %v1640_v49 = vadd.f32 %v3261_v63, %v1639_v30 }
 0xf93   :  { %3264 = vrcp.f32 %v1673_v23  ;;  %v1685_v4 = vand.u32 2147483648, %v1673_v23  ;;  %v1683_v0 = vand.u32 2147483647, %v1673_v23  ;;  %vm1679_vm0 = vweird.f32 %v1673_v23 }
 0xf94   :  { %v1644_v20 = vsel %vm1643_vm13, %v3261_v63, %v1640_v49  ;;  %v630_v49 = vadd.f32 %v3788_v26, %v3798_v31 }
 0xf95   :  { %v1649_v10 = vsel %vm1646_vm14, %v1648_v38, %v1644_v20  ;;  %v1686_v12 = vor.u32 1.1754944e-38, %v1685_v4  ;;  %vm1684_vm3 = vcmp.eq.f32.partialorder %v1683_v0, 8.507059e+37 }
 0xf96   :  { %v1651_v5 = vmul.f32 %v1649_v10, %v3774_v17  ;;  %v793_v38 = vadd.f32 %v3800_v32, %v630_v49 }
 0xf98   :  { %v1652_v24 = vadd.f32 %v1651_v5, %v3778_v21  ;;  %v811_v20 = vadd.f32 %v4120_v19, %v793_v38 }
 0xf99   :  { %v3265_v56 = vpop.eup %3264 }
 0xf9a   :  { %v1675_v25 = vmul.f32 %v3265_v56, %v1673_v23  ;;  %1655 = vrot.lane.b32.xlu2 %v1652_v24, %s3432_s25  ;;  %vm1680_vm15 = vweird.f32 %v3265_v56  ;;  %v1653_v57 = vmul.f32 %v1652_v24, %v4133_v1  ;;  %v4236_v23 = vld [vmem:[%s4604_s3 + $0x38] sm:$0xff] }
 0xf9b   :  { %vm1681_vm1 = vmor %vm1679_vm0, %vm1680_vm15 }
 0xf9c   :  { %v1676_v27 = vsub.f32 1.0, %v1675_v25 }
 0xf9e   :  { %v1677_v51 = vmul.f32 %v3265_v56, %v1676_v27 }
 0xfa0   :  { %v1678_v15 = vadd.f32 %v3265_v56, %v1677_v51 }
 0xfa2   :  { %v1682_v55 = vsel %vm1681_vm1, %v3265_v56, %v1678_v15 }
 0xfa3   :  { %v1687_v43 = vsel %vm1684_vm3, %v1686_v12, %v1682_v55 }
 0xfa4   :  { %v1689_v9 = vmul.f32 %v1687_v43, %v3774_v17 }
 0xfa6   :  { %v1690_v60 = vadd.f32 %v1689_v9, %v3778_v21 }
 0xfa8   :  { %1693 = vrot.lane.b32.xlu0 %v1690_v60, %s3432_s25  ;;  %v1691_v48 = vmul.f32 %v1690_v60, %v4138_v13 }
 0xff4   :  { %v1656_v2 = vpop.permute.xlu2 %1655 }
 0xff5   :  { %v1658_v3 = vmul.f32 %v1656_v2, %v1652_v24  ;;  %v4249_v2 = vld [vmem:[%s4604_s3 + $0x79] ss:$0 sm:$0xff] }
 0xff7   :  { %1660 = vrot.lane.b32.xlu1 %v1658_v3, %s3432_s25 }
0x101a   :  { %v1694_v18 = vpop.permute.xlu0 %1693 }
0x101b   :  { %v1696_v46 = vmul.f32 %v1694_v18, %v1690_v60 }
0x101d   :  { %1698 = vrot.lane.b32.xlu2 %v1696_v46, %s3432_s25 }
0x1069   :  { %v1661_v62 = vpop.permute.xlu1 %1660 }
0x106a   :  { %v4193_v8 = vadd.f32 %v1661_v62, %v1653_v57 }
0x106c   :  { %3266 = vtanh.f32 %v4193_v8 }
0x1072   :  { %v3267_v58 = vpop.eup %3266 }
0x1073   :  { %1666 = vrot.lane.b32.xlu0 %v3267_v58, %s3432_s25 }
0x1077   :  { %v1699_v52 = vpop.permute.xlu2 %1698 }
0x1078   :  { %v4198_v53 = vadd.f32 %v1699_v52, %v1691_v48 }
0x107a   :  { %3268 = vtanh.f32 %v4198_v53 }
0x1080   :  { %v3269_v63 = vpop.eup %3268 }
0x1081   :  { %1704 = vrot.lane.b32.xlu1 %v3269_v63, %s3432_s25 }
0x10e5   :  { %v1667_v6 = vpop.permute.xlu0 %1666 }
0x10e6   :  { %v1669_v1 = vmul.f32 %v1667_v6, %v1652_v24 }
0x10e8   :  { %1710 = vrot.lane.b32.xlu2 %v1669_v1, %s3433_s15 }
0x10f3   :  { %v1705_v29 = vpop.permute.xlu1 %1704 }
0x10f4   :  { %v1707_v14 = vmul.f32 %v1705_v29, %v1690_v60 }
0x10f6   :  { %1737 = vrot.lane.b32.xlu0 %v1707_v14, %s3434_s20 }
0x1142   :  { %v1711_v28 = vpop.permute.xlu2 %1710 }
0x1143   :  { %3142 = vmatmul.msk.f32.vlgmr.msrb.gmra.mxu2 %vm855_vm8, %v1711_v28 }
0x1144   :  { %1990 = vmatpush.msrb.mxu2 %v3963_v61  ;;  %v4218_v61 = vld [vmem:[%s4604_s3 + $0x50] sm:$0xff] }
0x1146   :  { %1991 = vmatpush.msrb.mxu2 %v3969_v45  ;;  %v4224_v45 = vld [vmem:[%s4604_s3 + $0x48] sm:$0xff] }
0x1148   :  { %1992 = vmatpush.msrb.mxu2 %v4015_v59 }
0x114a   :  { %1993 = vmatpush.msrb.mxu2 %v4021_v50 }
0x1168   :  { %v1738_v13 = vpop.permute.xlu0 %1737 }
0x1169   :  { %v1740_v30 = vsel %vm855_vm8, %v1711_v28, %v1738_v13 }
0x116a   :  { %3143 = vmatmul.msk.f32.vlgmr.msra.gmra.mxu2 %vm948_vm9, %v1740_v30 }
0x116b   :  { %2016 = vmatpush.msra.mxu2 %v4154_v11 }
0x116d   :  { %2017 = vmatpush.msra.mxu2 %v4160_v47 }
0x116f   :  { %2018 = vmatpush.msra.mxu2 %v4166_v54 }
0x1171   :  { %2019 = vmatpush.msra.mxu2 %v4172_v16 }
0x1173   :  { %2020 = vmatpush.msra.mxu2 %v4218_v61 }
0x1175   :  { %2021 = vmatpush.msra.mxu2 %v4224_v45 }
0x1177   :  { %2022 = vmatpush.msra.mxu2 %v4230_v22 }
0x1179   :  { %2023 = vmatpush.msra.mxu2 %v4236_v23 }
0x11c6   :  { %v1731_v10 = vpop.f32.mrf.mxu2 }
0x11c7   :  { %v1734_v5 = vadd.f32 %v1731_v10, %v811_v20 }
0x11c9   :  { %v3144_v24 = vmul.f32 -1.442695, %v1734_v5 }
0x11cb   :  { %3270 = vpow2.f32 %v3144_v24 }
0x11d1   :  { %v3271_v56 = vpop.eup %3270 }
0x11d2   :  { %v1767_v25 = vadd.f32 1.0, %v3271_v56 }
0x11d4   :  { %3272 = vrcp.f32 %v1767_v25  ;;  %v1779_v0 = vand.u32 2147483648, %v1767_v25  ;;  %v1777_v12 = vand.u32 2147483647, %v1767_v25  ;;  %vm1773_vm5 = vweird.f32 %v1767_v25 }
0x11d6   :  { %v1780_v31 = vor.u32 1.1754944e-38, %v1779_v0  ;;  %vm1778_vm7 = vcmp.eq.f32.partialorder %v1777_v12, 8.507059e+37 }
0x11da   :  { %v3273_v27 = vpop.eup %3272 }
0x11db   :  { %v1769_v4 = vmul.f32 %v3273_v27, %v1767_v25  ;;  %vm1774_vm4 = vweird.f32 %v3273_v27 }
0x11dc   :  { %vm1775_vm6 = vmor %vm1773_vm5, %vm1774_vm4 }
0x11dd   :  { %v1770_v51 = vsub.f32 1.0, %v1769_v4 }
0x11df   :  { %v1771_v15 = vmul.f32 %v3273_v27, %v1770_v51 }
0x11e1   :  { %v1772_v26 = vadd.f32 %v3273_v27, %v1771_v15 }
0x11e3   :  { %v1776_v32 = vsel %vm1775_vm6, %v3273_v27, %v1772_v26 }
0x11e4   :  { %v1781_v55 = vsel %vm1778_vm7, %v1780_v31, %v1776_v32  ;;  %v4279_v32 = vld [vmem:[%s4604_s3 + $0x28] sm:$0xff] }
0x11e5   :  { %v1783_v43 = vmul.f32 %v1781_v55, %v3774_v17 }
0x11e7   :  { %v1784_v9 = vadd.f32 %v1783_v43, %v3778_v21 }
0x11e9   :  { %1787 = vrot.lane.b32.xlu1 %v1784_v9, %s3432_s25  ;;  %v1785_v5 = vmul.f32 %v1784_v9, %v4193_v8 }
0x11ed   :  { %v1761_v60 = vpop.f32.mrf.mxu2 }
0x11ee   :  { %v1762_v3 = vadd.f32 %v4249_v2, %v1761_v60 }
0x11f0   :  { %v3145_v18 = vmul.f32 -1.442695, %v1762_v3 }
0x11f2   :  { %3274 = vpow2.f32 %v3145_v18 }
0x11f8   :  { %v3275_v46 = vpop.eup %3274 }
0x11f9   :  { %v1805_v57 = vadd.f32 1.0, %v3275_v46 }
0x11fb   :  { %3276 = vrcp.f32 %v1805_v57  ;;  %v1817_v52 = vand.u32 2147483648, %v1805_v57  ;;  %v1815_v6 = vand.u32 2147483647, %v1805_v57  ;;  %vm1811_vm11 = vweird.f32 %v1805_v57 }
0x11fd   :  { %v1818_v29 = vor.u32 1.1754944e-38, %v1817_v52  ;;  %vm1816_vm13 = vcmp.eq.f32.partialorder %v1815_v6, 8.507059e+37 }
0x1201   :  { %v3277_v62 = vpop.eup %3276 }
0x1202   :  { %v1807_v58 = vmul.f32 %v3277_v62, %v1805_v57  ;;  %vm1812_vm10 = vweird.f32 %v3277_v62 }
0x1203   :  { %vm1813_vm12 = vmor %vm1811_vm11, %vm1812_vm10 }
0x1204   :  { %v1808_v48 = vsub.f32 1.0, %v1807_v58 }
0x1206   :  { %v1809_v63 = vmul.f32 %v3277_v62, %v1808_v48 }
0x1208   :  { %v1810_v1 = vadd.f32 %v3277_v62, %v1809_v63 }
0x120a   :  { %v1814_v14 = vsel %vm1813_vm12, %v3277_v62, %v1810_v1 }
0x120b   :  { %v1819_v28 = vsel %vm1816_vm13, %v1818_v29, %v1814_v14 }
0x120c   :  { %v1821_v13 = vmul.f32 %v1819_v28, %v3774_v17 }
0x120e   :  { %v1822_v30 = vadd.f32 %v1821_v13, %v3778_v21 }
0x1210   :  { %1825 = vrot.lane.b32.xlu2 %v1822_v30, %s3432_s25  ;;  %v1823_v27 = vmul.f32 %v1822_v30, %v4198_v53  ;;  %v4273_v53 = vld [vmem:[%s4604_s3 + $0x30] sm:$0xff] }
0x125b   :  { %v1788_v49 = vpop.permute.xlu1 %1787 }
0x125c   :  { %v1790_v38 = vmul.f32 %v1788_v49, %v1784_v9 }
0x125e   :  { %1792 = vrot.lane.b32.xlu0 %v1790_v38, %s3432_s25 }
0x126a   :  { %v1826_v20 = vpop.permute.xlu2 %1825 }
0x126b   :  { %v1828_v10 = vmul.f32 %v1826_v20, %v1822_v30 }
0x126d   :  { %1830 = vrot.lane.b32.xlu1 %v1828_v10, %s3432_s25 }
0x12d0   :  { %v1793_v24 = vpop.permute.xlu0 %1792 }
0x12d1   :  { %v4258_v56 = vadd.f32 %v1793_v24, %v1785_v5 }
0x12d3   :  { %3278 = vtanh.f32 %v4258_v56 }
0x12d9   :  { %v3279_v25 = vpop.eup %3278 }
0x12da   :  { %1798 = vrot.lane.b32.xlu2 %v3279_v25, %s3432_s25 }
0x12df   :  { %v1831_v4 = vpop.permute.xlu1 %1830 }
0x12e0   :  { %v4263_v51 = vadd.f32 %v1831_v4, %v1823_v27 }
0x12e2   :  { %3280 = vtanh.f32 %v4263_v51 }
0x12e8   :  { %v3281_v0 = vpop.eup %3280 }
0x12e9   :  { %1836 = vrot.lane.b32.xlu0 %v3281_v0, %s3432_s25 }
0x1334   :  { %v1799_v15 = vpop.permute.xlu2 %1798 }
0x1335   :  { %v1801_v8 = vmul.f32 %v1799_v15, %v1784_v9 }
0x1337   :  { %1842 = vrot.lane.b32.xlu1 %v1801_v8, %s3433_s15 }
0x135b   :  { %v1837_v12 = vpop.permute.xlu0 %1836 }
0x135c   :  { %v1839_v26 = vmul.f32 %v1837_v12, %v1822_v30 }
0x135e   :  { %1869 = vrot.lane.b32.xlu2 %v1839_v26, %s3434_s20 }
0x13a9   :  { %v1843_v31 = vpop.permute.xlu1 %1842 }
0x13aa   :  { %3146 = vmatmul.msk.f32.vlgmr.msrb.gmra.mxu3 %vm855_vm8, %v1843_v31 }
0x13ab   :  { %2122 = vmatpush.msrb.mxu3 %v4273_v53 }
0x13ad   :  { %2123 = vmatpush.msrb.mxu3 %v4279_v32 }
0x13af   :  { %2124 = vmatpush.msrb.mxu3 %v4015_v59  ;;  %v633_v59 = vadd.f32 %v3794_v7, %v3804_v34 }
0x13b1   :  { %2125 = vmatpush.msrb.mxu3 %v4021_v50  ;;  %v794_v50 = vadd.f32 %v3806_v35, %v633_v59 }
0x13b3   :  { %v812_v9 = vadd.f32 %v4120_v19, %v794_v50 }
0x13b8   :  { %v1870_v55 = vpop.permute.xlu2 %1869 }
0x13b9   :  { %v1872_v43 = vsel %vm855_vm8, %v1843_v31, %v1870_v55 }
0x13ba   :  { %3147 = vmatmul.msk.f32.vlgmr.msra.gmra.mxu3 %vm948_vm9, %v1872_v43 }
0x13bb   :  { %2148 = vmatpush.msra.mxu3 %v4154_v11 }
0x13bd   :  { %2149 = vmatpush.msra.mxu3 %v4160_v47 }
0x13bf   :  { %2150 = vmatpush.msra.mxu3 %v4166_v54 }
0x13c1   :  { %2151 = vmatpush.msra.mxu3 %v4172_v16 }
0x13c3   :  { %2152 = vmatpush.msra.mxu3 %v4218_v61 }
0x13c5   :  { %2153 = vmatpush.msra.mxu3 %v4224_v45 }
0x13c7   :  { %2154 = vmatpush.msra.mxu3 %v4230_v22 }
0x13c9   :  { %2155 = vmatpush.msra.mxu3 %v4236_v23 }
0x142d   :  { %v1863_v60 = vpop.f32.mrf.mxu3 }
0x142e   :  { %v1866_v3 = vadd.f32 %v1863_v60, %v812_v9 }
0x1430   :  { %v3148_v18 = vmul.f32 -1.442695, %v1866_v3 }
0x1432   :  { %3282 = vpow2.f32 %v3148_v18 }
0x1438   :  { %v3283_v46 = vpop.eup %3282 }
0x1439   :  { %v1899_v57 = vadd.f32 1.0, %v3283_v46 }
0x143b   :  { %3284 = vrcp.f32 %v1899_v57  ;;  %v1911_v7 = vand.u32 2147483648, %v1899_v57  ;;  %v1909_v35 = vand.u32 2147483647, %v1899_v57  ;;  %vm1905_vm15 = vweird.f32 %v1899_v57 }
0x143d   :  { %v1893_v62 = vpop.f32.mrf.mxu3  ;;  %v1912_v28 = vor.u32 1.1754944e-38, %v1911_v7  ;;  %vm1910_vm1 = vcmp.eq.f32.partialorder %v1909_v35, 8.507059e+37  ;;  %v636_v35 = vadd.f32 %v3802_v33, %v3810_v37 }
0x143e   :  { %v1894_v58 = vadd.f32 %v4249_v2, %v1893_v62 }
0x1440   :  { %v3149_v48 = vmul.f32 -1.442695, %v1894_v58 }
0x1441   :  { %v3285_v52 = vpop.eup %3284 }
0x1442   :  { %v1901_v63 = vmul.f32 %v3285_v52, %v1899_v57  ;;  %3286 = vpow2.f32 %v3149_v48  ;;  %vm1906_vm14 = vweird.f32 %v3285_v52 }
0x1443   :  { %vm1907_vm0 = vmor %vm1905_vm15, %vm1906_vm14 }
0x1444   :  { %v1902_v6 = vsub.f32 1.0, %v1901_v63 }
0x1446   :  { %v1903_v34 = vmul.f32 %v3285_v52, %v1902_v6  ;;  %v4331_v6 = vld [vmem:[%s4604_s3 + $0x18] sm:$0xff] }
0x1448   :  { %v3287_v1 = vpop.eup %3286  ;;  %v1904_v29 = vadd.f32 %v3285_v52, %v1903_v34 }
0x1449   :  { %v1937_v14 = vadd.f32 1.0, %v3287_v1  ;;  %v795_v1 = vadd.f32 %v3812_v39, %v636_v35 }
0x144a   :  { %v1908_v13 = vsel %vm1907_vm0, %v3285_v52, %v1904_v29 }
0x144b   :  { %3288 = vrcp.f32 %v1937_v14  ;;  %v1913_v30 = vsel %vm1910_vm1, %v1912_v28, %v1908_v13  ;;  %v1949_v24 = vand.u32 2147483648, %v1937_v14  ;;  %v1947_v27 = vand.u32 2147483647, %v1937_v14 }
0x144c   :  { %v1915_v49 = vmul.f32 %v1913_v30, %v3774_v17  ;;  %vm1943_vm4 = vweird.f32 %v1937_v14  ;;  %v813_v29 = vadd.f32 %v4120_v19, %v795_v1 }
0x144d   :  { %v1950_v0 = vor.u32 1.1754944e-38, %v1949_v24  ;;  %vm1948_vm6 = vcmp.eq.f32.partialorder %v1947_v27, 8.507059e+37 }
0x144e   :  { %v1916_v38 = vadd.f32 %v1915_v49, %v3778_v21 }
0x1450   :  { %1919 = vrot.lane.b32.xlu0 %v1916_v38, %s3432_s25  ;;  %v1917_v50 = vmul.f32 %v1916_v38, %v4258_v56 }
0x1451   :  { %v3289_v20 = vpop.eup %3288 }
0x1452   :  { %v1939_v10 = vmul.f32 %v3289_v20, %v1937_v14  ;;  %vm1944_vm3 = vweird.f32 %v3289_v20 }
0x1453   :  { %vm1945_vm5 = vmor %vm1943_vm4, %vm1944_vm3 }
0x1454   :  { %v1940_v5 = vsub.f32 1.0, %v1939_v10 }
0x1456   :  { %v1941_v25 = vmul.f32 %v3289_v20, %v1940_v5 }
0x1458   :  { %v1942_v4 = vadd.f32 %v3289_v20, %v1941_v25 }
0x145a   :  { %v1946_v15 = vsel %vm1945_vm5, %v3289_v20, %v1942_v4 }
0x145b   :  { %v1951_v8 = vsel %vm1948_vm6, %v1950_v0, %v1946_v15 }
0x145c   :  { %v1953_v12 = vmul.f32 %v1951_v8, %v3774_v17 }
0x145e   :  { %v1954_v26 = vadd.f32 %v1953_v12, %v3778_v21 }
0x1460   :  { %1957 = vrot.lane.b32.xlu1 %v1954_v26, %s3432_s25  ;;  %v1955_v18 = vmul.f32 %v1954_v26, %v4263_v51  ;;  %v4325_v51 = vld [vmem:[%s4604_s3 + $0x20] sm:$0xff] }
0x14c2   :  { %v1920_v31 = vpop.permute.xlu0 %1919 }
0x14c3   :  { %v1922_v55 = vmul.f32 %v1920_v31, %v1916_v38 }
0x14c5   :  { %1924 = vrot.lane.b32.xlu2 %v1922_v55, %s3432_s25 }
0x14d2   :  { %v1958_v43 = vpop.permute.xlu1 %1957 }
0x14d3   :  { %v1960_v59 = vmul.f32 %v1958_v43, %v1954_v26 }
0x14d5   :  { %1962 = vrot.lane.b32.xlu0 %v1960_v59, %s3432_s25 }
0x151f   :  { %v1925_v9 = vpop.permute.xlu2 %1924 }
0x1520   :  { %v4308_v60 = vadd.f32 %v1925_v9, %v1917_v50 }
0x1522   :  { %3290 = vtanh.f32 %v4308_v60 }
0x1528   :  { %v3291_v3 = vpop.eup %3290 }
0x1529   :  { %1930 = vrot.lane.b32.xlu1 %v3291_v3, %s3432_s25 }
0x1547   :  { %v1963_v46 = vpop.permute.xlu0 %1962 }
0x1548   :  { %v4313_v57 = vadd.f32 %v1963_v46, %v1955_v18 }
0x154a   :  { %3292 = vtanh.f32 %v4313_v57 }
0x1550   :  { %v3293_v62 = vpop.eup %3292 }
0x1551   :  { %1968 = vrot.lane.b32.xlu2 %v3293_v62, %s3432_s25 }
0x159b   :  { %v1931_v58 = vpop.permute.xlu1 %1930 }
0x159c   :  { %v1933_v56 = vmul.f32 %v1931_v58, %v1916_v38 }
0x159e   :  { %1974 = vrot.lane.b32.xlu0 %v1933_v56, %s3433_s15 }
0x15ab   :  { %v1969_v48 = vpop.permute.xlu2 %1968 }
0x15ac   :  { %v1971_v52 = vmul.f32 %v1969_v48, %v1954_v26 }
0x15ae   :  { %2001 = vrot.lane.b32.xlu1 %v1971_v52, %s3434_s20 }
0x1610   :  { %v1975_v63 = vpop.permute.xlu0 %1974 }
0x1611   :  { %3150 = vmatmul.msk.f32.vlgmr.msrb.gmra.mxu2 %vm855_vm8, %v1975_v63 }
0x1612   :  { %2254 = vmatpush.msrb.mxu2 %v4273_v53 }
0x1614   :  { %2255 = vmatpush.msrb.mxu2 %v4279_v32 }
0x1616   :  { %2256 = vmatpush.msrb.mxu2 %v4325_v51 }
0x1618   :  { %2257 = vmatpush.msrb.mxu2 %v4331_v6 }
0x1620   :  { %v2002_v7 = vpop.permute.xlu1 %2001 }
0x1621   :  { %v2004_v34 = vsel %vm855_vm8, %v1975_v63, %v2002_v7 }
0x1622   :  { %3151 = vmatmul.msk.f32.vlgmr.msra.gmra.mxu2 %vm948_vm9, %v2004_v34 }
0x1623   :  { %2412 = vmatpush.msra.mxu2 %v4154_v11 }
0x1625   :  { %2413 = vmatpush.msra.mxu2 %v4160_v47 }
0x1627   :  { %2414 = vmatpush.msra.mxu2 %v4166_v54 }
0x1629   :  { %2415 = vmatpush.msra.mxu2 %v4172_v16 }
0x162b   :  { %2416 = vmatpush.msra.mxu2 %v4218_v61 }
0x162d   :  { %2417 = vmatpush.msra.mxu2 %v4224_v45 }
0x162f   :  { %2418 = vmatpush.msra.mxu2 %v4230_v22 }
0x1631   :  { %2419 = vmatpush.msra.mxu2 %v4236_v23 }
0x1694   :  { %v1995_v14 = vpop.f32.mrf.mxu2 }
0x1695   :  { %v1998_v28 = vadd.f32 %v1995_v14, %v813_v29 }
0x1697   :  { %v3152_v13 = vmul.f32 -1.442695, %v1998_v28 }
0x1699   :  { %3294 = vpow2.f32 %v3152_v13 }
0x169f   :  { %v3295_v30 = vpop.eup %3294 }
0x16a0   :  { %v2031_v49 = vadd.f32 1.0, %v3295_v30 }
0x16a2   :  { %3296 = vrcp.f32 %v2031_v49  ;;  %v2043_v33 = vand.u32 2147483648, %v2031_v49  ;;  %v2041_v39 = vand.u32 2147483647, %v2031_v49  ;;  %vm2037_vm10 = vweird.f32 %v2031_v49 }
0x16a4   :  { %v2044_v0 = vor.u32 1.1754944e-38, %v2043_v33  ;;  %vm2042_vm12 = vcmp.eq.f32.partialorder %v2041_v39, 8.507059e+37 }
0x16a5   :  { %v2025_v38 = vpop.f32.mrf.mxu2 }
0x16a6   :  { %v2026_v20 = vadd.f32 %v4249_v2, %v2025_v38 }
0x16a8   :  { %v3297_v10 = vpop.eup %3296  ;;  %v3153_v5 = vmul.f32 -1.442695, %v2026_v20 }
0x16a9   :  { %v2033_v24 = vmul.f32 %v3297_v10, %v2031_v49  ;;  %vm2038_vm7 = vweird.f32 %v3297_v10 }
0x16aa   :  { %3298 = vpow2.f32 %v3153_v5  ;;  %vm2039_vm11 = vmor %vm2037_vm10, %vm2038_vm7 }
0x16ab   :  { %v2034_v25 = vsub.f32 1.0, %v2033_v24 }
0x16ad   :  { %v2035_v37 = vmul.f32 %v3297_v10, %v2034_v25  ;;  %v639_v25 = vadd.f32 %v3808_v36, %v3814_v40 }
0x16af   :  { %v2036_v27 = vadd.f32 %v3297_v10, %v2035_v37  ;;  %v796_v33 = vadd.f32 %v3818_v42, %v639_v25 }
0x16b0   :  { %v3299_v4 = vpop.eup %3298 }
0x16b1   :  { %v2069_v15 = vadd.f32 1.0, %v3299_v4  ;;  %v2040_v8 = vsel %vm2039_vm11, %v3297_v10, %v2036_v27  ;;  %v814_v37 = vadd.f32 %v4120_v19, %v796_v33 }
0x16b2   :  { %v2045_v12 = vsel %vm2042_vm12, %v2044_v0, %v2040_v8 }
0x16b3   :  { %3300 = vrcp.f32 %v2069_v15  ;;  %v2047_v26 = vmul.f32 %v2045_v12, %v3774_v17  ;;  %v2081_v50 = vand.u32 2147483648, %v2069_v15  ;;  %v2079_v3 = vand.u32 2147483647, %v2069_v15 }
0x16b4   :  { %vm2075_vm14 = vweird.f32 %v2069_v15 }
0x16b5   :  { %v2048_v31 = vadd.f32 %v2047_v26, %v3778_v21  ;;  %v2082_v46 = vor.u32 1.1754944e-38, %v2081_v50  ;;  %vm2080_vm0 = vcmp.eq.f32.partialorder %v2079_v3, 8.507059e+37 }
0x16b7   :  { %2051 = vrot.lane.b32.xlu2 %v2048_v31, %s3432_s25  ;;  %v2049_v35 = vmul.f32 %v2048_v31, %v4308_v60 }
0x16b9   :  { %v3301_v55 = vpop.eup %3300 }
0x16ba   :  { %v2071_v43 = vmul.f32 %v3301_v55, %v2069_v15  ;;  %vm2076_vm13 = vweird.f32 %v3301_v55 }
0x16bb   :  { %vm2077_vm15 = vmor %vm2075_vm14, %vm2076_vm13 }
0x16bc   :  { %v2072_v59 = vsub.f32 1.0, %v2071_v43 }
0x16be   :  { %v2073_v9 = vmul.f32 %v3301_v55, %v2072_v59 }
0x16c0   :  { %v2074_v18 = vadd.f32 %v3301_v55, %v2073_v9 }
0x16c2   :  { %v2078_v62 = vsel %vm2077_vm15, %v3301_v55, %v2074_v18 }
0x16c3   :  { %v2083_v58 = vsel %vm2080_vm0, %v2082_v46, %v2078_v62 }
0x16c4   :  { %v2085_v56 = vmul.f32 %v2083_v58, %v3774_v17 }
0x16c6   :  { %v2086_v48 = vadd.f32 %v2085_v56, %v3778_v21 }
0x16c8   :  { %2089 = vrot.lane.b32.xlu0 %v2086_v48, %s3432_s25  ;;  %v2087_v28 = vmul.f32 %v2086_v48, %v4313_v57 }
0x1711   :  { %v2052_v52 = vpop.permute.xlu2 %2051 }
0x1712   :  { %v2054_v63 = vmul.f32 %v2052_v52, %v2048_v31 }
0x1714   :  { %2056 = vrot.lane.b32.xlu1 %v2054_v63, %s3432_s25 }
0x173a   :  { %v2090_v7 = vpop.permute.xlu0 %2089 }
0x173b   :  { %v2092_v34 = vmul.f32 %v2090_v7, %v2086_v48 }
0x173d   :  { %2094 = vrot.lane.b32.xlu2 %v2092_v34, %s3432_s25 }
0x1786   :  { %v2057_v1 = vpop.permute.xlu1 %2056 }
0x1787   :  { %v4358_v29 = vadd.f32 %v2057_v1, %v2049_v35 }
0x1789   :  { %3302 = vtanh.f32 %v4358_v29 }
0x178f   :  { %v3303_v14 = vpop.eup %3302 }
0x1790   :  { %2062 = vrot.lane.b32.xlu0 %v3303_v14, %s3432_s25 }
0x1797   :  { %v2095_v13 = vpop.permute.xlu2 %2094 }
0x1798   :  { %v4363_v30 = vadd.f32 %v2095_v13, %v2087_v28 }
0x179a   :  { %3304 = vtanh.f32 %v4363_v30 }
0x17a0   :  { %v3305_v49 = vpop.eup %3304 }
0x17a1   :  { %2100 = vrot.lane.b32.xlu1 %v3305_v49, %s3432_s25 }
0x1802   :  { %v2063_v38 = vpop.permute.xlu0 %2062 }
0x1803   :  { %v2065_v60 = vmul.f32 %v2063_v38, %v2048_v31 }
0x1805   :  { %2106 = vrot.lane.b32.xlu2 %v2065_v60, %s3433_s15 }
0x1813   :  { %v2101_v20 = vpop.permute.xlu1 %2100 }
0x1814   :  { %v2103_v10 = vmul.f32 %v2101_v20, %v2086_v48 }
0x1816   :  { %2133 = vrot.lane.b32.xlu0 %v2103_v10, %s3434_s20 }
0x185f   :  { %v2107_v5 = vpop.permute.xlu2 %2106 }
0x1860   :  { %3154 = vmatmul.msk.f32.vlgmr.msrb.gmra.mxu3 %vm855_vm8, %v2107_v5 }
0x1861   :  { %2518 = vmatpush.msrb.mxu3 %v4273_v53 }
0x1863   :  { %2519 = vmatpush.msrb.mxu3 %v4279_v32 }
0x1865   :  { %2520 = vmatpush.msrb.mxu3 %v4325_v51 }
0x1867   :  { %2521 = vmatpush.msrb.mxu3 %v4331_v6 }
0x1888   :  { %v2134_v57 = vpop.permute.xlu0 %2133 }
0x1889   :  { %v2136_v24 = vsel %vm855_vm8, %v2107_v5, %v2134_v57 }
0x188a   :  { %3155 = vmatmul.msk.f32.vlgmr.msra.gmra.mxu3 %vm948_vm9, %v2136_v24 }
0x188b   :  { %2676 = vmatpush.msra.mxu3 %v4154_v11 }
0x188d   :  { %2677 = vmatpush.msra.mxu3 %v4160_v47 }
0x188f   :  { %2678 = vmatpush.msra.mxu3 %v4166_v54 }
0x1891   :  { %2679 = vmatpush.msra.mxu3 %v4172_v16 }
0x1893   :  { %2680 = vmatpush.msra.mxu3 %v4218_v61 }
0x1895   :  { %2681 = vmatpush.msra.mxu3 %v4224_v45 }
0x1897   :  { %2682 = vmatpush.msra.mxu3 %v4230_v22 }
0x1899   :  { %2683 = vmatpush.msra.mxu3 %v4236_v23 }
0x18e3   :  { %v2127_v39 = vpop.f32.mrf.mxu3 }
0x18e4   :  { %v2130_v27 = vadd.f32 %v2127_v39, %v814_v37 }
0x18e6   :  { %v3156_v4 = vmul.f32 -1.442695, %v2130_v27 }
0x18e8   :  { %3306 = vpow2.f32 %v3156_v4 }
0x18ee   :  { %v3307_v0 = vpop.eup %3306 }
0x18ef   :  { %v2163_v15 = vadd.f32 1.0, %v3307_v0 }
0x18f1   :  { %3308 = vrcp.f32 %v2163_v15  ;;  %v2175_v31 = vand.u32 2147483648, %v2163_v15  ;;  %v2173_v43 = vand.u32 2147483647, %v2163_v15  ;;  %vm2169_vm3 = vweird.f32 %v2163_v15 }
0x18f3   :  { %v2176_v40 = vor.u32 1.1754944e-38, %v2175_v31  ;;  %vm2174_vm5 = vcmp.eq.f32.partialorder %v2173_v43, 8.507059e+37 }
0x18f7   :  { %v3309_v8 = vpop.eup %3308 }
0x18f8   :  { %v2165_v12 = vmul.f32 %v3309_v8, %v2163_v15  ;;  %vm2170_vm1 = vweird.f32 %v3309_v8 }
0x18f9   :  { %vm2171_vm4 = vmor %vm2169_vm3, %vm2170_vm1 }
0x18fa   :  { %v2166_v26 = vsub.f32 1.0, %v2165_v12  ;;  %v642_v12 = vadd.f32 %v3816_v41, %v3820_v44 }
0x18fc   :  { %v2167_v55 = vmul.f32 %v3309_v8, %v2166_v26  ;;  %v4614_v26 = vld [vmem:[#allocation8_spill] sm:$0xff] }
0x18fd   :  { %v797_v31 = vadd.f32 %v4614_v26, %v642_v12 }
0x18fe   :  { %v2168_v36 = vadd.f32 %v3309_v8, %v2167_v55 }
0x1900   :  { %v2172_v42 = vsel %vm2171_vm4, %v3309_v8, %v2168_v36 }
0x1901   :  { %v2177_v19 = vsel %vm2174_vm5, %v2176_v40, %v2172_v42 }
0x1902   :  { %v2179_v59 = vmul.f32 %v2177_v19, %v3774_v17 }
0x1904   :  { %v2180_v50 = vadd.f32 %v2179_v59, %v3778_v21 }
0x1906   :  { %2183 = vrot.lane.b32.xlu1 %v2180_v50, %s3432_s25  ;;  %v2181_v10 = vmul.f32 %v2180_v50, %v4358_v29 }
0x190d   :  { %v2157_v9 = vpop.f32.mrf.mxu3 }
0x190e   :  { %v2158_v3 = vadd.f32 %v4249_v2, %v2157_v9 }
0x1910   :  { %v3157_v18 = vmul.f32 -1.442695, %v2158_v3 }
0x1912   :  { %3310 = vpow2.f32 %v3157_v18 }
0x1918   :  { %v3311_v46 = vpop.eup %3310 }
0x1919   :  { %v2201_v62 = vadd.f32 1.0, %v3311_v46 }
0x191b   :  { %3312 = vrcp.f32 %v2201_v62  ;;  %v2213_v52 = vand.u32 2147483648, %v2201_v62  ;;  %v2211_v7 = vand.u32 2147483647, %v2201_v62  ;;  %vm2207_vm7 = vweird.f32 %v2201_v62 }
0x191d   :  { %v2214_v35 = vor.u32 1.1754944e-38, %v2213_v52  ;;  %vm2212_vm11 = vcmp.eq.f32.partialorder %v2211_v7, 8.507059e+37 }
0x1921   :  { %v3313_v58 = vpop.eup %3312 }
0x1922   :  { %v2203_v56 = vmul.f32 %v3313_v58, %v2201_v62  ;;  %vm2208_vm6 = vweird.f32 %v3313_v58 }
0x1923   :  { %vm2209_vm10 = vmor %vm2207_vm7, %vm2208_vm6 }
0x1924   :  { %v2204_v48 = vsub.f32 1.0, %v2203_v56 }
0x1926   :  { %v2205_v63 = vmul.f32 %v3313_v58, %v2204_v48 }
0x1928   :  { %v2206_v34 = vadd.f32 %v3313_v58, %v2205_v63 }
0x192a   :  { %v2210_v1 = vsel %vm2209_vm10, %v3313_v58, %v2206_v34 }
0x192b   :  { %v2215_v14 = vsel %vm2212_vm11, %v2214_v35, %v2210_v1 }
0x192c   :  { %v2217_v28 = vmul.f32 %v2215_v14, %v3774_v17 }
0x192e   :  { %v2218_v13 = vadd.f32 %v2217_v28, %v3778_v21 }
0x1930   :  { %2221 = vrot.lane.b32.xlu2 %v2218_v13, %s3432_s25  ;;  %v2219_v25 = vmul.f32 %v2218_v13, %v4363_v30 }
0x1978   :  { %v2184_v49 = vpop.permute.xlu1 %2183 }
0x1979   :  { %v2186_v38 = vmul.f32 %v2184_v49, %v2180_v50 }
0x197b   :  { %2188 = vrot.lane.b32.xlu0 %v2186_v38, %s3432_s25 }
0x198a   :  { %v2222_v60 = vpop.permute.xlu2 %2221 }
0x198b   :  { %v2224_v20 = vmul.f32 %v2222_v60, %v2218_v13 }
0x198d   :  { %2226 = vrot.lane.b32.xlu1 %v2224_v20, %s3432_s25 }
0x19ed   :  { %v2189_v5 = vpop.permute.xlu0 %2188 }
0x19ee   :  { %v4398_v57 = vadd.f32 %v2189_v5, %v2181_v10 }
0x19f0   :  { %3314 = vtanh.f32 %v4398_v57 }
0x19f6   :  { %v3315_v24 = vpop.eup %3314 }
0x19f7   :  { %2194 = vrot.lane.b32.xlu2 %v3315_v24, %s3432_s25 }
0x19ff   :  { %v2227_v33 = vpop.permute.xlu1 %2226 }
0x1a00   :  { %v4403_v37 = vadd.f32 %v2227_v33, %v2219_v25 }
0x1a02   :  { %3316 = vtanh.f32 %v4403_v37 }
0x1a08   :  { %v3317_v39 = vpop.eup %3316 }
0x1a09   :  { %2232 = vrot.lane.b32.xlu0 %v3317_v39, %s3432_s25 }
0x1a51   :  { %v2195_v27 = vpop.permute.xlu2 %2194 }
0x1a52   :  { %v2197_v29 = vmul.f32 %v2195_v27, %v2180_v50 }
0x1a54   :  { %2238 = vrot.lane.b32.xlu1 %v2197_v29, %s3433_s15 }
0x1a7b   :  { %v2233_v4 = vpop.permute.xlu0 %2232 }
0x1a7c   :  { %v2235_v0 = vmul.f32 %v2233_v4, %v2218_v13 }
0x1a7e   :  { %2265 = vrot.lane.b32.xlu2 %v2235_v0, %s3434_s20 }
0x1ac6   :  { %v2239_v15 = vpop.permute.xlu1 %2238 }
0x1ac7   :  { %3158 = vmatmul.msk.f32.vlgmr.msrb.gmra.mxu2 %vm855_vm8, %v2239_v15 }
0x1ac8   :  { %2808 = vmatpush.msrb.mxu2 %v4154_v11 }
0x1aca   :  { %2809 = vmatpush.msrb.mxu2 %v4160_v47 }
0x1acc   :  { %2810 = vmatpush.msrb.mxu2 %v4166_v54 }
0x1ace   :  { %2811 = vmatpush.msrb.mxu2 %v4172_v16 }
0x1ad0   :  { %2812 = vmatpush.msrb.mxu2 %v4218_v61 }
0x1ad2   :  { %2813 = vmatpush.msrb.mxu2 %v4224_v45 }
0x1ad4   :  { %2814 = vmatpush.msrb.mxu2 %v4230_v22 }
0x1ad6   :  { %2815 = vmatpush.msrb.mxu2 %v4236_v23 }
0x1ad8   :  { %v2266_v30 = vpop.permute.xlu2 %2265 }
0x1ad9   :  { %v2268_v8 = vsel %vm855_vm8, %v2239_v15, %v2266_v30 }
0x1ada   :  { %3159 = vmatmul.msk.f32.vlgmr.msra.gmra.mxu0 %vm948_vm9, %v2268_v8 }
0x1adb   :  { %2916 = vmatpush.msra.mxu0 %v4154_v11  ;;  %v4434_v11 = vld [vmem:[%s4604_s3 + $0x78] ss:$0 sm:$0xff] }
0x1add   :  { %2917 = vmatpush.msra.mxu0 %v4160_v47  ;;  %v815_v47 = vadd.f32 %v4434_v11, %v797_v31  ;;  %v4467_v31 = vpop.f32.mrf.mxu1 }
0x1adf   :  { %2918 = vmatpush.msra.mxu0 %v4166_v54 }
0x1ae1   :  { %2919 = vmatpush.msra.mxu0 %v4172_v16 }
0x1ae3   :  { %2920 = vmatpush.msra.mxu0 %v4218_v61 }
0x1ae5   :  { %2921 = vmatpush.msra.mxu0 %v4224_v45  ;;  %v4437_v45 = vpop.f32.mrf.mxu0 }
0x1ae7   :  { %2922 = vmatpush.msra.mxu0 %v4230_v22 }
0x1ae9   :  { %2923 = vmatpush.msra.mxu0 %v4236_v23 }
0x1b4a   :  { %v2259_v54 = vpop.f32.mrf.mxu2 }
0x1b4b   :  { %v2262_v16 = vadd.f32 %v2259_v54, %v815_v47  ;;  %v4615_v47 = vld [vmem:[#allocation9_spill] sm:$0xff]  ;;  %v4616_v54 = vld [vmem:[#allocation10_spill] sm:$0xff] }
0x1b4d   :  { %v3160_v61 = vmul.f32 -1.442695, %v2262_v16  ;;  %v798_v16 = vadd.f32 %v4616_v54, %v4615_v47 }
0x1b4f   :  { %3318 = vpow2.f32 %v3160_v61  ;;  %v816_v61 = vadd.f32 %v4434_v11, %v798_v16 }
0x1b55   :  { %v3319_v22 = vpop.eup %3318 }
0x1b56   :  { %v2295_v23 = vadd.f32 1.0, %v3319_v22 }
0x1b57   :  { %v2289_v55 = vpop.f32.mrf.mxu0 }
0x1b58   :  { %3320 = vrcp.f32 %v2295_v23  ;;  %v2290_v41 = vadd.f32 %v4249_v2, %v2289_v55  ;;  %v2307_v19 = vand.u32 2147483648, %v2295_v23  ;;  %v2305_v9 = vand.u32 2147483647, %v2295_v23 }
0x1b59   :  { %vm2301_vm13 = vweird.f32 %v2295_v23 }
0x1b5a   :  { %v3161_v44 = vmul.f32 -1.442695, %v2290_v41  ;;  %v2308_v18 = vor.u32 1.1754944e-38, %v2307_v19  ;;  %vm2306_vm15 = vcmp.eq.f32.partialorder %v2305_v9, 8.507059e+37 }
0x1b5c   :  { %3322 = vpow2.f32 %v3161_v44 }
0x1b5e   :  { %v3321_v43 = vpop.eup %3320 }
0x1b5f   :  { %v2297_v36 = vmul.f32 %v3321_v43, %v2295_v23  ;;  %vm2302_vm12 = vweird.f32 %v3321_v43 }
0x1b60   :  { %vm2303_vm14 = vmor %vm2301_vm13, %vm2302_vm12 }
0x1b61   :  { %v2298_v40 = vsub.f32 1.0, %v2297_v36 }
0x1b62   :  { %v3323_v42 = vpop.eup %3322 }
0x1b63   :  { %v2299_v59 = vmul.f32 %v3321_v43, %v2298_v40  ;;  %v2333_v50 = vadd.f32 1.0, %v3323_v42 }
0x1b65   :  { %3324 = vrcp.f32 %v2333_v50  ;;  %v2300_v3 = vadd.f32 %v3321_v43, %v2299_v59  ;;  %v2345_v7 = vand.u32 2147483648, %v2333_v50  ;;  %v2343_v35 = vand.u32 2147483647, %v2333_v50 }
0x1b66   :  { %vm2339_vm1 = vweird.f32 %v2333_v50 }
0x1b67   :  { %v2304_v46 = vsel %vm2303_vm14, %v3321_v43, %v2300_v3  ;;  %v2346_v14 = vor.u32 1.1754944e-38, %v2345_v7  ;;  %vm2344_vm4 = vcmp.eq.f32.partialorder %v2343_v35, 8.507059e+37 }
0x1b68   :  { %v2309_v62 = vsel %vm2306_vm15, %v2308_v18, %v2304_v46 }
0x1b69   :  { %v2311_v58 = vmul.f32 %v2309_v62, %v3774_v17 }
0x1b6b   :  { %v3325_v56 = vpop.eup %3324  ;;  %v2312_v48 = vadd.f32 %v2311_v58, %v3778_v21 }
0x1b6c   :  { %v2335_v52 = vmul.f32 %v3325_v56, %v2333_v50  ;;  %vm2340_vm0 = vweird.f32 %v3325_v56 }
0x1b6d   :  { %2315 = vrot.lane.b32.xlu0 %v2312_v48, %s3432_s25  ;;  %vm2341_vm3 = vmor %vm2339_vm1, %vm2340_vm0  ;;  %v2313_v24 = vmul.f32 %v2312_v48, %v4398_v57 }
0x1b6e   :  { %v2336_v63 = vsub.f32 1.0, %v2335_v52 }
0x1b70   :  { %v2337_v34 = vmul.f32 %v3325_v56, %v2336_v63 }
0x1b72   :  { %v2338_v1 = vadd.f32 %v3325_v56, %v2337_v34 }
0x1b74   :  { %v2342_v28 = vsel %vm2341_vm3, %v3325_v56, %v2338_v1 }
0x1b75   :  { %v2347_v13 = vsel %vm2344_vm4, %v2346_v14, %v2342_v28 }
0x1b76   :  { %v2349_v49 = vmul.f32 %v2347_v13, %v3774_v17 }
0x1b78   :  { %v2350_v38 = vadd.f32 %v2349_v49, %v3778_v21 }
0x1b7a   :  { %2353 = vrot.lane.b32.xlu1 %v2350_v38, %s3432_s25  ;;  %v2351_v27 = vmul.f32 %v2350_v38, %v4403_v37 }
0x1bdf   :  { %v2316_v60 = vpop.permute.xlu0 %2315 }
0x1be0   :  { %v2318_v20 = vmul.f32 %v2316_v60, %v2312_v48 }
0x1be2   :  { %2320 = vrot.lane.b32.xlu2 %v2318_v20, %s3432_s25 }
0x1bec   :  { %v2354_v10 = vpop.permute.xlu1 %2353 }
0x1bed   :  { %v2356_v5 = vmul.f32 %v2354_v10, %v2350_v38 }
0x1bef   :  { %2358 = vrot.lane.b32.xlu0 %v2356_v5, %s3432_s25 }
0x1c3c   :  { %v2321_v25 = vpop.permute.xlu2 %2320 }
0x1c3d   :  { %v4449_v33 = vadd.f32 %v2321_v25, %v2313_v24 }
0x1c3f   :  { %3326 = vtanh.f32 %v4449_v33 }
0x1c45   :  { %v3327_v39 = vpop.eup %3326 }
0x1c46   :  { %2326 = vrot.lane.b32.xlu1 %v3327_v39, %s3432_s25 }
0x1c61   :  { %v2359_v29 = vpop.permute.xlu0 %2358 }
0x1c62   :  { %v4454_v4 = vadd.f32 %v2359_v29, %v2351_v27 }
0x1c64   :  { %3328 = vtanh.f32 %v4454_v4 }
0x1c6a   :  { %v3329_v0 = vpop.eup %3328 }
0x1c6b   :  { %2364 = vrot.lane.b32.xlu2 %v3329_v0, %s3432_s25 }
0x1cb8   :  { %v2327_v15 = vpop.permute.xlu1 %2326 }
0x1cb9   :  { %v2329_v57 = vmul.f32 %v2327_v15, %v2312_v48 }
0x1cbb   :  { %2370 = vrot.lane.b32.xlu0 %v2329_v57, %s3433_s15 }
0x1cc5   :  { %v2365_v30 = vpop.permute.xlu2 %2364 }
0x1cc6   :  { %v2367_v8 = vmul.f32 %v2365_v30, %v2350_v38 }
0x1cc8   :  { %2397 = vrot.lane.b32.xlu1 %v2367_v8, %s3434_s20 }
0x1d2d   :  { %v2371_v12 = vpop.permute.xlu0 %2370 }
0x1d2e   :  { %3162 = vmatmul.msk.f32.vlgmr.msra.gmra.mxu1 %vm855_vm8, %v2371_v12 }
0x1d2f   :  { %2782 = vmatpush.msra.mxu1 %v4273_v53 }
0x1d31   :  { %2783 = vmatpush.msra.mxu1 %v4279_v32 }
0x1d33   :  { %2784 = vmatpush.msra.mxu1 %v4325_v51 }
0x1d35   :  { %2785 = vmatpush.msra.mxu1 %v4331_v6 }
0x1d3a   :  { %v2398_v37 = vpop.permute.xlu1 %2397 }
0x1d3b   :  { %v2400_v26 = vsel %vm855_vm8, %v2371_v12, %v2398_v37  ;;  %v4617_v37 = vld [vmem:[#allocation11_spill] sm:$0xff] }
0x1d3c   :  { %3163 = vmatmul.msk.f32.vlgmr.msra.gmra.mxu2 %vm948_vm9, %v2400_v26  ;;  %v817_v26 = vadd.f32 %v4434_v11, %v4617_v37 }
0x1dab   :  { %v2391_v22 = vpop.f32.mrf.mxu1 }
0x1dac   :  { %v2394_v53 = vadd.f32 %v2391_v22, %v816_v61 }
0x1dae   :  { %v3164_v23 = vmul.f32 -1.442695, %v2394_v53 }
0x1db0   :  { %3330 = vpow2.f32 %v3164_v23 }
0x1db6   :  { %v3331_v32 = vpop.eup %3330 }
0x1db7   :  { %v2427_v51 = vadd.f32 1.0, %v3331_v32 }
0x1db9   :  { %3332 = vrcp.f32 %v2427_v51  ;;  %v2439_v40 = vand.u32 2147483648, %v2427_v51  ;;  %v2437_v19 = vand.u32 2147483647, %v2427_v51  ;;  %vm2433_vm6 = vweird.f32 %v2427_v51 }
0x1dbb   :  { %v2440_v50 = vor.u32 1.1754944e-38, %v2439_v40  ;;  %vm2438_vm10 = vcmp.eq.f32.partialorder %v2437_v19, 8.507059e+37 }
0x1dbf   :  { %v3333_v6 = vpop.eup %3332  ;;  %v2421_v55 = vpop.f32.mrf.mxu2 }
0x1dc0   :  { %v2429_v41 = vmul.f32 %v3333_v6, %v2427_v51  ;;  %v2422_v44 = vadd.f32 %v4249_v2, %v2421_v55  ;;  %vm2434_vm5 = vweird.f32 %v3333_v6 }
0x1dc1   :  { %vm2435_vm7 = vmor %vm2433_vm6, %vm2434_vm5 }
0x1dc2   :  { %v2430_v43 = vsub.f32 1.0, %v2429_v41  ;;  %v3165_v36 = vmul.f32 -1.442695, %v2422_v44 }
0x1dc4   :  { %v2431_v42 = vmul.f32 %v3333_v6, %v2430_v43  ;;  %3334 = vpow2.f32 %v3165_v36 }
0x1dc6   :  { %v2432_v59 = vadd.f32 %v3333_v6, %v2431_v42 }
0x1dc8   :  { %v2436_v9 = vsel %vm2435_vm7, %v3333_v6, %v2432_v59  ;;  %v4504_v59 = vld [vmem:[%s4604_s3 + $0x79] ss:$0 sm:$0xff] }
0x1dc9   :  { %v2441_v3 = vsel %vm2438_vm10, %v2440_v50, %v2436_v9 }
0x1dca   :  { %v3335_v18 = vpop.eup %3334  ;;  %v2443_v46 = vmul.f32 %v2441_v3, %v3774_v17 }
0x1dcb   :  { %v2465_v62 = vadd.f32 1.0, %v3335_v18 }
0x1dcc   :  { %v2444_v2 = vadd.f32 %v2443_v46, %v3778_v21 }
0x1dcd   :  { %3336 = vrcp.f32 %v2465_v62  ;;  %v2477_v52 = vand.u32 2147483648, %v2465_v62  ;;  %v2475_v7 = vand.u32 2147483647, %v2465_v62  ;;  %vm2471_vm12 = vweird.f32 %v2465_v62 }
0x1dce   :  { %2447 = vrot.lane.b32.xlu2 %v2444_v2, %s3432_s25  ;;  %v2445_v10 = vmul.f32 %v2444_v2, %v4449_v33 }
0x1dcf   :  { %v2478_v35 = vor.u32 1.1754944e-38, %v2477_v52  ;;  %vm2476_vm14 = vcmp.eq.f32.partialorder %v2475_v7, 8.507059e+37 }
0x1dd3   :  { %v3337_v58 = vpop.eup %3336 }
0x1dd4   :  { %v2467_v56 = vmul.f32 %v3337_v58, %v2465_v62  ;;  %vm2472_vm11 = vweird.f32 %v3337_v58 }
0x1dd5   :  { %vm2473_vm13 = vmor %vm2471_vm12, %vm2472_vm11 }
0x1dd6   :  { %v2468_v48 = vsub.f32 1.0, %v2467_v56 }
0x1dd8   :  { %v2469_v63 = vmul.f32 %v3337_v58, %v2468_v48 }
0x1dda   :  { %v2470_v34 = vadd.f32 %v3337_v58, %v2469_v63 }
0x1ddc   :  { %v2474_v1 = vsel %vm2473_vm13, %v3337_v58, %v2470_v34 }
0x1ddd   :  { %v2479_v14 = vsel %vm2476_vm14, %v2478_v35, %v2474_v1 }
0x1dde   :  { %v2481_v28 = vmul.f32 %v2479_v14, %v3774_v17 }
0x1de0   :  { %v2482_v13 = vadd.f32 %v2481_v28, %v3778_v21 }
0x1de2   :  { %2485 = vrot.lane.b32.xlu0 %v2482_v13, %s3432_s25  ;;  %v2483_v39 = vmul.f32 %v2482_v13, %v4454_v4 }
0x1e28   :  { %v2448_v49 = vpop.permute.xlu2 %2447 }
0x1e29   :  { %v2450_v38 = vmul.f32 %v2448_v49, %v2444_v2 }
0x1e2b   :  { %2452 = vrot.lane.b32.xlu1 %v2450_v38, %s3432_s25 }
0x1e54   :  { %v2486_v60 = vpop.permute.xlu0 %2485 }
0x1e55   :  { %v2488_v20 = vmul.f32 %v2486_v60, %v2482_v13 }
0x1e57   :  { %2490 = vrot.lane.b32.xlu2 %v2488_v20, %s3432_s25 }
0x1e9d   :  { %v2453_v5 = vpop.permute.xlu1 %2452 }
0x1e9e   :  { %v4482_v24 = vadd.f32 %v2453_v5, %v2445_v10 }
0x1ea0   :  { %3338 = vtanh.f32 %v4482_v24 }
0x1ea6   :  { %v3339_v25 = vpop.eup %3338 }
0x1ea7   :  { %2458 = vrot.lane.b32.xlu0 %v3339_v25, %s3432_s25 }
0x1eb1   :  { %v2491_v27 = vpop.permute.xlu2 %2490 }
0x1eb2   :  { %v4487_v29 = vadd.f32 %v2491_v27, %v2483_v39 }
0x1eb4   :  { %3340 = vtanh.f32 %v4487_v29 }
0x1eba   :  { %v3341_v0 = vpop.eup %3340 }
0x1ebb   :  { %2496 = vrot.lane.b32.xlu1 %v3341_v0, %s3432_s25 }
0x1f19   :  { %v2459_v15 = vpop.permute.xlu0 %2458 }
0x1f1a   :  { %v2461_v33 = vmul.f32 %v2459_v15, %v2444_v2 }
0x1f1c   :  { %2502 = vrot.lane.b32.xlu2 %v2461_v33, %s3433_s15 }
0x1f2d   :  { %v2497_v57 = vpop.permute.xlu1 %2496 }
0x1f2e   :  { %v2499_v30 = vmul.f32 %v2497_v57, %v2482_v13 }
0x1f30   :  { %2529 = vrot.lane.b32.xlu0 %v2499_v30, %s3434_s20 }
0x1f76   :  { %v2503_v8 = vpop.permute.xlu2 %2502 }
0x1f77   :  { %3166 = vmatmul.msk.f32.vlgmr.msrb.gmra.mxu3 %vm855_vm8, %v2503_v8 }
0x1fa2   :  { %v2530_v4 = vpop.permute.xlu0 %2529 }
0x1fa3   :  { %v2532_v12 = vsel %vm855_vm8, %v2503_v8, %v2530_v4  ;;  %v4618_v8 = vld [vmem:[#allocation12_spill] sm:$0xff] }
0x1fa4   :  { %3167 = vmatmul.msk.f32.vlgmr.msrb.gmra.mxu0 %vm948_vm9, %v2532_v12  ;;  %v818_v4 = vadd.f32 %v4434_v11, %v4618_v8 }
0x1ffa   :  { %v2523_v47 = vpop.f32.mrf.mxu3 }
0x1ffb   :  { %v2526_v54 = vadd.f32 %v2523_v47, %v817_v26 }
0x1ffd   :  { %v3168_v16 = vmul.f32 -1.442695, %v2526_v54 }
0x1fff   :  { %3342 = vpow2.f32 %v3168_v16 }
0x2005   :  { %v3343_v61 = vpop.eup %3342 }
0x2006   :  { %v2559_v22 = vadd.f32 1.0, %v3343_v61 }
0x2008   :  { %3344 = vrcp.f32 %v2559_v22  ;;  %v2571_v51 = vand.u32 2147483648, %v2559_v22  ;;  %v2569_v55 = vand.u32 2147483647, %v2559_v22  ;;  %vm2565_vm0 = vweird.f32 %v2559_v22 }
0x200a   :  { %v2572_v44 = vor.u32 1.1754944e-38, %v2571_v51  ;;  %vm2570_vm3 = vcmp.eq.f32.partialorder %v2569_v55, 8.507059e+37 }
0x200e   :  { %v3345_v53 = vpop.eup %3344 }
0x200f   :  { %v2561_v23 = vmul.f32 %v3345_v53, %v2559_v22  ;;  %vm2566_vm15 = vweird.f32 %v3345_v53 }
0x2010   :  { %vm2567_vm1 = vmor %vm2565_vm0, %vm2566_vm15 }
0x2011   :  { %v2562_v32 = vsub.f32 1.0, %v2561_v23 }
0x2013   :  { %v2563_v6 = vmul.f32 %v3345_v53, %v2562_v32 }
0x2015   :  { %v2564_v41 = vadd.f32 %v3345_v53, %v2563_v6 }
0x2017   :  { %v2568_v43 = vsel %vm2567_vm1, %v3345_v53, %v2564_v41 }
0x2018   :  { %v2573_v36 = vsel %vm2570_vm3, %v2572_v44, %v2568_v43 }
0x2019   :  { %v2575_v40 = vmul.f32 %v2573_v36, %v3774_v17 }
0x201b   :  { %v2576_v42 = vadd.f32 %v2575_v40, %v3778_v21 }
0x201d   :  { %2579 = vrot.lane.b32.xlu1 %v2576_v42, %s3432_s25  ;;  %v2577_v38 = vmul.f32 %v2576_v42, %v4482_v24 }
0x2021   :  { %v2553_v19 = vpop.f32.mrf.mxu0 }
0x2022   :  { %v2554_v50 = vadd.f32 %v4504_v59, %v2553_v19 }
0x2024   :  { %v3169_v9 = vmul.f32 -1.442695, %v2554_v50 }
0x2026   :  { %3346 = vpow2.f32 %v3169_v9 }
0x202c   :  { %v3347_v3 = vpop.eup %3346 }
0x202d   :  { %v2597_v18 = vadd.f32 1.0, %v3347_v3 }
0x202f   :  { %3348 = vrcp.f32 %v2597_v18  ;;  %v2609_v58 = vand.u32 2147483648, %v2597_v18  ;;  %v2607_v48 = vand.u32 2147483647, %v2597_v18  ;;  %vm2603_vm5 = vweird.f32 %v2597_v18 }
0x2031   :  { %v2610_v63 = vor.u32 1.1754944e-38, %v2609_v58  ;;  %vm2608_vm7 = vcmp.eq.f32.partialorder %v2607_v48, 8.507059e+37 }
0x2035   :  { %v3349_v46 = vpop.eup %3348 }
0x2036   :  { %v2599_v62 = vmul.f32 %v3349_v46, %v2597_v18  ;;  %vm2604_vm4 = vweird.f32 %v3349_v46 }
0x2037   :  { %vm2605_vm6 = vmor %vm2603_vm5, %vm2604_vm4 }
0x2038   :  { %v2600_v2 = vsub.f32 1.0, %v2599_v62 }
0x203a   :  { %v2601_v56 = vmul.f32 %v3349_v46, %v2600_v2 }
0x203c   :  { %v2602_v52 = vadd.f32 %v3349_v46, %v2601_v56 }
0x203e   :  { %v2606_v7 = vsel %vm2605_vm6, %v3349_v46, %v2602_v52 }
0x203f   :  { %v2611_v34 = vsel %vm2608_vm7, %v2610_v63, %v2606_v7 }
0x2040   :  { %v2613_v35 = vmul.f32 %v2611_v34, %v3774_v17 }
0x2042   :  { %v2614_v1 = vadd.f32 %v2613_v35, %v3778_v21 }
0x2044   :  { %2617 = vrot.lane.b32.xlu2 %v2614_v1, %s3432_s25  ;;  %v2615_v5 = vmul.f32 %v2614_v1, %v4487_v29 }
0x208f   :  { %v2580_v14 = vpop.permute.xlu1 %2579 }
0x2090   :  { %v2582_v28 = vmul.f32 %v2580_v14, %v2576_v42 }
0x2092   :  { %2584 = vrot.lane.b32.xlu0 %v2582_v28, %s3432_s25 }
0x209e   :  { %v2618_v13 = vpop.permute.xlu2 %2617 }
0x209f   :  { %v2620_v49 = vmul.f32 %v2618_v13, %v2614_v1 }
0x20a1   :  { %2622 = vrot.lane.b32.xlu1 %v2620_v49, %s3432_s25 }
0x2104   :  { %v2585_v60 = vpop.permute.xlu0 %2584 }
0x2105   :  { %v4513_v20 = vadd.f32 %v2585_v60, %v2577_v38 }
0x2107   :  { %3350 = vtanh.f32 %v4513_v20 }
0x210d   :  { %v3351_v10 = vpop.eup %3350 }
0x210e   :  { %2590 = vrot.lane.b32.xlu2 %v3351_v10, %s3432_s25 }
0x2113   :  { %v2623_v25 = vpop.permute.xlu1 %2622 }
0x2114   :  { %v4518_v39 = vadd.f32 %v2623_v25, %v2615_v5 }
0x2116   :  { %3352 = vtanh.f32 %v4518_v39 }
0x211c   :  { %v3353_v27 = vpop.eup %3352 }
0x211d   :  { %2628 = vrot.lane.b32.xlu0 %v3353_v27, %s3432_s25 }
0x2168   :  { %v2591_v0 = vpop.permute.xlu2 %2590 }
0x2169   :  { %v2593_v24 = vmul.f32 %v2591_v0, %v2576_v42 }
0x216b   :  { %2634 = vrot.lane.b32.xlu1 %v2593_v24, %s3433_s15 }
0x218f   :  { %v2629_v15 = vpop.permute.xlu0 %2628 }
0x2190   :  { %v2631_v33 = vmul.f32 %v2629_v15, %v2614_v1 }
0x2192   :  { %2661 = vrot.lane.b32.xlu2 %v2631_v33, %s3434_s20 }
0x21dd   :  { %v2635_v57 = vpop.permute.xlu1 %2634 }
0x21de   :  { %3170 = vmatmul.msk.f32.vlgmr.msrb.gmra.mxu1 %vm855_vm8, %v2635_v57 }
0x21ec   :  { %v2662_v29 = vpop.permute.xlu2 %2661 }
0x21ed   :  { %v2664_v30 = vsel %vm855_vm8, %v2635_v57, %v2662_v29  ;;  %v4619_v57 = vld [vmem:[#allocation13_spill] sm:$0xff] }
0x21ee   :  { %3171 = vmatmul.msk.f32.vlgmr.msra.gmra.mxu3 %vm948_vm9, %v2664_v30  ;;  %v654_v29 = vadd.f32 %v4437_v45, %v4619_v57 }
0x21f0   :  { %v801_v30 = vadd.f32 %v4467_v31, %v654_v29 }
0x21f2   :  { %v819_v8 = vadd.f32 %v4434_v11, %v801_v30 }
0x225b   :  { %v2655_v12 = vpop.f32.mrf.mxu1 }
0x225c   :  { %v2658_v37 = vadd.f32 %v2655_v12, %v818_v4 }
0x225e   :  { %v3172_v26 = vmul.f32 -1.442695, %v2658_v37 }
0x2260   :  { %3354 = vpow2.f32 %v3172_v26 }
0x2266   :  { %v3355_v47 = vpop.eup %3354 }
0x2267   :  { %v2691_v54 = vadd.f32 1.0, %v3355_v47 }
0x2269   :  { %3356 = vrcp.f32 %v2691_v54  ;;  %v2703_v32 = vand.u32 2147483648, %v2691_v54  ;;  %v2701_v55 = vand.u32 2147483647, %v2691_v54  ;;  %vm2697_vm11 = vweird.f32 %v2691_v54 }
0x226b   :  { %v2704_v44 = vor.u32 1.1754944e-38, %v2703_v32  ;;  %vm2702_vm13 = vcmp.eq.f32.partialorder %v2701_v55, 8.507059e+37 }
0x226f   :  { %v3357_v16 = vpop.eup %3356 }
0x2270   :  { %v2693_v61 = vmul.f32 %v3357_v16, %v2691_v54  ;;  %vm2698_vm10 = vweird.f32 %v3357_v16 }
0x2271   :  { %v2685_v22 = vpop.f32.mrf.mxu3  ;;  %vm2699_vm12 = vmor %vm2697_vm11, %vm2698_vm10 }
0x2272   :  { %v2694_v53 = vsub.f32 1.0, %v2693_v61  ;;  %v2686_v23 = vadd.f32 %v4504_v59, %v2685_v22 }
0x2274   :  { %v2695_v51 = vmul.f32 %v3357_v16, %v2694_v53  ;;  %v3173_v6 = vmul.f32 -1.442695, %v2686_v23 }
0x2276   :  { %3358 = vpow2.f32 %v3173_v6  ;;  %v2696_v41 = vadd.f32 %v3357_v16, %v2695_v51 }
0x2278   :  { %v2700_v43 = vsel %vm2699_vm12, %v3357_v16, %v2696_v41 }
0x2279   :  { %v2705_v36 = vsel %vm2702_vm13, %v2704_v44, %v2700_v43 }
0x227a   :  { %v2707_v40 = vmul.f32 %v2705_v36, %v3774_v17 }
0x227c   :  { %v3359_v42 = vpop.eup %3358  ;;  %v2708_v19 = vadd.f32 %v2707_v40, %v3778_v21 }
0x227d   :  { %v2729_v50 = vadd.f32 1.0, %v3359_v42 }
0x227e   :  { %2711 = vrot.lane.b32.xlu0 %v2708_v19, %s3432_s25  ;;  %v2709_v28 = vmul.f32 %v2708_v19, %v4513_v20 }
0x227f   :  { %3360 = vrcp.f32 %v2729_v50  ;;  %v2741_v46 = vand.u32 2147483648, %v2729_v50  ;;  %v2739_v2 = vand.u32 2147483647, %v2729_v50  ;;  %vm2735_vm15 = vweird.f32 %v2729_v50 }
0x2281   :  { %v2742_v56 = vor.u32 1.1754944e-38, %v2741_v46  ;;  %vm2740_vm1 = vcmp.eq.f32.partialorder %v2739_v2, 8.507059e+37 }
0x2285   :  { %v3361_v9 = vpop.eup %3360 }
0x2286   :  { %v2731_v3 = vmul.f32 %v3361_v9, %v2729_v50  ;;  %vm2736_vm14 = vweird.f32 %v3361_v9 }
0x2287   :  { %vm2737_vm0 = vmor %vm2735_vm15, %vm2736_vm14 }
0x2288   :  { %v2732_v18 = vsub.f32 1.0, %v2731_v3 }
0x228a   :  { %v2733_v62 = vmul.f32 %v3361_v9, %v2732_v18 }
0x228c   :  { %v2734_v58 = vadd.f32 %v3361_v9, %v2733_v62 }
0x228e   :  { %v2738_v48 = vsel %vm2737_vm0, %v3361_v9, %v2734_v58 }
0x228f   :  { %v2743_v52 = vsel %vm2740_vm1, %v2742_v56, %v2738_v48 }
0x2290   :  { %v2745_v63 = vmul.f32 %v2743_v52, %v3774_v17 }
0x2292   :  { %v2746_v7 = vadd.f32 %v2745_v63, %v3778_v21 }
0x2294   :  { %2749 = vrot.lane.b32.xlu1 %v2746_v7, %s3432_s25  ;;  %v2747_v60 = vmul.f32 %v2746_v7, %v4518_v39 }
0x22f0   :  { %v2712_v34 = vpop.permute.xlu0 %2711 }
0x22f1   :  { %v2714_v35 = vmul.f32 %v2712_v34, %v2708_v19 }
0x22f3   :  { %2716 = vrot.lane.b32.xlu2 %v2714_v35, %s3432_s25 }
0x2306   :  { %v2750_v1 = vpop.permute.xlu1 %2749 }
0x2307   :  { %v2752_v14 = vmul.f32 %v2750_v1, %v2746_v7 }
0x2309   :  { %2754 = vrot.lane.b32.xlu0 %v2752_v14, %s3432_s25 }
0x234d   :  { %v2717_v13 = vpop.permute.xlu2 %2716 }
0x234e   :  { %v4539_v49 = vadd.f32 %v2717_v13, %v2709_v28 }
0x2350   :  { %3362 = vtanh.f32 %v4539_v49 }
0x2356   :  { %v3363_v38 = vpop.eup %3362 }
0x2357   :  { %2722 = vrot.lane.b32.xlu1 %v3363_v38, %s3432_s25 }
0x237b   :  { %v2755_v10 = vpop.permute.xlu0 %2754 }
0x237c   :  { %v4544_v5 = vadd.f32 %v2755_v10, %v2747_v60 }
0x237e   :  { %3364 = vtanh.f32 %v4544_v5 }
0x2384   :  { %v3365_v25 = vpop.eup %3364 }
0x2385   :  { %2760 = vrot.lane.b32.xlu2 %v3365_v25, %s3432_s25 }
0x23c9   :  { %v2723_v27 = vpop.permute.xlu1 %2722 }
0x23ca   :  { %v2725_v20 = vmul.f32 %v2723_v27, %v2708_v19 }
0x23cc   :  { %2766 = vrot.lane.b32.xlu0 %v2725_v20, %s3433_s15 }
0x23df   :  { %v2761_v0 = vpop.permute.xlu2 %2760 }
0x23e0   :  { %v2763_v24 = vmul.f32 %v2761_v0, %v2746_v7 }
0x23e2   :  { %2793 = vrot.lane.b32.xlu1 %v2763_v24, %s3434_s20 }
0x243e   :  { %v2767_v15 = vpop.permute.xlu0 %2766 }
0x243f   :  { %3174 = vmatmul.msk.f32.vlgmr.msra.gmra.mxu1 %vm855_vm8, %v2767_v15 }
0x2454   :  { %v2794_v39 = vpop.permute.xlu1 %2793 }
0x2455   :  { %v2796_v33 = vsel %vm855_vm8, %v2767_v15, %v2794_v39 }
0x2456   :  { %3175 = vmatmul.msk.f32.vlgmr.msrb.gmra.mxu2 %vm948_vm9, %v2796_v33 }
0x24bc   :  { %v2787_v4 = vpop.f32.mrf.mxu1 }
0x24bd   :  { %v2790_v12 = vadd.f32 %v2787_v4, %v819_v8 }
0x24bf   :  { %v3176_v37 = vmul.f32 -1.442695, %v2790_v12 }
0x24c1   :  { %3366 = vpow2.f32 %v3176_v37 }
0x24c7   :  { %v3367_v26 = vpop.eup %3366 }
0x24c8   :  { %v2823_v47 = vadd.f32 1.0, %v3367_v26 }
0x24ca   :  { %3368 = vrcp.f32 %v2823_v47  ;;  %v2835_v22 = vand.u32 2147483648, %v2823_v47  ;;  %v2833_v23 = vand.u32 2147483647, %v2823_v47  ;;  %vm2829_vm4 = vweird.f32 %v2823_v47 }
0x24cc   :  { %v2836_v31 = vor.u32 1.1754944e-38, %v2835_v22  ;;  %vm2834_vm6 = vcmp.eq.f32.partialorder %v2833_v23, 8.507059e+37 }
0x24d0   :  { %v3369_v54 = vpop.eup %3368 }
0x24d1   :  { %v2825_v16 = vmul.f32 %v3369_v54, %v2823_v47  ;;  %vm2830_vm3 = vweird.f32 %v3369_v54 }
0x24d2   :  { %vm2831_vm5 = vmor %vm2829_vm4, %vm2830_vm3 }
0x24d3   :  { %v2826_v61 = vsub.f32 1.0, %v2825_v16 }
0x24d5   :  { %v2827_v53 = vmul.f32 %v3369_v54, %v2826_v61 }
0x24d7   :  { %v2828_v45 = vadd.f32 %v3369_v54, %v2827_v53 }
0x24d9   :  { %v2817_v32 = vpop.f32.mrf.mxu2  ;;  %v2832_v11 = vsel %vm2831_vm5, %v3369_v54, %v2828_v45 }
0x24da   :  { %v2818_v51 = vadd.f32 %v4504_v59, %v2817_v32  ;;  %v2837_v6 = vsel %vm2834_vm6, %v2836_v31, %v2832_v11  ;;  %v2969_v11 = vld [vmem:[%s4605_s4 + $0x18] sm:$0xff] }
0x24db   :  { %v2839_v55 = vmul.f32 %v2837_v6, %v3774_v17  ;;  %2991 = vmatpush.msrb.mxu1 %v2969_v11 }
0x24dc   :  { %v3177_v41 = vmul.f32 -1.442695, %v2818_v51  ;;  %v2966_v51 = vld [vmem:[%s4605_s4] sm:$0xff] }
0x24dd   :  { %v2840_v44 = vadd.f32 %v2839_v55, %v3778_v21 }
0x24de   :  { %3370 = vpow2.f32 %v3177_v41 }
0x24df   :  { %2843 = vrot.lane.b32.xlu2 %v2840_v44, %s3432_s25  ;;  %v2841_v34 = vmul.f32 %v2840_v44, %v4539_v49 }
0x24e4   :  { %v3371_v43 = vpop.eup %3370 }
0x24e5   :  { %v2861_v36 = vadd.f32 1.0, %v3371_v43 }
0x24e7   :  { %3372 = vrcp.f32 %v2861_v36  ;;  %v2873_v50 = vand.u32 2147483648, %v2861_v36  ;;  %v2871_v3 = vand.u32 2147483647, %v2861_v36  ;;  %vm2867_vm10 = vweird.f32 %v2861_v36 }
0x24e9   :  { %v2874_v46 = vor.u32 1.1754944e-38, %v2873_v50  ;;  %vm2872_vm12 = vcmp.eq.f32.partialorder %v2871_v3, 8.507059e+37 }
0x24ed   :  { %v3373_v40 = vpop.eup %3372 }
0x24ee   :  { %v2863_v42 = vmul.f32 %v3373_v40, %v2861_v36  ;;  %vm2868_vm7 = vweird.f32 %v3373_v40 }
0x24ef   :  { %vm2869_vm11 = vmor %vm2867_vm10, %vm2868_vm7 }
0x24f0   :  { %v2864_v19 = vsub.f32 1.0, %v2863_v42 }
0x24f2   :  { %v2865_v9 = vmul.f32 %v3373_v40, %v2864_v19 }
0x24f4   :  { %v2866_v18 = vadd.f32 %v3373_v40, %v2865_v9 }
0x24f6   :  { %v2870_v62 = vsel %vm2869_vm11, %v3373_v40, %v2866_v18 }
0x24f7   :  { %v2875_v2 = vsel %vm2872_vm12, %v2874_v46, %v2870_v62 }
0x24f8   :  { %v2877_v58 = vmul.f32 %v2875_v2, %v3774_v17 }
0x24fa   :  { %v2878_v56 = vadd.f32 %v2877_v58, %v3778_v21 }
0x24fc   :  { %2881 = vrot.lane.b32.xlu0 %v2878_v56, %s3432_s25  ;;  %v2879_v28 = vmul.f32 %v2878_v56, %v4544_v5 }
0x2539   :  { %v2844_v48 = vpop.permute.xlu2 %2843 }
0x253a   :  { %v2846_v52 = vmul.f32 %v2844_v48, %v2840_v44 }
0x253c   :  { %2848 = vrot.lane.b32.xlu1 %v2846_v52, %s3432_s25 }
0x256e   :  { %v2882_v63 = vpop.permute.xlu0 %2881 }
0x256f   :  { %v2884_v7 = vmul.f32 %v2882_v63, %v2878_v56 }
0x2571   :  { %2886 = vrot.lane.b32.xlu2 %v2884_v7, %s3432_s25 }
0x25ae   :  { %v2849_v35 = vpop.permute.xlu1 %2848 }
0x25af   :  { %v2851_v1 = vadd.f32 %v2849_v35, %v2841_v34 }
0x25b1   :  { %3374 = vtanh.f32 %v2851_v1 }
0x25b7   :  { %v3375_v14 = vpop.eup %3374 }
0x25b8   :  { %2854 = vrot.lane.b32.xlu0 %v3375_v14, %s3432_s25 }
0x25cb   :  { %v2887_v13 = vpop.permute.xlu2 %2886 }
0x25cc   :  { %v2889_v38 = vadd.f32 %v2887_v13, %v2879_v28 }
0x25ce   :  { %3376 = vtanh.f32 %v2889_v38 }
0x25d4   :  { %v3377_v60 = vpop.eup %3376 }
0x25d5   :  { %2892 = vrot.lane.b32.xlu1 %v3377_v60, %s3432_s25 }
0x262a   :  { %v2855_v10 = vpop.permute.xlu0 %2854 }
0x262b   :  { %v2857_v25 = vmul.f32 %v2855_v10, %v2840_v44  ;;  %v3191_v44 = vld [vmem:[%s4606_s5] ss:$0 sm:$0xff] }
0x262d   :  { %2897 = vrot.lane.b32.xlu2 %v2857_v25, %s3433_s15 }
0x2647   :  { %v2893_v27 = vpop.permute.xlu1 %2892 }
0x2648   :  { %v2895_v49 = vmul.f32 %v2893_v27, %v2878_v56 }
0x264a   :  { %2901 = vrot.lane.b32.xlu0 %v2895_v49, %s3434_s20 }
0x2687   :  { %v2898_v20 = vpop.permute.xlu2 %2897 }
0x26bc   :  { %v2902_v0 = vpop.permute.xlu0 %2901 }
0x26bd   :  { %v2904_v24 = vsel %vm855_vm8, %v2898_v20, %v2902_v0 }
0x26be   :  { %3178 = vmatmul.msk.f32.vlgmr.msra.gmra.mxu0 %vm948_vm9, %v2904_v24 }
0x273b   :  { %v2925_v5 = vpop.f32.mrf.mxu0 }
0x273c   :  { %v2926_v15 = vadd.f32 %v4504_v59, %v2925_v5 }
0x273e   :  { %v3179_v39 = vmul.f32 -1.442695, %v2926_v15 }
0x2740   :  { %3378 = vpow2.f32 %v3179_v39 }
0x2746   :  { %v3379_v33 = vpop.eup %3378 }
0x2747   :  { %v2931_v57 = vadd.f32 1.0, %v3379_v33 }
0x2749   :  { %3380 = vrcp.f32 %v2931_v57  ;;  %v2943_v4 = vand.u32 2147483648, %v2931_v57  ;;  %v2941_v37 = vand.u32 2147483647, %v2931_v57  ;;  %vm2937_vm14 = vweird.f32 %v2931_v57 }
0x274b   :  { %v2944_v47 = vor.u32 1.1754944e-38, %v2943_v4  ;;  %vm2942_vm9 = vcmp.eq.f32.partialorder %v2941_v37, 8.507059e+37 }
0x274f   :  { %v3381_v29 = vpop.eup %3380 }
0x2750   :  { %v2933_v30 = vmul.f32 %v3381_v29, %v2931_v57  ;;  %vm2938_vm13 = vweird.f32 %v3381_v29 }
0x2751   :  { %vm2939_vm15 = vmor %vm2937_vm14, %vm2938_vm13 }
0x2752   :  { %v2934_v8 = vsub.f32 1.0, %v2933_v30 }
0x2754   :  { %v2935_v12 = vmul.f32 %v3381_v29, %v2934_v8 }
0x2756   :  { %v2936_v26 = vadd.f32 %v3381_v29, %v2935_v12 }
0x2758   :  { %v2940_v54 = vsel %vm2939_vm15, %v3381_v29, %v2936_v26 }
0x2759   :  { %v2945_v16 = vsel %vm2942_vm9, %v2944_v47, %v2940_v54 }
0x275a   :  { %v2947_v59 = vmul.f32 %v2945_v16, %v3774_v17  ;;  %v2968_v17 = vld [vmem:[%s4605_s4 + $0x10] sm:$0xff] }
0x275b   :  { %2992 = vmatpush.msrb.mxu1 %v2968_v17 }
0x275c   :  { %v2948_v61 = vadd.f32 %v2947_v59, %v3778_v21  ;;  %v2967_v21 = vld [vmem:[%s4605_s4 + $0x8] sm:$0xff] }
0x275d   :  { %2993 = vmatpush.msrb.mxu1 %v2967_v21 }
0x275e   :  { %2951 = vrot.lane.b32.xlu1 %v2948_v61, %s3432_s25  ;;  %v2949_v23 = vmul.f32 %v2948_v61, %v2889_v38 }
0x275f   :  { %2994 = vmatpush.msrb.mxu1 %v2966_v51 }
0x27d0   :  { %v2952_v22 = vpop.permute.xlu1 %2951 }
0x27d1   :  { %v2954_v53 = vmul.f32 %v2952_v22, %v2948_v61 }
0x27d3   :  { %2956 = vrot.lane.b32.xlu2 %v2954_v53, %s3432_s25 }
0x282d   :  { %v2957_v45 = vpop.permute.xlu2 %2956 }
0x282e   :  { %v2959_v31 = vadd.f32 %v2957_v45, %v2949_v23 }
0x2830   :  { %3382 = vtanh.f32 %v2959_v31 }
0x2836   :  { %v3383_v32 = vpop.eup %3382 }
0x2837   :  { %2962 = vrot.lane.b32.xlu0 %v3383_v32, %s3432_s25 }
0x28a9   :  { %v2963_v6 = vpop.permute.xlu0 %2962 }
0x28aa   :  { %v2965_v55 = vmul.f32 %v2963_v6, %v2948_v61 }
0x28ac   :  { %2975 = vrot.lane.b32.xlu1 %v2965_v55, %s3433_s15 }
0x291e   :  { %v2976_v41 = vpop.permute.xlu1 %2975 }
0x291f   :  { %3180 = vmatmul.msk.f32.vlgmr.msrb.gmra.mxu1 %vm855_vm8, %v2976_v41 }
0x299c   :  { %v2996_v43 = vpop.f32.mrf.mxu1 }
0x299d   :  { %v2997_v36 = vadd.f32 %v3191_v44, %v2996_v43 }
0x299f   :  { %2999 = vst.msk [vmem:[#allocation5] sm:$0xff] %vm437_vm2, %v2997_v36 }
0x29a0   :  { %3010 = dma.vmem_to_hbm [thread:$0]  %s3006_s0, 128, %s3008_s23, [#allocation6]  }
0x29a1   :  { %3428 = dma.done.wait [#allocation6], 128  }
0x29a2   :  { %3429 = vsyncadd [#allocation6], 4294967168 }
0x29a3   :  { %3015 = vsyncpa [#allocation6], 1 }

</bundles_post_ra>
